<compile_context>
chip_gen: v6e
topology: v6e:2x2x1
jax: 0.10.0
libtpu: 0.0.40
codegen_flags: <defaults>
</compile_context>

<pallas_src>
import functools

import jax
import jax.numpy as jnp
import numpy as np
from jax.experimental import pallas as pl
from jax.experimental.pallas import tpu as pltpu

EPS = 1e-5
LANE = 128


def _round_up(x, m):
    return (x + m - 1) // m * m


def _pick_row_tile(ho, wo, target_rows):
    """Largest divisor of ho whose (rows x wo) tile stays under target_rows."""
    # TODO(synk): relax the "th divides ho" requirement (pl.cdiv + masked tail)
    # so large, generation-tuned row tiles are available for any ho.
    best = 1
    for th in range(1, ho + 1):
        if ho % th == 0 and th * wo <= max(target_rows, wo):
            best = th
    return best


@functools.lru_cache(maxsize=None)
def _vmem_limit_bytes():
    """Generation-aware VMEM budget: ~3/4 of physical VMEM per TensorCore
    (v5e/v6e: 96 MiB of 128; v7x: 48 MiB of 64), conservative fallback."""
    try:
        cap = int(pltpu.get_tpu_info().vmem_capacity_bytes)
    except Exception:
        cap = 64 * 1024 * 1024
    return max(32 * 1024 * 1024, (cap // 4) * 3)


def _compiler_params(semantics):
    return pltpu.CompilerParams(dimension_semantics=semantics,
                                vmem_limit_bytes=_vmem_limit_bytes())


def _resident_spec(block_shape, index_map):
    """Full-sample input block: its block index is constant along the row axis,
    so one VMEM buffer suffices (halves residency of the largest operand)."""
    try:
        return pl.BlockSpec(block_shape, index_map,
                            pipeline_mode=pl.Buffered(1))
    except Exception:  # older jax without pipeline_mode support
        return pl.BlockSpec(block_shape, index_map)


# ---------------------------------------------------------------------------
# Shared im2col helper (runs on values already loaded into vregs)
# ---------------------------------------------------------------------------
def _taps_matmul(window, w, *, th, wo, stride, col0, mm_dtype):
    """window: (span, ncols, cin); returns (f32 matmul acc, bf16 center tap)."""
    cin = window.shape[-1]
    taps = []
    for kh in range(3):
        for kw in range(3):
            t = jax.lax.slice(
                window,
                (kh, col0 + kw, 0),
                (kh + (th - 1) * stride + 1,
                 col0 + kw + (wo - 1) * stride + 1,
                 cin),
                (stride, stride, 1))                     # (th, wo, cin)
            taps.append(t.reshape(th * wo, cin).astype(mm_dtype))
    patch = jnp.concatenate(taps, axis=1)                # (th*wo, 9*cin)
    acc = jnp.dot(patch, w, preferred_element_type=jnp.float32)
    return acc, taps[4]                                  # taps[4] = center tap


# ---------------------------------------------------------------------------
# Kernels
# ---------------------------------------------------------------------------
def _conv3x3_pad_in_kernel(x_ref, w_ref, *rest, stride, has_ds, out_dtype,
                           mm_dtype):
    """3x3 conv (stride s) over one row tile, input pre-padded in the wrapper.
    Optionally fuses the 1x1 stride-s downsample projection (re-uses the
    center im2col tap).  Emits per-row-block BN statistic partials."""
    if has_ds:
        wd_ref, o_ref, s1_ref, s2_ref, r_ref, rs1_ref, rs2_ref = rest
    else:
        o_ref, s1_ref, s2_ref = rest
    th, wo, cout = o_ref.shape[1], o_ref.shape[2], o_ref.shape[3]

    rb = pl.program_id(1)
    row0 = pl.multiple_of(rb * (th * stride), th * stride)
    span = (th - 1) * stride + 3
    window = x_ref[0, pl.ds(row0, span), :, :]           # (span, w+2, cin) f32

    acc, center = _taps_matmul(window, w_ref[...], th=th, wo=wo,
                               stride=stride, col0=0, mm_dtype=mm_dtype)
    o_ref[...] = acc.reshape(1, th, wo, cout).astype(out_dtype)
    # TODO(synk): single-pass E[x^2]-E[x]^2 variance; switch to Welford if
    # activations ever have |mean| >> std.
    s1_ref[...] = jnp.sum(acc, axis=0).reshape(1, 1, 1, cout)
    s2_ref[...] = jnp.sum(acc * acc, axis=0).reshape(1, 1, 1, cout)

    if has_ds:
        racc = jnp.dot(center, wd_ref[...],
                       preferred_element_type=jnp.float32)
        r_ref[...] = racc.reshape(1, th, wo, cout).astype(out_dtype)
        rs1_ref[...] = jnp.sum(racc, axis=0).reshape(1, 1, 1, cout)
        rs2_ref[...] = jnp.sum(racc * racc, axis=0).reshape(1, 1, 1, cout)


def _conv3x3_preact_kernel(x_ref, w_ref, sc_ref, sh_ref,
                           o_ref, s1_ref, s2_ref, xpad_ref, *,
                           padw, out_dtype, mm_dtype):
    """3x3 conv (stride 1, pad 1) with BN+ReLU of the previous layer fused into
    the input read.  Per-sample padded activation lives in VMEM scratch; only
    the halo border is zeroed (interior is fully overwritten)."""
    rb = pl.program_id(1)
    hin, win, cin = x_ref.shape[1], x_ref.shape[2], x_ref.shape[3]
    th, wo, cout = o_ref.shape[1], o_ref.shape[2], o_ref.shape[3]

    @pl.when(rb == 0)
    def _fill():
        zrow = jnp.zeros((1, xpad_ref.shape[1], cin), xpad_ref.dtype)
        zcol = jnp.zeros((xpad_ref.shape[0], 1, cin), xpad_ref.dtype)
        xpad_ref[0:1, :, :] = zrow                       # top halo row
        xpad_ref[hin + 1:hin + 2, :, :] = zrow           # bottom halo row
        xpad_ref[:, padw - 1:padw, :] = zcol             # left halo column
        xpad_ref[:, padw + win:padw + win + 1, :] = zcol  # right halo column
        sc = sc_ref[...].reshape(1, 1, cin)
        sh = sh_ref[...].reshape(1, 1, cin)
        xv = jnp.maximum(x_ref[0].astype(jnp.float32) * sc + sh, 0.0)
        xpad_ref[1:hin + 1, padw:padw + win, :] = xv.astype(xpad_ref.dtype)

    row0 = pl.multiple_of(rb * th, th)
    window = xpad_ref[pl.ds(row0, th + 2), :, :]
    acc, _ = _taps_matmul(window, w_ref[...], th=th, wo=wo, stride=1,
                          col0=padw - 1, mm_dtype=mm_dtype)
    o_ref[...] = acc.reshape(1, th, wo, cout).astype(out_dtype)
    s1_ref[...] = jnp.sum(acc, axis=0).reshape(1, 1, 1, cout)
    s2_ref[...] = jnp.sum(acc * acc, axis=0).reshape(1, 1, 1, cout)


def _bn_add_relu_kernel(a_ref, asc_ref, ash_ref, r_ref, rsc_ref, rsh_ref,
                        o_ref):
    """out = relu(BN2(conv2) + BN_d(residual)), per-channel affines, f32 out."""
    c = o_ref.shape[3]
    asc = asc_ref[...].reshape(1, 1, 1, c)
    ash = ash_ref[...].reshape(1, 1, 1, c)
    rsc = rsc_ref[...].reshape(1, 1, 1, c)
    rsh = rsh_ref[...].reshape(1, 1, 1, c)
    y = (a_ref[...].astype(jnp.float32) * asc + ash
         + r_ref[...].astype(jnp.float32) * rsc + rsh)
    o_ref[...] = jnp.maximum(y, 0.0)


# ---------------------------------------------------------------------------
# pallas_call wrappers
# ---------------------------------------------------------------------------
def _conv3x3_pad_in(xpadded, w_flat, wd, *, stride, ho, wo, cout, th,
                    out_dtype):
    n, hp, wp, cin = xpadded.shape
    num_rb = ho // th
    has_ds = wd is not None
    mm_dtype = w_flat.dtype
    kernel = functools.partial(_conv3x3_pad_in_kernel, stride=stride,
                               has_ds=has_ds, out_dtype=out_dtype,
                               mm_dtype=mm_dtype)
    out_shape = [jax.ShapeDtypeStruct((n, ho, wo, cout), out_dtype),
                 jax.ShapeDtypeStruct((n, num_rb, 1, cout), jnp.float32),
                 jax.ShapeDtypeStruct((n, num_rb, 1, cout), jnp.float32)]
    out_specs = [pl.BlockSpec((1, th, wo, cout), lambda i, j: (i, j, 0, 0)),
                 pl.BlockSpec((1, 1, 1, cout), lambda i, j: (i, j, 0, 0)),
                 pl.BlockSpec((1, 1, 1, cout), lambda i, j: (i, j, 0, 0))]
    in_specs = [_resident_spec((1, hp, wp, cin), lambda i, j: (i, 0, 0, 0)),
                pl.BlockSpec((9 * cin, cout), lambda i, j: (0, 0))]
    args = [xpadded, w_flat]
    if has_ds:
        in_specs.append(pl.BlockSpec((cin, cout), lambda i, j: (0, 0)))
        args.append(wd)
        out_shape += [jax.ShapeDtypeStruct((n, ho, wo, cout), out_dtype),
                      jax.ShapeDtypeStruct((n, num_rb, 1, cout), jnp.float32),
                      jax.ShapeDtypeStruct((n, num_rb, 1, cout), jnp.float32)]
        out_specs += [pl.BlockSpec((1, th, wo, cout), lambda i, j: (i, j, 0, 0)),
                      pl.BlockSpec((1, 1, 1, cout), lambda i, j: (i, j, 0, 0)),
                      pl.BlockSpec((1, 1, 1, cout), lambda i, j: (i, j, 0, 0))]
    return pl.pallas_call(
        kernel,
        grid=(n, num_rb),
        out_shape=tuple(out_shape),
        in_specs=in_specs,
        out_specs=tuple(out_specs),
        compiler_params=_compiler_params(("parallel", "parallel")),
    )(*args)


def _conv3x3_preact(x, w_flat, in_scale, in_shift, *, ho, wo, cout, th,
                    out_dtype, padw):
    n, hin, win, cin = x.shape
    num_rb = ho // th
    mm_dtype = w_flat.dtype
    kernel = functools.partial(_conv3x3_preact_kernel, padw=padw,
                               out_dtype=out_dtype, mm_dtype=mm_dtype)
    return pl.pallas_call(
        kernel,
        grid=(n, num_rb),
        out_shape=(
            jax.ShapeDtypeStruct((n, ho, wo, cout), out_dtype),
            jax.ShapeDtypeStruct((n, num_rb, 1, cout), jnp.float32),
            jax.ShapeDtypeStruct((n, num_rb, 1, cout), jnp.float32),
        ),
        in_specs=[
            _resident_spec((1, hin, win, cin), lambda i, j: (i, 0, 0, 0)),
            pl.BlockSpec((9 * cin, cout), lambda i, j: (0, 0)),
            pl.BlockSpec((1, cin), lambda i, j: (0, 0)),
            pl.BlockSpec((1, cin), lambda i, j: (0, 0)),
        ],
        out_specs=(
            pl.BlockSpec((1, th, wo, cout), lambda i, j: (i, j, 0, 0)),
            pl.BlockSpec((1, 1, 1, cout), lambda i, j: (i, j, 0, 0)),
            pl.BlockSpec((1, 1, 1, cout), lambda i, j: (i, j, 0, 0)),
        ),
        scratch_shapes=[
            pltpu.VMEM((hin + 2, win + padw + 1, cin), mm_dtype)],
        compiler_params=_compiler_params(("parallel", "arbitrary")),
    )(x, w_flat, in_scale, in_shift)


def _bn_add_relu(a, a_scale, a_shift, r, r_scale, r_shift, *, th):
    n, ho, wo, c = a.shape
    num_rb = ho // th
    return pl.pallas_call(
        _bn_add_relu_kernel,
        grid=(n, num_rb),
        out_shape=jax.ShapeDtypeStruct((n, ho, wo, c), jnp.float32),
        in_specs=[
            pl.BlockSpec((1, th, wo, c), lambda i, j: (i, j, 0, 0)),
            pl.BlockSpec((1, c), lambda i, j: (0, 0)),
            pl.BlockSpec((1, c), lambda i, j: (0, 0)),
            pl.BlockSpec((1, th, wo, c), lambda i, j: (i, j, 0, 0)),
            pl.BlockSpec((1, c), lambda i, j: (0, 0)),
            pl.BlockSpec((1, c), lambda i, j: (0, 0)),
        ],
        out_specs=pl.BlockSpec((1, th, wo, c), lambda i, j: (i, j, 0, 0)),
        compiler_params=_compiler_params(("parallel", "parallel")),
    )(a, a_scale, a_shift, r, r_scale, r_shift)


def _affine_from_stats(s1, s2, gamma, beta, count):
    """Per-channel scale/shift from sum & sum-of-squares (batch BN, eps=1e-5)."""
    tot1 = jnp.sum(s1, axis=(0, 1, 2))                   # (C,)
    tot2 = jnp.sum(s2, axis=(0, 1, 2))
    mean = tot1 / count
    var = jnp.maximum(tot2 / count - mean * mean, 0.0)
    scale = gamma.reshape(-1) * jax.lax.rsqrt(var + EPS)
    shift = beta.reshape(-1) - mean * scale
    return scale.reshape(1, -1), shift.reshape(1, -1)


# ---------------------------------------------------------------------------
# Public wrapper (NCHW in / NCHW out, like the PyTorch module)
# ---------------------------------------------------------------------------
def basic_block_forward(x_nchw, params, *, stride, has_downsample,
                        target_rows=1024, compute_dtype=jnp.bfloat16):
    # TODO(synk): the NCHW<->NHWC transposes and channel zero-padding are plain
    # XLA glue at the module boundary; keep NHWC end-to-end if the caller can.
    x = jnp.transpose(x_nchw, (0, 2, 3, 1)).astype(jnp.float32)   # NHWC
    n, h, w, cin = x.shape
    planes = params["w1"].shape[-1]
    if not has_downsample and (stride != 1 or cin != planes):
        raise ValueError("identity shortcut requires stride == 1 and "
                         "inplanes == planes")

    cin_p = _round_up(max(cin, LANE), LANE)
    pp = _round_up(max(planes, LANE), LANE)
    ho = (h - 1) // stride + 1
    wo = (w - 1) // stride + 1
    th = _pick_row_tile(ho, wo, target_rows)
    count = float(n * ho * wo)

    mm_dtype = compute_dtype                 # matmul operand dtype
    inter_dtype = compute_dtype              # raw conv output storage dtype
    padw = 16 if inter_dtype == jnp.bfloat16 else 8

    # Lane-dense channel padding + spatial halo (1 px) done once in XLA.
    xp = jnp.pad(x, ((0, 0), (0, 0), (0, 0), (0, cin_p - cin)))
    xp_halo = jnp.pad(xp, ((0, 0), (1, 1), (1, 1), (0, 0)))

    # Weights: pad, flatten to (9*Cin, Cout), cast to the matmul dtype ONCE.
    w1 = jnp.pad(params["w1"],
                 ((0, 0), (0, 0), (0, cin_p - cin), (0, pp - planes))
                 ).reshape(9 * cin_p, pp).astype(mm_dtype)
    w2 = jnp.pad(params["w2"],
                 ((0, 0), (0, 0), (0, pp - planes), (0, pp - planes))
                 ).reshape(9 * pp, pp).astype(mm_dtype)
    wd = None
    if has_downsample:
        wd = jnp.pad(params["wd"],
                     ((0, cin_p - cin), (0, pp - planes))).astype(mm_dtype)

    def _pad_vec(v):
        return jnp.pad(v.reshape(1, -1), ((0, 0), (0, pp - planes)))

    g1, b1 = _pad_vec(params["g1"]), _pad_vec(params["b1"])
    g2, b2 = _pad_vec(params["g2"]), _pad_vec(params["b2"])

    # conv1 (3x3, stride) [+ fused 1x1 downsample]: raw outputs + BN partials.
    outs = _conv3x3_pad_in(xp_halo, w1, wd, stride=stride, ho=ho, wo=wo,
                           cout=pp, th=th, out_dtype=inter_dtype)
    if has_downsample:
        conv1_raw, s1a, s1b, res_raw, sda, sdb = outs
    else:
        conv1_raw, s1a, s1b = outs
    scale1, shift1 = _affine_from_stats(s1a, s1b, g1, b1, count)

    # conv2 (3x3, stride 1); BN1 + ReLU fused into its input read.
    conv2_raw, s2a, s2b = _conv3x3_preact(
        conv1_raw, w2, scale1, shift1, ho=ho, wo=wo, cout=pp, th=th,
        out_dtype=inter_dtype, padw=padw)
    scale2, shift2 = _affine_from_stats(s2a, s2b, g2, b2, count)

    if has_downsample:
        gd, bd = _pad_vec(params["gd"]), _pad_vec(params["bd"])
        scale_r, shift_r = _affine_from_stats(sda, sdb, gd, bd, count)
        res = res_raw
    else:
        res = xp                              # identity shortcut (f32)
        scale_r = jnp.ones((1, pp), jnp.float32)
        shift_r = jnp.zeros((1, pp), jnp.float32)

    out = _bn_add_relu(conv2_raw, scale2, shift2, res, scale_r, shift_r, th=th)
    out = out[..., :planes]
    return jnp.transpose(out, (0, 3, 1, 2))   # back to NCHW


# ---------------------------------------------------------------------------
# Pure-JAX reference (mirrors the PyTorch forward, NCHW, full f32 precision)
# ---------------------------------------------------------------------------
def ref_basic_block(x_nchw, params, *, stride, has_downsample):
    def conv(x, w_oihw, s, pad):
        return jax.lax.conv_general_dilated(
            x, w_oihw, (s, s), [(pad, pad), (pad, pad)],
            dimension_numbers=("NCHW", "OIHW", "NCHW"),
            precision=jax.lax.Precision.HIGHEST)

    def bn(x, g, b):
        mean = x.mean(axis=(0, 2, 3), keepdims=True)
        var = ((x - mean) ** 2).mean(axis=(0, 2, 3), keepdims=True)
        return (x - mean) * jax.lax.rsqrt(var + EPS) * g[None, :, None, None] \
            + b[None, :, None, None]

    w1 = jnp.transpose(params["w1"], (3, 2, 0, 1))   # HWIO -> OIHW
    w2 = jnp.transpose(params["w2"], (3, 2, 0, 1))
    out = jax.nn.relu(bn(conv(x_nchw, w1, stride, 1), params["g1"], params["b1"]))
    out = bn(conv(out, w2, 1, 1), params["g2"], params["b2"])
    if has_downsample:
        wd = jnp.transpose(params["wd"], (1, 0))[:, :, None, None]
        residual = bn(conv(x_nchw, wd, stride, 0), params["gd"], params["bd"])
    else:
        residual = x_nchw
    return jax.nn.relu(out + residual)


def make_params(key, inplanes, planes, has_downsample):
    ks = jax.random.split(key, 8)
    p = {
        "w1": 0.1 * jax.random.normal(ks[0], (3, 3, inplanes, planes), jnp.float32),
        "g1": 1.0 + 0.1 * jax.random.normal(ks[1], (planes,), jnp.float32),
        "b1": 0.1 * jax.random.normal(ks[2], (planes,), jnp.float32),
        "w2": 0.1 * jax.random.normal(ks[3], (3, 3, planes, planes), jnp.float32),
        "g2": 1.0 + 0.1 * jax.random.normal(ks[4], (planes,), jnp.float32),
        "b2": 0.1 * jax.random.normal(ks[5], (planes,), jnp.float32),
    }
    if has_downsample:
        p["wd"] = 0.1 * jax.random.normal(ks[6], (inplanes, planes), jnp.float32)
        p["gd"] = 1.0 + 0.05 * jax.random.normal(ks[7], (planes,), jnp.float32)
        p["bd"] = 0.05 * jax.random.normal(ks[7], (planes,), jnp.float32)
    return p


if __name__ == "__main__":
    key = jax.random.PRNGKey(0)
    k_x1, k_p1, k_x2, k_p2 = jax.random.split(key, 4)

    # Case 1: identity shortcut (inplanes == planes, stride=1), bf16 compute.
    # Small target_rows forces 2 row blocks per sample (exercises the
    # per-row-block stats and the persistent conv2 pad scratch).
    x1 = jax.random.normal(k_x1, (2, 8, 16, 16), jnp.float32)
    p1 = make_params(k_p1, 8, 8, has_downsample=False)
    fwd1 = jax.jit(functools.partial(basic_block_forward, stride=1,
                                     has_downsample=False, target_rows=128))
    out1 = jax.block_until_ready(fwd1(x1, p1))
    ref1 = ref_basic_block(x1, p1, stride=1, has_downsample=False)
    assert out1.shape == (2, 8, 16, 16)
    np.testing.assert_allclose(np.asarray(out1), np.asarray(ref1),
                               rtol=8e-2, atol=8e-2)

    # Case 2: projection shortcut (stride=2, fused 1x1 downsample), bf16.
    x2 = jax.random.normal(k_x2, (2, 4, 16, 16), jnp.float32)
    p2 = make_params(k_p2, 4, 8, has_downsample=True)
    fwd2 = jax.jit(functools.partial(basic_block_forward, stride=2,
                                     has_downsample=True, target_rows=32))
    out2 = jax.block_until_ready(fwd2(x2, p2))
    ref2 = ref_basic_block(x2, p2, stride=2, has_downsample=True)
    assert out2.shape == (2, 8, 8, 8)
    np.testing.assert_allclose(np.asarray(out2), np.asarray(ref2),
                               rtol=8e-2, atol=8e-2)

    # Case 3: same config in f32 compute mode (tight structural exactness).
    fwd3 = jax.jit(functools.partial(basic_block_forward, stride=2,
                                     has_downsample=True, target_rows=32,
                                     compute_dtype=jnp.float32))
    out3 = jax.block_until_ready(fwd3(x2, p2))
    np.testing.assert_allclose(np.asarray(out3), np.asarray(ref2),
                               rtol=1e-3, atol=1e-3)

    print("KERNEL_OK")
</pallas_src>

<mosaic_0001>
module attributes {stable_mosaic.version = 11 : i64} {
  func.func @_conv3x3_preact_kernel(%arg0: i32, %arg1: i32, %arg2: memref<1x16x16x128xbf16, #tpu.memory_space<vmem>>, %arg3: memref<1152x128xbf16, #tpu.memory_space<vmem>>, %arg4: memref<1x128xf32, #tpu.memory_space<vmem>>, %arg5: memref<1x128xf32, #tpu.memory_space<vmem>>, %arg6: memref<1x8x16x128xbf16, #tpu.memory_space<vmem>>, %arg7: memref<1x1x1x128xf32, #tpu.memory_space<vmem>>, %arg8: memref<1x1x1x128xf32, #tpu.memory_space<vmem>>, %arg9: memref<18x33x128xbf16, #tpu.memory_space<vmem>>) attributes {dimension_semantics = [#tpu.dimension_semantics<parallel>, #tpu.dimension_semantics<arbitrary>], iteration_bounds = array<i64: 2, 2>, scalar_prefetch = 0 : i64, scratch_operands = 1 : i64, tpu.core_type = #tpu.core_type<tc>, window_params = [{pipeline_mode = #tpu.pipeline_mode<synchronous>, transform_indices = @transform_0, window_bounds = array<i64: 1, 16, 16, 128>}, {pipeline_mode = #tpu.pipeline_mode<synchronous>, transform_indices = @transform_1, window_bounds = array<i64: 1152, 128>}, {pipeline_mode = #tpu.pipeline_mode<synchronous>, transform_indices = @transform_2, window_bounds = array<i64: 1, 128>}, {pipeline_mode = #tpu.pipeline_mode<synchronous>, transform_indices = @transform_3, window_bounds = array<i64: 1, 128>}, {transform_indices = @transform_4, window_bounds = array<i64: 1, 8, 16, 128>}, {transform_indices = @transform_5, window_bounds = array<i64: 1, 1, 1, 128>}, {transform_indices = @transform_6, window_bounds = array<i64: 1, 1, 1, 128>}]} {
    %c0_i32 = arith.constant 0 : i32
    %0 = arith.cmpi eq, %arg1, %c0_i32 : i32
    %1 = arith.extui %0 : i1 to i32
    %c0_i32_0 = arith.constant 0 : i32
    %2 = arith.cmpi ne, %1, %c0_i32_0 : i32
    scf.if %2 {
      %cst_18 = arith.constant 0.000000e+00 : bf16
      %38 = vector.broadcast %cst_18 : bf16 to vector<1x33x128xbf16>
      %cst_19 = arith.constant 0.000000e+00 : bf16
      %39 = vector.broadcast %cst_19 : bf16 to vector<18x1x128xbf16>
      %c0_20 = arith.constant 0 : index
      %c0_21 = arith.constant 0 : index
      %c0_22 = arith.constant 0 : index
      %40 = vector.load %arg9[%c0_20, %c0_21, %c0_22] : memref<18x33x128xbf16, #tpu.memory_space<vmem>>, vector<1x33x128xbf16>
      tpu.vector_store %arg9[%c0_20, %c0_21, %c0_22], %38 {strides = array<i32>} : memref<18x33x128xbf16, #tpu.memory_space<vmem>>, vector<1x33x128xbf16>,
      %c17 = arith.constant 17 : index
      %c0_23 = arith.constant 0 : index
      %c0_24 = arith.constant 0 : index
      %41 = vector.load %arg9[%c17, %c0_23, %c0_24] : memref<18x33x128xbf16, #tpu.memory_space<vmem>>, vector<1x33x128xbf16>
      tpu.vector_store %arg9[%c17, %c0_23, %c0_24], %38 {strides = array<i32>} : memref<18x33x128xbf16, #tpu.memory_space<vmem>>, vector<1x33x128xbf16>,
      %c0_25 = arith.constant 0 : index
      %c15 = arith.constant 15 : index
      %c0_26 = arith.constant 0 : index
      %42 = vector.load %arg9[%c0_25, %c15, %c0_26] : memref<18x33x128xbf16, #tpu.memory_space<vmem>>, vector<18x1x128xbf16>
      tpu.vector_store %arg9[%c0_25, %c15, %c0_26], %39 {strides = array<i32>} : memref<18x33x128xbf16, #tpu.memory_space<vmem>>, vector<18x1x128xbf16>,
      %c0_27 = arith.constant 0 : index
      %c32 = arith.constant 32 : index
      %c0_28 = arith.constant 0 : index
      %43 = vector.load %arg9[%c0_27, %c32, %c0_28] : memref<18x33x128xbf16, #tpu.memory_space<vmem>>, vector<18x1x128xbf16>
      tpu.vector_store %arg9[%c0_27, %c32, %c0_28], %39 {strides = array<i32>} : memref<18x33x128xbf16, #tpu.memory_space<vmem>>, vector<18x1x128xbf16>,
      %c0_29 = arith.constant 0 : index
      %c0_30 = arith.constant 0 : index
      %44 = vector.load %arg4[%c0_29, %c0_30] : memref<1x128xf32, #tpu.memory_space<vmem>>, vector<1x128xf32>
      %45 = vector.shape_cast %44 : vector<1x128xf32> to vector<1x1x128xf32>
      %c0_31 = arith.constant 0 : index
      %c0_32 = arith.constant 0 : index
      %46 = vector.load %arg5[%c0_31, %c0_32] : memref<1x128xf32, #tpu.memory_space<vmem>>, vector<1x128xf32>
      %47 = vector.shape_cast %46 : vector<1x128xf32> to vector<1x1x128xf32>
      %c0_33 = arith.constant 0 : index
      %c0_34 = arith.constant 0 : index
      %c0_35 = arith.constant 0 : index
      %c0_36 = arith.constant 0 : index
      %48 = vector.load %arg2[%c0_33, %c0_34, %c0_35, %c0_36] : memref<1x16x16x128xbf16, #tpu.memory_space<vmem>>, vector<1x16x16x128xbf16>
      %49 = vector.shape_cast %48 : vector<1x16x16x128xbf16> to vector<16x16x128xbf16>
      %50 = arith.extf %49 : vector<16x16x128xbf16> to vector<16x16x128xf32>
      %51 = vector.broadcast %45 : vector<1x1x128xf32> to vector<16x16x128xf32>
      %52 = arith.mulf %50, %51 : vector<16x16x128xf32>
      %53 = vector.broadcast %47 : vector<1x1x128xf32> to vector<16x16x128xf32>
      %54 = arith.addf %52, %53 : vector<16x16x128xf32>
      %cst_37 = arith.constant 0.000000e+00 : f32
      %55 = vector.broadcast %cst_37 : f32 to vector<16x16x128xf32>
      %56 = arith.maximumf %54, %55 : vector<16x16x128xf32>
      %57 = arith.truncf %56 : vector<16x16x128xf32> to vector<16x16x128xbf16>
      %c1 = arith.constant 1 : index
      %c16 = arith.constant 16 : index
      %c0_38 = arith.constant 0 : index
      %58 = vector.load %arg9[%c1, %c16, %c0_38] : memref<18x33x128xbf16, #tpu.memory_space<vmem>>, vector<16x16x128xbf16>
      tpu.vector_store %arg9[%c1, %c16, %c0_38], %57 {strides = array<i32>} : memref<18x33x128xbf16, #tpu.memory_space<vmem>>, vector<16x16x128xbf16>,
    } else {
    }
    %c8_i32 = arith.constant 8 : i32
    %3 = arith.muli %arg1, %c8_i32 : i32
    %4 = tpu.assume_multiple %3, 8 : i32
    %5 = arith.index_cast %4 : i32 to index
    %c0 = arith.constant 0 : index
    %c0_1 = arith.constant 0 : index
    %6 = vector.load %arg9[%5, %c0, %c0_1] : memref<18x33x128xbf16, #tpu.memory_space<vmem>>, vector<10x33x128xbf16>
    %c0_2 = arith.constant 0 : index
    %c0_3 = arith.constant 0 : index
    %7 = vector.load %arg3[%c0_2, %c0_3] : memref<1152x128xbf16, #tpu.memory_space<vmem>>, vector<1152x128xbf16>
    %8 = vector.extract_strided_slice %6 {offsets = [0, 15, 0], sizes = [8, 16, 128], strides = [1, 1, 1]} : vector<10x33x128xbf16> to vector<8x16x128xbf16>
    %9 = vector.shape_cast %8 : vector<8x16x128xbf16> to vector<128x128xbf16>
    %10 = vector.extract_strided_slice %6 {offsets = [0, 16, 0], sizes = [8, 16, 128], strides = [1, 1, 1]} : vector<10x33x128xbf16> to vector<8x16x128xbf16>
    %11 = vector.shape_cast %10 : vector<8x16x128xbf16> to vector<128x128xbf16>
    %12 = vector.extract_strided_slice %6 {offsets = [0, 17, 0], sizes = [8, 16, 128], strides = [1, 1, 1]} : vector<10x33x128xbf16> to vector<8x16x128xbf16>
    %13 = vector.shape_cast %12 : vector<8x16x128xbf16> to vector<128x128xbf16>
    %14 = vector.extract_strided_slice %6 {offsets = [1, 15, 0], sizes = [8, 16, 128], strides = [1, 1, 1]} : vector<10x33x128xbf16> to vector<8x16x128xbf16>
    %15 = vector.shape_cast %14 : vector<8x16x128xbf16> to vector<128x128xbf16>
    %16 = vector.extract_strided_slice %6 {offsets = [1, 16, 0], sizes = [8, 16, 128], strides = [1, 1, 1]} : vector<10x33x128xbf16> to vector<8x16x128xbf16>
    %17 = vector.shape_cast %16 : vector<8x16x128xbf16> to vector<128x128xbf16>
    %18 = vector.extract_strided_slice %6 {offsets = [1, 17, 0], sizes = [8, 16, 128], strides = [1, 1, 1]} : vector<10x33x128xbf16> to vector<8x16x128xbf16>
    %19 = vector.shape_cast %18 : vector<8x16x128xbf16> to vector<128x128xbf16>
    %20 = vector.extract_strided_slice %6 {offsets = [2, 15, 0], sizes = [8, 16, 128], strides = [1, 1, 1]} : vector<10x33x128xbf16> to vector<8x16x128xbf16>
    %21 = vector.shape_cast %20 : vector<8x16x128xbf16> to vector<128x128xbf16>
    %22 = vector.extract_strided_slice %6 {offsets = [2, 16, 0], sizes = [8, 16, 128], strides = [1, 1, 1]} : vector<10x33x128xbf16> to vector<8x16x128xbf16>
    %23 = vector.shape_cast %22 : vector<8x16x128xbf16> to vector<128x128xbf16>
    %24 = vector.extract_strided_slice %6 {offsets = [2, 17, 0], sizes = [8, 16, 128], strides = [1, 1, 1]} : vector<10x33x128xbf16> to vector<8x16x128xbf16>
    %25 = vector.shape_cast %24 : vector<8x16x128xbf16> to vector<128x128xbf16>
    %26 = tpu.concatenate %9, %11, %13, %15, %17, %19, %21, %23, %25 in 1 : vector<128x128xbf16>, vector<128x128xbf16>, vector<128x128xbf16>, vector<128x128xbf16>, vector<128x128xbf16>, vector<128x128xbf16>, vector<128x128xbf16>, vector<128x128xbf16>, vector<128x128xbf16> -> vector<128x1152xbf16>
    %cst = arith.constant dense<0.000000e+00> : vector<128x128xf32>
    %27 = tpu.matmul %26, %7, %cst {dimension_numbers = #tpu.dot_dimension_numbers<[1], [0], [0], [1], [0, 0, 1, 1], [], []>} : vector<128x1152xbf16>, vector<1152x128xbf16>, vector<128x128xf32> -> vector<128x128xf32>
    %28 = vector.shape_cast %27 : vector<128x128xf32> to vector<1x8x16x128xf32>
    %29 = arith.truncf %28 : vector<1x8x16x128xf32> to vector<1x8x16x128xbf16>
    %c0_4 = arith.constant 0 : index
    %c0_5 = arith.constant 0 : index
    %c0_6 = arith.constant 0 : index
    %c0_7 = arith.constant 0 : index
    %30 = vector.load %arg6[%c0_4, %c0_5, %c0_6, %c0_7] : memref<1x8x16x128xbf16, #tpu.memory_space<vmem>>, vector<1x8x16x128xbf16>
    tpu.vector_store %arg6[%c0_4, %c0_5, %c0_6, %c0_7], %29 {strides = array<i32>} : memref<1x8x16x128xbf16, #tpu.memory_space<vmem>>, vector<1x8x16x128xbf16>,
    %cst_8 = arith.constant dense<0.000000e+00> : vector<128xf32>
    %31 = vector.multi_reduction <add>, %27, %cst_8 [0] : vector<128x128xf32> to vector<128xf32>
    %32 = vector.shape_cast %31 : vector<128xf32> to vector<1x1x1x128xf32>
    %c0_9 = arith.constant 0 : index
    %c0_10 = arith.constant 0 : index
    %c0_11 = arith.constant 0 : index
    %c0_12 = arith.constant 0 : index
    %33 = vector.load %arg7[%c0_9, %c0_10, %c0_11, %c0_12] : memref<1x1x1x128xf32, #tpu.memory_space<vmem>>, vector<1x1x1x128xf32>
    tpu.vector_store %arg7[%c0_9, %c0_10, %c0_11, %c0_12], %32 {strides = array<i32>} : memref<1x1x1x128xf32, #tpu.memory_space<vmem>>, vector<1x1x1x128xf32>,
    %34 = arith.mulf %27, %27 : vector<128x128xf32>
    %cst_13 = arith.constant dense<0.000000e+00> : vector<128xf32>
    %35 = vector.multi_reduction <add>, %34, %cst_13 [0] : vector<128x128xf32> to vector<128xf32>
    %36 = vector.shape_cast %35 : vector<128xf32> to vector<1x1x1x128xf32>
    %c0_14 = arith.constant 0 : index
    %c0_15 = arith.constant 0 : index
    %c0_16 = arith.constant 0 : index
    %c0_17 = arith.constant 0 : index
    %37 = vector.load %arg8[%c0_14, %c0_15, %c0_16, %c0_17] : memref<1x1x1x128xf32, #tpu.memory_space<vmem>>, vector<1x1x1x128xf32>
    tpu.vector_store %arg8[%c0_14, %c0_15, %c0_16, %c0_17], %36 {strides = array<i32>} : memref<1x1x1x128xf32, #tpu.memory_space<vmem>>, vector<1x1x1x128xf32>,
    return
  }
  func.func @transform_0(%arg0: i32, %arg1: i32) -> (i32, i32, i32, i32) {
    %c0_i32 = arith.constant 0 : i32
    %c0_i32_0 = arith.constant 0 : i32
    %c0_i32_1 = arith.constant 0 : i32
    %c0_i32_2 = arith.constant 0 : i32
    return %arg0, %c0_i32, %c0_i32_0, %c0_i32_1 : i32, i32, i32, i32
  }
  func.func @transform_1(%arg0: i32, %arg1: i32) -> (i32, i32) {
    %c0_i32 = arith.constant 0 : i32
    %c0_i32_0 = arith.constant 0 : i32
    %c0_i32_1 = arith.constant 0 : i32
    return %c0_i32, %c0_i32_0 : i32, i32
  }
  func.func @transform_2(%arg0: i32, %arg1: i32) -> (i32, i32) {
    %c0_i32 = arith.constant 0 : i32
    %c0_i32_0 = arith.constant 0 : i32
    %c0_i32_1 = arith.constant 0 : i32
    return %c0_i32, %c0_i32_0 : i32, i32
  }
  func.func @transform_3(%arg0: i32, %arg1: i32) -> (i32, i32) {
    %c0_i32 = arith.constant 0 : i32
    %c0_i32_0 = arith.constant 0 : i32
    %c0_i32_1 = arith.constant 0 : i32
    return %c0_i32, %c0_i32_0 : i32, i32
  }
  func.func @transform_4(%arg0: i32, %arg1: i32) -> (i32, i32, i32, i32) {
    %c0_i32 = arith.constant 0 : i32
    %c0_i32_0 = arith.constant 0 : i32
    %c0_i32_1 = arith.constant 0 : i32
    return %arg0, %arg1, %c0_i32, %c0_i32_0 : i32, i32, i32, i32
  }
  func.func @transform_5(%arg0: i32, %arg1: i32) -> (i32, i32, i32, i32) {
    %c0_i32 = arith.constant 0 : i32
    %c0_i32_0 = arith.constant 0 : i32
    %c0_i32_1 = arith.constant 0 : i32
    return %arg0, %arg1, %c0_i32, %c0_i32_0 : i32, i32, i32, i32
  }
  func.func @transform_6(%arg0: i32, %arg1: i32) -> (i32, i32, i32, i32) {
    %c0_i32 = arith.constant 0 : i32
    %c0_i32_0 = arith.constant 0 : i32
    %c0_i32_1 = arith.constant 0 : i32
    return %arg0, %arg1, %c0_i32, %c0_i32_0 : i32, i32, i32, i32
  }
}

module attributes {stable_mosaic.version = 11 : i64} {
  func.func @_conv3x3_pad_in_kernel(%arg0: i32, %arg1: i32, %arg2: memref<1x18x18x128xf32, #tpu.memory_space<vmem>>, %arg3: memref<1152x128xbf16, #tpu.memory_space<vmem>>, %arg4: memref<1x8x16x128xbf16, #tpu.memory_space<vmem>>, %arg5: memref<1x1x1x128xf32, #tpu.memory_space<vmem>>, %arg6: memref<1x1x1x128xf32, #tpu.memory_space<vmem>>) attributes {dimension_semantics = [#tpu.dimension_semantics<parallel>, #tpu.dimension_semantics<parallel>], iteration_bounds = array<i64: 2, 2>, scalar_prefetch = 0 : i64, scratch_operands = 0 : i64, tpu.core_type = #tpu.core_type<tc>, window_params = [{pipeline_mode = #tpu.pipeline_mode<synchronous>, transform_indices = @transform_0, window_bounds = array<i64: 1, 18, 18, 128>}, {pipeline_mode = #tpu.pipeline_mode<synchronous>, transform_indices = @transform_1, window_bounds = array<i64: 1152, 128>}, {transform_indices = @transform_2, window_bounds = array<i64: 1, 8, 16, 128>}, {transform_indices = @transform_3, window_bounds = array<i64: 1, 1, 1, 128>}, {transform_indices = @transform_4, window_bounds = array<i64: 1, 1, 1, 128>}]} {
    %c8_i32 = arith.constant 8 : i32
    %0 = arith.muli %arg1, %c8_i32 : i32
    %1 = tpu.assume_multiple %0, 8 : i32
    %c0 = arith.constant 0 : index
    %2 = arith.index_cast %1 : i32 to index
    %c0_0 = arith.constant 0 : index
    %c0_1 = arith.constant 0 : index
    %3 = vector.load %arg2[%c0, %2, %c0_0, %c0_1] : memref<1x18x18x128xf32, #tpu.memory_space<vmem>>, vector<1x10x18x128xf32>
    %4 = vector.shape_cast %3 : vector<1x10x18x128xf32> to vector<10x18x128xf32>
    %c0_2 = arith.constant 0 : index
    %c0_3 = arith.constant 0 : index
    %5 = vector.load %arg3[%c0_2, %c0_3] : memref<1152x128xbf16, #tpu.memory_space<vmem>>, vector<1152x128xbf16>
    %6 = vector.extract_strided_slice %4 {offsets = [0, 0, 0], sizes = [8, 16, 128], strides = [1, 1, 1]} : vector<10x18x128xf32> to vector<8x16x128xf32>
    %7 = vector.shape_cast %6 : vector<8x16x128xf32> to vector<128x128xf32>
    %8 = arith.truncf %7 : vector<128x128xf32> to vector<128x128xbf16>
    %9 = vector.extract_strided_slice %4 {offsets = [0, 1, 0], sizes = [8, 16, 128], strides = [1, 1, 1]} : vector<10x18x128xf32> to vector<8x16x128xf32>
    %10 = vector.shape_cast %9 : vector<8x16x128xf32> to vector<128x128xf32>
    %11 = arith.truncf %10 : vector<128x128xf32> to vector<128x128xbf16>
    %12 = vector.extract_strided_slice %4 {offsets = [0, 2, 0], sizes = [8, 16, 128], strides = [1, 1, 1]} : vector<10x18x128xf32> to vector<8x16x128xf32>
    %13 = vector.shape_cast %12 : vector<8x16x128xf32> to vector<128x128xf32>
    %14 = arith.truncf %13 : vector<128x128xf32> to vector<128x128xbf16>
    %15 = vector.extract_strided_slice %4 {offsets = [1, 0, 0], sizes = [8, 16, 128], strides = [1, 1, 1]} : vector<10x18x128xf32> to vector<8x16x128xf32>
    %16 = vector.shape_cast %15 : vector<8x16x128xf32> to vector<128x128xf32>
    %17 = arith.truncf %16 : vector<128x128xf32> to vector<128x128xbf16>
    %18 = vector.extract_strided_slice %4 {offsets = [1, 1, 0], sizes = [8, 16, 128], strides = [1, 1, 1]} : vector<10x18x128xf32> to vector<8x16x128xf32>
    %19 = vector.shape_cast %18 : vector<8x16x128xf32> to vector<128x128xf32>
    %20 = arith.truncf %19 : vector<128x128xf32> to vector<128x128xbf16>
    %21 = vector.extract_strided_slice %4 {offsets = [1, 2, 0], sizes = [8, 16, 128], strides = [1, 1, 1]} : vector<10x18x128xf32> to vector<8x16x128xf32>
    %22 = vector.shape_cast %21 : vector<8x16x128xf32> to vector<128x128xf32>
    %23 = arith.truncf %22 : vector<128x128xf32> to vector<128x128xbf16>
    %24 = vector.extract_strided_slice %4 {offsets = [2, 0, 0], sizes = [8, 16, 128], strides = [1, 1, 1]} : vector<10x18x128xf32> to vector<8x16x128xf32>
    %25 = vector.shape_cast %24 : vector<8x16x128xf32> to vector<128x128xf32>
    %26 = arith.truncf %25 : vector<128x128xf32> to vector<128x128xbf16>
    %27 = vector.extract_strided_slice %4 {offsets = [2, 1, 0], sizes = [8, 16, 128], strides = [1, 1, 1]} : vector<10x18x128xf32> to vector<8x16x128xf32>
    %28 = vector.shape_cast %27 : vector<8x16x128xf32> to vector<128x128xf32>
    %29 = arith.truncf %28 : vector<128x128xf32> to vector<128x128xbf16>
    %30 = vector.extract_strided_slice %4 {offsets = [2, 2, 0], sizes = [8, 16, 128], strides = [1, 1, 1]} : vector<10x18x128xf32> to vector<8x16x128xf32>
    %31 = vector.shape_cast %30 : vector<8x16x128xf32> to vector<128x128xf32>
    %32 = arith.truncf %31 : vector<128x128xf32> to vector<128x128xbf16>
    %33 = tpu.concatenate %8, %11, %14, %17, %20, %23, %26, %29, %32 in 1 : vector<128x128xbf16>, vector<128x128xbf16>, vector<128x128xbf16>, vector<128x128xbf16>, vector<128x128xbf16>, vector<128x128xbf16>, vector<128x128xbf16>, vector<128x128xbf16>, vector<128x128xbf16> -> vector<128x1152xbf16>
    %cst = arith.constant dense<0.000000e+00> : vector<128x128xf32>
    %34 = tpu.matmul %33, %5, %cst {dimension_numbers = #tpu.dot_dimension_numbers<[1], [0], [0], [1], [0, 0, 1, 1], [], []>} : vector<128x1152xbf16>, vector<1152x128xbf16>, vector<128x128xf32> -> vector<128x128xf32>
    %35 = vector.shape_cast %34 : vector<128x128xf32> to vector<1x8x16x128xf32>
    %36 = arith.truncf %35 : vector<1x8x16x128xf32> to vector<1x8x16x128xbf16>
    %c0_4 = arith.constant 0 : index
    %c0_5 = arith.constant 0 : index
    %c0_6 = arith.constant 0 : index
    %c0_7 = arith.constant 0 : index
    %37 = vector.load %arg4[%c0_4, %c0_5, %c0_6, %c0_7] : memref<1x8x16x128xbf16, #tpu.memory_space<vmem>>, vector<1x8x16x128xbf16>
    tpu.vector_store %arg4[%c0_4, %c0_5, %c0_6, %c0_7], %36 {strides = array<i32>} : memref<1x8x16x128xbf16, #tpu.memory_space<vmem>>, vector<1x8x16x128xbf16>,
    %cst_8 = arith.constant dense<0.000000e+00> : vector<128xf32>
    %38 = vector.multi_reduction <add>, %34, %cst_8 [0] : vector<128x128xf32> to vector<128xf32>
    %39 = vector.shape_cast %38 : vector<128xf32> to vector<1x1x1x128xf32>
    %c0_9 = arith.constant 0 : index
    %c0_10 = arith.constant 0 : index
    %c0_11 = arith.constant 0 : index
    %c0_12 = arith.constant 0 : index
    %40 = vector.load %arg5[%c0_9, %c0_10, %c0_11, %c0_12] : memref<1x1x1x128xf32, #tpu.memory_space<vmem>>, vector<1x1x1x128xf32>
    tpu.vector_store %arg5[%c0_9, %c0_10, %c0_11, %c0_12], %39 {strides = array<i32>} : memref<1x1x1x128xf32, #tpu.memory_space<vmem>>, vector<1x1x1x128xf32>,
    %41 = arith.mulf %34, %34 : vector<128x128xf32>
    %cst_13 = arith.constant dense<0.000000e+00> : vector<128xf32>
    %42 = vector.multi_reduction <add>, %41, %cst_13 [0] : vector<128x128xf32> to vector<128xf32>
    %43 = vector.shape_cast %42 : vector<128xf32> to vector<1x1x1x128xf32>
    %c0_14 = arith.constant 0 : index
    %c0_15 = arith.constant 0 : index
    %c0_16 = arith.constant 0 : index
    %c0_17 = arith.constant 0 : index
    %44 = vector.load %arg6[%c0_14, %c0_15, %c0_16, %c0_17] : memref<1x1x1x128xf32, #tpu.memory_space<vmem>>, vector<1x1x1x128xf32>
    tpu.vector_store %arg6[%c0_14, %c0_15, %c0_16, %c0_17], %43 {strides = array<i32>} : memref<1x1x1x128xf32, #tpu.memory_space<vmem>>, vector<1x1x1x128xf32>,
    return
  }
  func.func @transform_0(%arg0: i32, %arg1: i32) -> (i32, i32, i32, i32) {
    %c0_i32 = arith.constant 0 : i32
    %c0_i32_0 = arith.constant 0 : i32
    %c0_i32_1 = arith.constant 0 : i32
    %c0_i32_2 = arith.constant 0 : i32
    return %arg0, %c0_i32, %c0_i32_0, %c0_i32_1 : i32, i32, i32, i32
  }
  func.func @transform_1(%arg0: i32, %arg1: i32) -> (i32, i32) {
    %c0_i32 = arith.constant 0 : i32
    %c0_i32_0 = arith.constant 0 : i32
    %c0_i32_1 = arith.constant 0 : i32
    return %c0_i32, %c0_i32_0 : i32, i32
  }
  func.func @transform_2(%arg0: i32, %arg1: i32) -> (i32, i32, i32, i32) {
    %c0_i32 = arith.constant 0 : i32
    %c0_i32_0 = arith.constant 0 : i32
    %c0_i32_1 = arith.constant 0 : i32
    return %arg0, %arg1, %c0_i32, %c0_i32_0 : i32, i32, i32, i32
  }
  func.func @transform_3(%arg0: i32, %arg1: i32) -> (i32, i32, i32, i32) {
    %c0_i32 = arith.constant 0 : i32
    %c0_i32_0 = arith.constant 0 : i32
    %c0_i32_1 = arith.constant 0 : i32
    return %arg0, %arg1, %c0_i32, %c0_i32_0 : i32, i32, i32, i32
  }
  func.func @transform_4(%arg0: i32, %arg1: i32) -> (i32, i32, i32, i32) {
    %c0_i32 = arith.constant 0 : i32
    %c0_i32_0 = arith.constant 0 : i32
    %c0_i32_1 = arith.constant 0 : i32
    return %arg0, %arg1, %c0_i32, %c0_i32_0 : i32, i32, i32, i32
  }
}

module attributes {stable_mosaic.version = 11 : i64} {
  func.func @_bn_add_relu_kernel(%arg0: i32, %arg1: i32, %arg2: memref<1x8x16x128xbf16, #tpu.memory_space<vmem>>, %arg3: memref<1x128xf32, #tpu.memory_space<vmem>>, %arg4: memref<1x128xf32, #tpu.memory_space<vmem>>, %arg5: memref<1x8x16x128xf32, #tpu.memory_space<vmem>>, %arg6: memref<1x128xf32, #tpu.memory_space<vmem>>, %arg7: memref<1x128xf32, #tpu.memory_space<vmem>>, %arg8: memref<1x8x16x128xf32, #tpu.memory_space<vmem>>) attributes {dimension_semantics = [#tpu.dimension_semantics<parallel>, #tpu.dimension_semantics<parallel>], iteration_bounds = array<i64: 2, 2>, scalar_prefetch = 0 : i64, scratch_operands = 0 : i64, tpu.core_type = #tpu.core_type<tc>, window_params = [{transform_indices = @transform_0, window_bounds = array<i64: 1, 8, 16, 128>}, {pipeline_mode = #tpu.pipeline_mode<synchronous>, transform_indices = @transform_1, window_bounds = array<i64: 1, 128>}, {pipeline_mode = #tpu.pipeline_mode<synchronous>, transform_indices = @transform_2, window_bounds = array<i64: 1, 128>}, {transform_indices = @transform_3, window_bounds = array<i64: 1, 8, 16, 128>}, {pipeline_mode = #tpu.pipeline_mode<synchronous>, transform_indices = @transform_4, window_bounds = array<i64: 1, 128>}, {pipeline_mode = #tpu.pipeline_mode<synchronous>, transform_indices = @transform_5, window_bounds = array<i64: 1, 128>}, {transform_indices = @transform_6, window_bounds = array<i64: 1, 8, 16, 128>}]} {
    %c0 = arith.constant 0 : index
    %c0_0 = arith.constant 0 : index
    %0 = vector.load %arg3[%c0, %c0_0] : memref<1x128xf32, #tpu.memory_space<vmem>>, vector<1x128xf32>
    %1 = vector.shape_cast %0 : vector<1x128xf32> to vector<1x1x1x128xf32>
    %c0_1 = arith.constant 0 : index
    %c0_2 = arith.constant 0 : index
    %2 = vector.load %arg4[%c0_1, %c0_2] : memref<1x128xf32, #tpu.memory_space<vmem>>, vector<1x128xf32>
    %3 = vector.shape_cast %2 : vector<1x128xf32> to vector<1x1x1x128xf32>
    %c0_3 = arith.constant 0 : index
    %c0_4 = arith.constant 0 : index
    %4 = vector.load %arg6[%c0_3, %c0_4] : memref<1x128xf32, #tpu.memory_space<vmem>>, vector<1x128xf32>
    %5 = vector.shape_cast %4 : vector<1x128xf32> to vector<1x1x1x128xf32>
    %c0_5 = arith.constant 0 : index
    %c0_6 = arith.constant 0 : index
    %6 = vector.load %arg7[%c0_5, %c0_6] : memref<1x128xf32, #tpu.memory_space<vmem>>, vector<1x128xf32>
    %7 = vector.shape_cast %6 : vector<1x128xf32> to vector<1x1x1x128xf32>
    %c0_7 = arith.constant 0 : index
    %c0_8 = arith.constant 0 : index
    %c0_9 = arith.constant 0 : index
    %c0_10 = arith.constant 0 : index
    %8 = vector.load %arg2[%c0_7, %c0_8, %c0_9, %c0_10] : memref<1x8x16x128xbf16, #tpu.memory_space<vmem>>, vector<1x8x16x128xbf16>
    %9 = arith.extf %8 : vector<1x8x16x128xbf16> to vector<1x8x16x128xf32>
    %10 = vector.broadcast %1 : vector<1x1x1x128xf32> to vector<1x8x16x128xf32>
    %11 = arith.mulf %9, %10 : vector<1x8x16x128xf32>
    %12 = vector.broadcast %3 : vector<1x1x1x128xf32> to vector<1x8x16x128xf32>
    %13 = arith.addf %11, %12 : vector<1x8x16x128xf32>
    %c0_11 = arith.constant 0 : index
    %c0_12 = arith.constant 0 : index
    %c0_13 = arith.constant 0 : index
    %c0_14 = arith.constant 0 : index
    %14 = vector.load %arg5[%c0_11, %c0_12, %c0_13, %c0_14] : memref<1x8x16x128xf32, #tpu.memory_space<vmem>>, vector<1x8x16x128xf32>
    %15 = vector.broadcast %5 : vector<1x1x1x128xf32> to vector<1x8x16x128xf32>
    %16 = arith.mulf %14, %15 : vector<1x8x16x128xf32>
    %17 = arith.addf %13, %16 : vector<1x8x16x128xf32>
    %18 = vector.broadcast %7 : vector<1x1x1x128xf32> to vector<1x8x16x128xf32>
    %19 = arith.addf %17, %18 : vector<1x8x16x128xf32>
    %cst = arith.constant 0.000000e+00 : f32
    %20 = vector.broadcast %cst : f32 to vector<1x8x16x128xf32>
    %21 = arith.maximumf %19, %20 : vector<1x8x16x128xf32>
    %c0_15 = arith.constant 0 : index
    %c0_16 = arith.constant 0 : index
    %c0_17 = arith.constant 0 : index
    %c0_18 = arith.constant 0 : index
    %22 = vector.load %arg8[%c0_15, %c0_16, %c0_17, %c0_18] : memref<1x8x16x128xf32, #tpu.memory_space<vmem>>, vector<1x8x16x128xf32>
    tpu.vector_store %arg8[%c0_15, %c0_16, %c0_17, %c0_18], %21 {strides = array<i32>} : memref<1x8x16x128xf32, #tpu.memory_space<vmem>>, vector<1x8x16x128xf32>,
    return
  }
  func.func @transform_0(%arg0: i32, %arg1: i32) -> (i32, i32, i32, i32) {
    %c0_i32 = arith.constant 0 : i32
    %c0_i32_0 = arith.constant 0 : i32
    %c0_i32_1 = arith.constant 0 : i32
    return %arg0, %arg1, %c0_i32, %c0_i32_0 : i32, i32, i32, i32
  }
  func.func @transform_1(%arg0: i32, %arg1: i32) -> (i32, i32) {
    %c0_i32 = arith.constant 0 : i32
    %c0_i32_0 = arith.constant 0 : i32
    %c0_i32_1 = arith.constant 0 : i32
    return %c0_i32, %c0_i32_0 : i32, i32
  }
  func.func @transform_2(%arg0: i32, %arg1: i32) -> (i32, i32) {
    %c0_i32 = arith.constant 0 : i32
    %c0_i32_0 = arith.constant 0 : i32
    %c0_i32_1 = arith.constant 0 : i32
    return %c0_i32, %c0_i32_0 : i32, i32
  }
  func.func @transform_3(%arg0: i32, %arg1: i32) -> (i32, i32, i32, i32) {
    %c0_i32 = arith.constant 0 : i32
    %c0_i32_0 = arith.constant 0 : i32
    %c0_i32_1 = arith.constant 0 : i32
    return %arg0, %arg1, %c0_i32, %c0_i32_0 : i32, i32, i32, i32
  }
  func.func @transform_4(%arg0: i32, %arg1: i32) -> (i32, i32) {
    %c0_i32 = arith.constant 0 : i32
    %c0_i32_0 = arith.constant 0 : i32
    %c0_i32_1 = arith.constant 0 : i32
    return %c0_i32, %c0_i32_0 : i32, i32
  }
  func.func @transform_5(%arg0: i32, %arg1: i32) -> (i32, i32) {
    %c0_i32 = arith.constant 0 : i32
    %c0_i32_0 = arith.constant 0 : i32
    %c0_i32_1 = arith.constant 0 : i32
    return %c0_i32, %c0_i32_0 : i32, i32
  }
  func.func @transform_6(%arg0: i32, %arg1: i32) -> (i32, i32, i32, i32) {
    %c0_i32 = arith.constant 0 : i32
    %c0_i32_0 = arith.constant 0 : i32
    %c0_i32_1 = arith.constant 0 : i32
    return %arg0, %arg1, %c0_i32, %c0_i32_0 : i32, i32, i32, i32
  }
}

</mosaic_0001>

<bundles_post_ra>
// kernel: basic_block_forward.5
= control target key start
LH: loop header
LB: loop body
LE: loop exit
PB: predicated region body
PF: predicated region fallthrough
CT: control target
= control target key end

     0   :  { %s820_s21 = smov 0   ;;  %s822_s22 = smov 0   ;;  %s1012_s0 = inlined_call_operand.vmem [shape: bf16[2,16,16,128], index: 0, kind: input, shape index: {}]   ;;  %s1013_s1 = inlined_call_operand.vmem [shape: f32[1,128], index: 1, kind: input, shape index: {}]   ;;  %s1014_s2 = inlined_call_operand.vmem [shape: f32[1,128], index: 2, kind: input, shape index: {}]   ;;  %s1015_s3 = inlined_call_operand.vmem [shape: f32[2,16,16,128], index: 3, kind: input, shape index: {}]   ;;  %s1016_s4 = inlined_call_operand.vmem [shape: f32[1,128], index: 4, kind: input, shape index: {}]   ;;  %s1017_s5 = inlined_call_operand.vmem [shape: f32[1,128], index: 5, kind: input, shape index: {}]   ;;  %s1018_s6 = inlined_call_operand.vmem [shape: f32[2,16,16,128], index: 6, kind: output, shape index: {}]  }
   0x1   :  { %s824_s23 = smov 0   ;;  %s826_s24 = smov 0  }
   0x2   :  { %s828_s25 = smov 0  }
   0x3 LB: > { %s25_s26 = sadd.s32 1, %s775_s23  ;;  %s28_s27 = sadd.s32 1, %s779_s24  ;;  %s783_s25 = sphi %s828_s25, %s16_s25   ;;  %s779_s24 = sphi %s826_s24, %s1022_s24   ;;  %s775_s23 = sphi %s824_s23, %s1021_s23   ;;  %s771_s22 = sphi %s822_s22, %s1020_s22   ;;  %s767_s21 = sphi %s820_s21, %s1019_s21  }
   0x4   : > { %p26_p0 = scmp.ge.s32.totalorder %s25_s26, 2  ;;  %p647_p1 = scmp.ge.s32.totalorder %s783_s25, 1 }
   0x5   : > { %p252_p2 = scmp.lt.s32.totalorder %s783_s25, 5 }
   0x6   : > { %s1024_s26 = smov (%p26_p0, %s25_s26), 0  ;;  %s1026_s27 = smov (!%p26_p0, %s28_s27), %s779_s24 }
   0x7   : > { %p253_p3 = pnand %p647_p1, %p252_p2  ;;  %p30_p4 = scmp.ge.s32.totalorder %s1026_s27, 2 }
   0x8   : > { %s648_s28 = sshll.u32 (!%p253_p3), %s767_s21, 3  ;;  %p303_p5 = scmp.lt.s32.totalorder (!%p253_p3), %s771_s22, 1 }
   0x9   : > { %s1028_s27 = smov (%p30_p4, %s1026_s27), 0  ;;  %256 = sbr.rel (%p253_p3) target bundleno = 56 (0x38), region = 44 }
   0xa   : > { %p305_p6 = scmp.lt.s32.totalorder (!%p253_p3), %s648_s28, 15 }
   0xe   : > { %s1030_s22 = smov (!%p303_p5, %s771_s22), 1  ;;  %s1032_s28 = smov (!%p305_p6, %s648_s28), 15  ;;  %v857_v0 = vld [vmem:[%s1016_s4] ss:$0 sm:$0xff] }
   0xf   : > { %s650_s29 = sshll.u32 %s1030_s22, 5  ;;  %s649_s30 = sshll.u32 %s1032_s28, 1  ;;  %v874_v1 = vld [vmem:[%s1013_s1] ss:$0 sm:$0xff] }
  0x10   : > { %s850_s7 = sadd.s32 %s650_s29, %s649_s30  ;;  %v879_v2 = vld [vmem:[%s1014_s2] ss:$0 sm:$0xff] }
  0x11   : > { %s651_s8 = sshll.u32 %s850_s7, 2  ;;  %s655_s9 = sshll.u32 %s850_s7, 3  ;;  %v908_v34 = vld [vmem:[%s1017_s5] ss:$0 sm:$0xff] }
  0x12   : > { %s862_s14 = scalar_lea.vmem %s1012_s0, %s651_s8  ;;  %s869_s17 = scalar_lea.vmem %s1015_s3, %s655_s9 }
  0x13   : > { %v667_v3 = vld [vmem:[%s862_s14] sm:$0xff]   ;;  %v416_v5 = vld [vmem:[%s869_s17 + $0x8] sm:$0xff]  ;;  %v417_v11 = vld [vmem:[%s869_s17 + $0x10] sm:$0xff]  ;;  %s925_s8 = scalar_lea.vmem %s1018_s6, %s655_s9 }
  0x14   : > { %v415_v4 = vld [vmem:[%s869_s17] sm:$0xff]  ;;  %v668_v6 = vunpack.c.l.bf16 %v667_v3  ;;  %v669_v8 = vunpack.c.h.bf16 %v667_v3  ;;  %v438_v9 = vmul.f32 %v857_v0, %v416_v5  ;;  %v698_v10 = vld [vmem:[%s862_s14 + $0x8] sm:$0xff]   ;;  %v418_v12 = vld [vmem:[%s869_s17 + $0x18] sm:$0xff]  ;;  %v439_v14 = vmul.f32 %v857_v0, %v417_v11 }
  0x15   : > { %v437_v7 = vmul.f32 %v857_v0, %v415_v4  ;;  %v672_v13 = vunpack.c.l.bf16 %v698_v10  ;;  %v673_v15 = vunpack.c.h.bf16 %v698_v10  ;;  %v440_v16 = vmul.f32 %v857_v0, %v418_v12  ;;  %v699_v17 = vld [vmem:[%s862_s14 + $0x10] sm:$0xff]   ;;  %v419_v18 = vld [vmem:[%s869_s17 + $0x20] sm:$0xff]  ;;  %v420_v19 = vld [vmem:[%s869_s17 + $0x28] sm:$0xff] }
  0x16   : > { %v377_v20 = vmul.f32 %v668_v6, %v874_v1  ;;  %v378_v21 = vmul.f32 %v669_v8, %v874_v1  ;;  %v676_v22 = vunpack.c.l.bf16 %v699_v17  ;;  %v441_v23 = vmul.f32 %v857_v0, %v419_v18  ;;  %v700_v24 = vld [vmem:[%s862_s14 + $0x18] sm:$0xff]   ;;  %v421_v25 = vld [vmem:[%s869_s17 + $0x30] sm:$0xff]  ;;  %v701_v56 = vld [vmem:[%s862_s14 + $0x20] sm:$0xff]  }
  0x17   : > { %v379_v26 = vmul.f32 %v672_v13, %v874_v1  ;;  %v380_v27 = vmul.f32 %v673_v15, %v874_v1  ;;  %v677_v28 = vunpack.c.h.bf16 %v699_v17  ;;  %v442_v29 = vmul.f32 %v857_v0, %v420_v19  ;;  %v422_v55 = vld [vmem:[%s869_s17 + $0x38] sm:$0xff]  ;;  %v423_v61 = vld [vmem:[%s869_s17 + $0x40] sm:$0xff]  ;;  %v424_v62 = vld [vmem:[%s869_s17 + $0x48] sm:$0xff] }
  0x18   : > { %v399_v30 = vadd.f32 %v879_v2, %v377_v20  ;;  %v400_v31 = vadd.f32 %v879_v2, %v378_v21  ;;  %v381_v32 = vmul.f32 %v676_v22, %v874_v1  ;;  %v680_v33 = vunpack.c.l.bf16 %v700_v24  ;;  %v702_v6 = vld [vmem:[%s862_s14 + $0x28] sm:$0xff]   ;;  %v425_v11 = vld [vmem:[%s869_s17 + $0x50] sm:$0xff]  ;;  %v426_v12 = vld [vmem:[%s869_s17 + $0x58] sm:$0xff] }
  0x19   : > { %v401_v35 = vadd.f32 %v879_v2, %v379_v26  ;;  %v402_v36 = vadd.f32 %v879_v2, %v380_v27  ;;  %v382_v37 = vmul.f32 %v677_v28, %v874_v1  ;;  %v443_v38 = vmul.f32 %v857_v0, %v421_v25  ;;  %v703_v17 = vld [vmem:[%s862_s14 + $0x30] sm:$0xff]   ;;  %v427_v22 = vld [vmem:[%s869_s17 + $0x60] sm:$0xff] }
  0x1a   : > { %v453_v39 = vadd.f32 %v437_v7, %v399_v30  ;;  %v454_v40 = vadd.f32 %v438_v9, %v400_v31  ;;  %v403_v41 = vadd.f32 %v879_v2, %v381_v32  ;;  %v383_v42 = vmul.f32 %v680_v33, %v874_v1  ;;  %v428_v31 = vld [vmem:[%s869_s17 + $0x68] sm:$0xff] }
  0x1b   : > { %v455_v43 = vadd.f32 %v439_v14, %v401_v35  ;;  %v456_v44 = vadd.f32 %v440_v16, %v402_v36  ;;  %v404_v45 = vadd.f32 %v879_v2, %v382_v37  ;;  %v681_v46 = vunpack.c.h.bf16 %v700_v24  ;;  %v704_v37 = vld [vmem:[%s862_s14 + $0x38] sm:$0xff]  }
  0x1c   : > { %v475_v47 = vadd.f32 %v908_v34, %v453_v39  ;;  %v476_v48 = vadd.f32 %v908_v34, %v454_v40  ;;  %v457_v49 = vadd.f32 %v441_v23, %v403_v41  ;;  %v405_v50 = vadd.f32 %v879_v2, %v383_v42  ;;  %v429_v42 = vld [vmem:[%s869_s17 + $0x70] sm:$0xff] }
  0x1d   : > { %v477_v51 = vadd.f32 %v908_v34, %v455_v43  ;;  %v478_v52 = vadd.f32 %v908_v34, %v456_v44  ;;  %v458_v53 = vadd.f32 %v442_v29, %v404_v45  ;;  %v384_v54 = vmul.f32 %v681_v46, %v874_v1 }
  0x1e   : > { %v491_v57 = vmax.f32 %v475_v47, 0.0  ;;  %v492_v58 = vmax.f32 %v476_v48, 0.0  ;;  %v479_v59 = vadd.f32 %v908_v34, %v457_v49  ;;  %v459_v60 = vadd.f32 %v443_v38, %v405_v50 }
  0x1f   : > { %v493_v63 = vmax.f32 %v477_v51, 0.0  ;;  %v494_v3 = vmax.f32 %v478_v52, 0.0  ;;  %v480_v4 = vadd.f32 %v908_v34, %v458_v53  ;;  %v406_v5 = vadd.f32 %v879_v2, %v384_v54 }
  0x20   : > { %507 = vst [vmem:[%s925_s8] sm:$0xff] %v491_v57  ;;  %508 = vst [vmem:[%s925_s8 + $0x8] sm:$0xff] %v492_v58  ;;  %v495_v7 = vmax.f32 %v479_v59, 0.0  ;;  %v481_v8 = vadd.f32 %v908_v34, %v459_v60  ;;  %v444_v9 = vmul.f32 %v857_v0, %v422_v55  ;;  %v684_v10 = vunpack.c.l.bf16 %v701_v56  ;;  %v430_v59 = vld [vmem:[%s869_s17 + $0x78] sm:$0xff] }
  0x21   : > { %509 = vst [vmem:[%s925_s8 + $0x10] sm:$0xff] %v493_v63  ;;  %510 = vst [vmem:[%s925_s8 + $0x18] sm:$0xff] %v494_v3  ;;  %v496_v13 = vmax.f32 %v480_v4, 0.0  ;;  %v445_v14 = vmul.f32 %v857_v0, %v423_v61  ;;  %v685_v15 = vunpack.c.h.bf16 %v701_v56  ;;  %v446_v16 = vmul.f32 %v857_v0, %v424_v62 }
  0x22   : > { %511 = vst [vmem:[%s925_s8 + $0x20] sm:$0xff] %v495_v7  ;;  %v497_v18 = vmax.f32 %v481_v8, 0.0  ;;  %v460_v19 = vadd.f32 %v444_v9, %v406_v5  ;;  %v385_v20 = vmul.f32 %v684_v10, %v874_v1  ;;  %v688_v21 = vunpack.c.l.bf16 %v702_v6 }
  0x23   : > { %512 = vst [vmem:[%s925_s8 + $0x28] sm:$0xff] %v496_v13  ;;  %v386_v23 = vmul.f32 %v685_v15, %v874_v1  ;;  %v447_v24 = vmul.f32 %v857_v0, %v425_v11  ;;  %v689_v25 = vunpack.c.h.bf16 %v702_v6  ;;  %v448_v26 = vmul.f32 %v857_v0, %v426_v12 }
  0x24   : > { %513 = vst [vmem:[%s925_s8 + $0x30] sm:$0xff] %v497_v18  ;;  %v482_v27 = vadd.f32 %v908_v34, %v460_v19  ;;  %v407_v28 = vadd.f32 %v879_v2, %v385_v20  ;;  %v387_v29 = vmul.f32 %v688_v21, %v874_v1  ;;  %v692_v30 = vunpack.c.l.bf16 %v703_v17 }
  0x25   : > { %v408_v32 = vadd.f32 %v879_v2, %v386_v23  ;;  %v388_v33 = vmul.f32 %v689_v25, %v874_v1  ;;  %v449_v35 = vmul.f32 %v857_v0, %v427_v22  ;;  %v693_v36 = vunpack.c.h.bf16 %v703_v17 }
  0x26   : > { %v498_v38 = vmax.f32 %v482_v27, 0.0  ;;  %v461_v39 = vadd.f32 %v445_v14, %v407_v28  ;;  %v409_v40 = vadd.f32 %v879_v2, %v387_v29  ;;  %v389_v41 = vmul.f32 %v692_v30, %v874_v1 }
  0x27   : > { %v462_v43 = vadd.f32 %v446_v16, %v408_v32  ;;  %v410_v44 = vadd.f32 %v879_v2, %v388_v33  ;;  %v390_v45 = vmul.f32 %v693_v36, %v874_v1  ;;  %v450_v46 = vmul.f32 %v857_v0, %v428_v31 }
  0x28   : > { %514 = vst [vmem:[%s925_s8 + $0x38] sm:$0xff] %v498_v38  ;;  %v483_v47 = vadd.f32 %v908_v34, %v461_v39  ;;  %v463_v48 = vadd.f32 %v447_v24, %v409_v40  ;;  %v411_v49 = vadd.f32 %v879_v2, %v389_v41  ;;  %v696_v50 = vunpack.c.l.bf16 %v704_v37 }
  0x29   : > { %v484_v51 = vadd.f32 %v908_v34, %v462_v43  ;;  %v464_v52 = vadd.f32 %v448_v26, %v410_v44  ;;  %v412_v53 = vadd.f32 %v879_v2, %v390_v45  ;;  %v451_v54 = vmul.f32 %v857_v0, %v429_v42 }
  0x2a   : > { %v499_v55 = vmax.f32 %v483_v47, 0.0  ;;  %v485_v56 = vadd.f32 %v908_v34, %v463_v48  ;;  %v465_v57 = vadd.f32 %v449_v35, %v411_v49  ;;  %v391_v58 = vmul.f32 %v696_v50, %v874_v1 }
  0x2b   : > { %v500_v60 = vmax.f32 %v484_v51, 0.0  ;;  %v486_v61 = vadd.f32 %v908_v34, %v464_v52  ;;  %v466_v62 = vadd.f32 %v450_v46, %v412_v53  ;;  %v697_v63 = vunpack.c.h.bf16 %v704_v37 }
  0x2c   : > { %515 = vst [vmem:[%s925_s8 + $0x40] sm:$0xff] %v499_v55  ;;  %v501_v3 = vmax.f32 %v485_v56, 0.0  ;;  %v487_v4 = vadd.f32 %v908_v34, %v465_v57  ;;  %v413_v5 = vadd.f32 %v879_v2, %v391_v58  ;;  %v452_v9 = vmul.f32 %v857_v0, %v430_v59 }
  0x2d   : > { %516 = vst [vmem:[%s925_s8 + $0x48] sm:$0xff] %v500_v60  ;;  %v502_v6 = vmax.f32 %v486_v61, 0.0  ;;  %v488_v7 = vadd.f32 %v908_v34, %v466_v62  ;;  %v392_v8 = vmul.f32 %v697_v63, %v874_v1 }
  0x2e   : > { %517 = vst [vmem:[%s925_s8 + $0x50] sm:$0xff] %v501_v3  ;;  %v503_v10 = vmax.f32 %v487_v4, 0.0  ;;  %v467_v11 = vadd.f32 %v451_v54, %v413_v5 }
  0x2f   : > { %518 = vst [vmem:[%s925_s8 + $0x58] sm:$0xff] %v502_v6  ;;  %v504_v12 = vmax.f32 %v488_v7, 0.0  ;;  %v414_v13 = vadd.f32 %v879_v2, %v392_v8 }
  0x30   : > { %519 = vst [vmem:[%s925_s8 + $0x60] sm:$0xff] %v503_v10  ;;  %v489_v14 = vadd.f32 %v908_v34, %v467_v11 }
  0x31   : > { %520 = vst [vmem:[%s925_s8 + $0x68] sm:$0xff] %v504_v12  ;;  %v468_v15 = vadd.f32 %v452_v9, %v414_v13 }
  0x32   : > { %v505_v16 = vmax.f32 %v489_v14, 0.0 }
  0x33   : > { %v490_v17 = vadd.f32 %v908_v34, %v468_v15 }
  0x34   : > { %521 = vst [vmem:[%s925_s8 + $0x70] sm:$0xff] %v505_v16 }
  0x35   : > { %v506_v1 = vmax.f32 %v490_v17, 0.0 }
  0x37   : > { %522 = vst [vmem:[%s925_s8 + $0x78] sm:$0xff] %v506_v1 }
  0x38 PF: > { %s16_s25 = sadd.s32 1, %s783_s25   ;;  %s1019_s21 = smov %s775_s23 }
  0x39   : > { %p13_p7 = scmp.ge.s32.totalorder %s16_s25, 6   ;;  %s1020_s22 = smov %s779_s24 }
  0x3a   : > { %s1021_s23 = smov %s1024_s26  ;;  %s1022_s24 = smov %s1028_s27 }
  0x3b   :  { %15 = sbr.rel (!%p13_p7) target bundleno = 3 (0x3), region = 77 }

// kernel: basic_block_forward.3
= control target key start
LH: loop header
LB: loop body
LE: loop exit
PB: predicated region body
PF: predicated region fallthrough
CT: control target
= control target key end

     0   :  { %s2538_s15 = smov 0   ;;  %s2540_s16 = smov 0   ;;  %s3248_s0 = inlined_call_operand.vmem [shape: f32[2,18,18,128], index: 0, kind: input, shape index: {}]   ;;  %s3249_s1 = inlined_call_operand.vmem [shape: bf16[1152,128], index: 1, kind: input, shape index: {}]   ;;  %s3250_s2 = inlined_call_operand.vmem [shape: bf16[2,16,16,128], index: 2, kind: output, shape index: {0}]   ;;  %s3251_s3 = inlined_call_operand.vmem [shape: f32[2,2,1,128], index: 3, kind: output, shape index: {1}]   ;;  %s3252_s4 = inlined_call_operand.vmem [shape: f32[2,2,1,128], index: 4, kind: output, shape index: {2}]  }
   0x1   :  { %s2542_s17 = smov 0   ;;  %s2544_s18 = smov 0  }
   0x2   :  { %s2546_s19 = smov 0  }
   0x3 LB: > { %s24_s20 = sadd.s32 1, %s2503_s17  ;;  %s27_s21 = sadd.s32 1, %s2507_s18  ;;  %s2511_s19 = sphi %s2546_s19, %s15_s19   ;;  %s2507_s18 = sphi %s2544_s18, %s3286_s18   ;;  %s2503_s17 = sphi %s2542_s17, %s3285_s17   ;;  %s2499_s16 = sphi %s2540_s16, %s3284_s16   ;;  %s2495_s15 = sphi %s2538_s15, %s3283_s15  }
   0x4   : > { %p25_p0 = scmp.ge.s32.totalorder %s24_s20, 2  ;;  %p1877_p1 = scmp.ge.s32.totalorder %s2511_s19, 1 }
   0x5   : > { %p185_p2 = scmp.lt.s32.totalorder %s2511_s19, 5 }
   0x6   : > { %s3288_s20 = smov (%p25_p0, %s24_s20), 0  ;;  %s3290_s21 = smov (!%p25_p0, %s27_s21), %s2507_s18 }
   0x7   : > { %p186_p3 = pnand %p1877_p1, %p185_p2  ;;  %p29_p4 = scmp.ge.s32.totalorder %s3290_s21, 2 }
   0x9   : > { %s3292_s21 = smov (%p29_p4, %s3290_s21), 0  ;;  %189 = sbr.rel (%p186_p3) target bundleno = 423 (0x1a7), region = 28 }
   0xe   : > { %v2401_v0 = vld [vmem:[%s3249_s1 + $0x78] sm:$0xff]   ;;  %v2405_v4 = vld [vmem:[%s3249_s1 + $0x70] sm:$0xff]   ;;  %v2409_v8 = vld [vmem:[%s3249_s1 + $0x68] sm:$0xff]   ;;  %p230_p5 = scmp.lt.s32.totalorder %s2499_s16, 1  ;;  %s1886_s11 = smul.u32 192, %s2495_s15  ;;  %vm470_vm0 = vcmask 1046528  }
   0xf   : > { %v2402_v1 = vld [vmem:[%s3249_s1 + $0xf8] sm:$0xff]   ;;  %2040 = vmatprep.subr.bf16.mxu0 %v2401_v0  ;;  %v2406_v5 = vld [vmem:[%s3249_s1 + $0xf0] sm:$0xff]   ;;  %v2410_v9 = vld [vmem:[%s3249_s1 + $0xe8] sm:$0xff]   ;;  %vm535_vm1 = vcmask 1045504   ;;  %p248_p7 = scmp.lt.s32.totalorder %s2495_s15, 1 }
  0x10   : > { %v2403_v2 = vld [vmem:[%s3249_s1 + $0x38] sm:$0xff]   ;;  %2104 = vmatprep.subr.bf16.mxu1 %v2402_v1  ;;  %v2407_v6 = vld [vmem:[%s3249_s1 + $0x30] sm:$0xff]   ;;  %v2411_v10 = vld [vmem:[%s3249_s1 + $0x28] sm:$0xff]   ;;  %s3294_s16 = smov (!%p230_p5, %s2499_s16), 1 }
  0x11   : > { %v2404_v3 = vld [vmem:[%s3249_s1 + $0xb8] sm:$0xff]   ;;  %2041 = vmatpush3.bf16.msra.mxu0 %v2403_v2  ;;  %v2408_v7 = vld [vmem:[%s3249_s1 + $0xb0] sm:$0xff]   ;;  %v2412_v11 = vld [vmem:[%s3249_s1 + $0xa8] sm:$0xff]   ;;  %s2360_s30 = smul.u32 432, %s3294_s16  ;;  %s1881_s25 = sshll.u32 %s3294_s16, 5 }
  0x12   : > { %2105 = vmatpush3.bf16.msra.mxu1 %v2404_v3  ;;  %2042 = vmatprep.subr.bf16.mxu0 %v2405_v4  ;;  %v2413_v12 = vld [vmem:[%s3249_s1 + $0x60] sm:$0xff]   ;;  %v2417_v16 = vld [vmem:[%s3249_s1 + $0x58] sm:$0xff]   ;;  %v2421_v20 = vld [vmem:[%s3249_s1 + $0x50] sm:$0xff]  }
  0x13   : > { %2106 = vmatprep.subr.bf16.mxu1 %v2406_v5  ;;  %v2414_v13 = vld [vmem:[%s3249_s1 + $0xe0] sm:$0xff]   ;;  %v2418_v17 = vld [vmem:[%s3249_s1 + $0xd8] sm:$0xff]   ;;  %v2422_v21 = vld [vmem:[%s3249_s1 + $0xd0] sm:$0xff]   ;;  %s234_s23 = scalar_lea.vmem %s3248_s0, %s2360_s30  ;;  %s1883_s30 = sshll.u32 %s3294_s16, 1 }
  0x14   : > { %v2415_v14 = vld [vmem:[%s3249_s1 + $0x20] sm:$0xff]   ;;  %v2419_v18 = vld [vmem:[%s3249_s1 + $0x18] sm:$0xff]   ;;  %v2423_v22 = vld [vmem:[%s3249_s1 + $0x10] sm:$0xff]   ;;  %s2671_s5 = scalar_lea.vmem %s234_s23, %s1886_s11  ;;  %s1879_s23 = sshll.u32 %s2495_s15, 3 }
  0x15   : > { %2043 = vmatpush3.bf16.msra.mxu0 %v2407_v6  ;;  %v2416_v15 = vld [vmem:[%s3249_s1 + $0xa0] sm:$0xff]   ;;  %v2420_v19 = vld [vmem:[%s3249_s1 + $0x98] sm:$0xff]   ;;  %v2424_v23 = vld [vmem:[%s3249_s1 + $0x90] sm:$0xff]   ;;  %p238_p6 = scmp.lt.s32.totalorder %s1879_s23, 15  ;;  %s3298_s15 = smov (!%p248_p7, %s2495_s15), 1 }
  0x16   : > { %2107 = vmatpush3.bf16.msra.mxu1 %v2408_v7  ;;  %2044 = vmatprep.subr.bf16.mxu0 %v2409_v8  ;;  %v2425_v24 = vld [vmem:[%s3249_s1 + $0x48] sm:$0xff]   ;;  %v2429_v28 = vld [vmem:[%s3249_s1 + $0x40] sm:$0xff]   ;;  %v266_v34 = vld [vmem:[%s2671_s5 + $0x10] sm:$0x3]  ;;  %s251_s6 = sadd.s32 %s1883_s30, %s3298_s15 }
  0x17   : > { %2108 = vmatprep.subr.bf16.mxu1 %v2410_v9  ;;  %v2426_v25 = vld [vmem:[%s3249_s1 + $0xc8] sm:$0xff]   ;;  %v2430_v29 = vld [vmem:[%s3249_s1 + $0xc0] sm:$0xff]   ;;  %v474_v37 = vrot.slane %v266_v34, 1  ;;  %v539_v38 = vrot.slane %v266_v34, 2  ;;  %v267_v39 = vld [vmem:[%s2671_s5 + $0x18] sm:$0xff]  ;;  %s3296_s23 = smov (!%p238_p6, %s1879_s23), 15  ;;  %s252_s9 = scalar_lea.vmem %s3251_s3, %s251_s6 }
  0x18   : > { %v2427_v26 = vld [vmem:[%s3249_s1 + $0x8] sm:$0xff]   ;;  %v2431_v30 = vld [vmem:[%s3249_s1] sm:$0xff]   ;;  %v476_v42 = vrot.slane %v267_v39, 1  ;;  %v541_v44 = vrot.slane %v267_v39, 2  ;;  %v2433_v45 = vld [vmem:[%s3249_s1 + $0x178] sm:$0xff]   ;;  %s1880_s24 = sshll.u32 %s3296_s23, 1  ;;  %s259_s12 = scalar_lea.vmem %s3252_s4, %s251_s6 }
  0x19   : > { %2045 = vmatpush3.bf16.msra.mxu0 %v2411_v10  ;;  %v2428_v27 = vld [vmem:[%s3249_s1 + $0x88] sm:$0xff]   ;;  %v2432_v31 = vld [vmem:[%s3249_s1 + $0x80] sm:$0xff]   ;;  %v2434_v50 = vld [vmem:[%s3249_s1 + $0x138] sm:$0xff]   ;;  %s3173_s26 = sadd.s32 %s1881_s25, %s1880_s24 }
  0x1a   : > { %2109 = vmatpush3.bf16.msra.mxu1 %v2412_v11  ;;  %2046 = vmatprep.subr.bf16.mxu0 %v2413_v12  ;;  %v264_v32 = vld [vmem:[%s2671_s5] sm:$0xff]  ;;  %v265_v33 = vld [vmem:[%s2671_s5 + $0x8] sm:$0xff]  ;;  %v270_v57 = vld [vmem:[%s2671_s5 + $0x30] sm:$0xff]  ;;  %s1882_s27 = sshll.u32 %s3173_s26, 2 }
  0x1b   : > { %2110 = vmatprep.subr.bf16.mxu1 %v2414_v13  ;;  %v471_v35 = vrot.slane %v264_v32, 1  ;;  %v472_v36 = vrot.slane %v265_v33, 1  ;;  %v268_v40 = vld [vmem:[%s2671_s5 + $0x20] sm:$0xff]  ;;  %v438_v49 = vpack.c.bf16 %v265_v33, %v264_v32  ;;  %v536_v52 = vrot.slane %v264_v32, 2  ;;  %v269_v54 = vld [vmem:[%s2671_s5 + $0x28] sm:$0x3]  ;;  %s3193_s29 = scalar_lea.vmem %s3250_s2, %s1882_s27 }
  0x1c   : > { %v2684_v41 = vpack.c.bf16 %v268_v40, %v267_v39  ;;  %v477_v43 = vrot.slane %v268_v40, 1  ;;  %v542_v48 = vrot.slane %v268_v40, 2  ;;  %v537_v53 = vrot.slane %v265_v33, 2  ;;  %v271_v58 = vld [vmem:[%s2671_s5 + $0x38] sm:$0xff]  ;;  %v2435_v0 = vld [vmem:[%s3249_s1 + $0x170] sm:$0xff]   ;;  %v2437_v7 = vld [vmem:[%s3249_s1 + $0x168] sm:$0xff]  }
  0x1d   : > { %2047 = vmatpush3.bf16.msra.mxu0 %v2415_v14  ;;  %v473_v46 = vsel %vm470_vm0, %v471_v35, %v472_v36  ;;  %v475_v47 = vsel %vm470_vm0, %v472_v36, %v474_v37  ;;  %v479_v56 = vrot.slane %v269_v54, 1  ;;  %v544_v59 = vrot.slane %v269_v54, 2  ;;  %v2436_v5 = vld [vmem:[%s3249_s1 + $0x130] sm:$0xff]   ;;  %v272_v6 = vld [vmem:[%s2671_s5 + $0x40] sm:$0x3]  ;;  %v2718_v10 = vld [vmem:[%s2671_s5 + $0x48] sm:$0xff] }
  0x1e   : > { %2111 = vmatpush3.bf16.msra.mxu1 %v2416_v15  ;;  %2048 = vmatprep.subr.bf16.mxu0 %v2417_v16  ;;  %v527_v51 = vpack.c.bf16 %v475_v47, %v473_v46  ;;  %v478_v55 = vsel %vm470_vm0, %v476_v42, %v477_v43  ;;  %v538_v60 = vsel %vm535_vm1, %v536_v52, %v537_v53  ;;  %v481_v63 = vrot.slane %v270_v57, 1  ;;  %v2438_v11 = vld [vmem:[%s3249_s1 + $0x1f8] sm:$0xff]   ;;  %v2728_v14 = vld [vmem:[%s2671_s5 + $0x50] sm:$0xff]  ;;  %v2439_v15 = vld [vmem:[%s3249_s1 + $0x128] sm:$0xff]  }
  0x1f   : > { %2112 = vmatprep.subr.bf16.mxu1 %v2418_v17  ;;  %1201 = vmatprep.mubr.bf16.mxu1 %v2684_v41  ;;  %v540_v61 = vsel %vm535_vm1, %v537_v53, %v539_v38  ;;  %v2701_v62 = vpack.c.bf16 %v271_v58, %v270_v57  ;;  %v480_v2 = vsel %vm470_vm0, %v477_v43, %v479_v56  ;;  %v482_v3 = vrot.slane %v271_v58, 1  ;;  %v2443_v32 = vld [vmem:[%s3249_s1 + $0x120] sm:$0xff]   ;;  %v2444_v35 = vld [vmem:[%s3249_s1 + $0x1b0] sm:$0xff]   ;;  %v2776_v39 = vld [vmem:[%s2671_s5 + $0x68] sm:$0xff] }
  0x20   : > { %1104 = vmatprep.mubr.bf16.mxu0 %v527_v51  ;;  %v592_v1 = vpack.c.bf16 %v540_v61, %v538_v60  ;;  %v2707_v4 = vpack.c.bf16 %v480_v2, %v478_v55  ;;  %v484_v9 = vrot.slane %v272_v6, 1  ;;  %v543_v12 = vsel %vm535_vm1, %v541_v44, %v542_v48  ;;  %v2769_v36 = vld [vmem:[%s2671_s5 + $0x70] sm:$0x3]  ;;  %v2773_v38 = vld [vmem:[%s2671_s5 + $0x60] sm:$0xff]  ;;  %v2445_v44 = vld [vmem:[%s3249_s1 + $0x158] sm:$0xff]  }
  0x21   : > { %2049 = vmatpush3.bf16.msra.mxu0 %v2419_v18  ;;  %v483_v8 = vsel %vm470_vm0, %v481_v63, %v482_v3  ;;  %v545_v13 = vsel %vm535_vm1, %v542_v48, %v544_v59  ;;  %v546_v16 = vrot.slane %v270_v57, 2  ;;  %v2440_v18 = vld [vmem:[%s3249_s1 + $0x1b8] sm:$0xff]   ;;  %v551_v37 = vrot.slane %v2718_v10, 2  ;;  %v2446_v47 = vld [vmem:[%s3249_s1 + $0x1e8] sm:$0xff]   ;;  %v2811_v55 = vld [vmem:[%s2671_s5 + $0x80] sm:$0xff] }
  0x22   : > { %2113 = vmatpush3.bf16.msra.mxu1 %v2420_v19  ;;  %2050 = vmatprep.subr.bf16.mxu0 %v2421_v20  ;;  %v485_v17 = vsel %vm470_vm0, %v482_v3, %v484_v9  ;;  %v547_v20 = vrot.slane %v271_v58, 2  ;;  %v552_v40 = vrot.slane %v2728_v14, 2  ;;  %v491_v42 = vrot.slane %v2773_v38, 1  ;;  %v2448_v51 = vld [vmem:[%s3249_s1 + $0x1a8] sm:$0xff]   ;;  %v2808_v54 = vld [vmem:[%s2671_s5 + $0x78] sm:$0xff]  ;;  %v2449_v56 = vld [vmem:[%s3249_s1 + $0x150] sm:$0xff]  }
  0x23   : > { %2114 = vmatprep.subr.bf16.mxu1 %v2422_v21  ;;  %v2737_v19 = vpack.c.bf16 %v485_v17, %v483_v8  ;;  %v2739_v21 = vpack.c.bf16 %v545_v13, %v543_v12  ;;  %v492_v43 = vrot.slane %v2776_v39, 1  ;;  %v494_v46 = vrot.slane %v2769_v36, 1  ;;  %v2820_v59 = vld [vmem:[%s2671_s5 + $0x88] sm:$0x3]  ;;  %v2450_v60 = vld [vmem:[%s3249_s1 + $0x1e0] sm:$0xff]   ;;  %v2451_v63 = vld [vmem:[%s3249_s1 + $0x110] sm:$0xff]  }
  0x24   : > { %v548_v33 = vsel %vm535_vm1, %v546_v16, %v547_v20  ;;  %v2794_v48 = vpack.c.bf16 %v2776_v39, %v2773_v38  ;;  %v553_v57 = vsel %vm535_vm1, %v551_v37, %v552_v40  ;;  %v497_v2 = vrot.slane %v2811_v55, 1  ;;  %v2454_v12 = vld [vmem:[%s3249_s1 + $0x1d8] sm:$0xff]   ;;  %v2455_v17 = vld [vmem:[%s3249_s1 + $0x108] sm:$0xff]  }
  0x25   : > { %2051 = vmatpush3.bf16.msra.mxu0 %v2423_v22  ;;  %v486_v22 = vrot.slane %v2718_v10, 1  ;;  %v493_v52 = vsel %vm470_vm0, %v491_v42, %v492_v43  ;;  %v495_v53 = vsel %vm470_vm0, %v492_v43, %v494_v46  ;;  %v499_v3 = vrot.slane %v2820_v59, 1  ;;  %v2863_v16 = vld [vmem:[%s2671_s5 + $0x98] sm:$0xff]  ;;  %v2460_v37 = vld [vmem:[%s3249_s1 + $0x1c8] sm:$0xff]   ;;  %v2461_v46 = vld [vmem:[%s3249_s1 + $0x100] sm:$0xff]  }
  0x26   : > { %2115 = vmatpush3.bf16.msra.mxu1 %v2424_v23  ;;  %2052 = vmatprep.subr.bf16.mxu0 %v2425_v24  ;;  %v487_v23 = vrot.slane %v2728_v14, 1  ;;  %v275_v24 = vld [vmem:[%s2671_s5 + $0x58] sm:$0x3]  ;;  %v2825_v61 = vpack.c.bf16 %v495_v53, %v493_v52  ;;  %v2842_v8 = vpack.c.bf16 %v2811_v55, %v2808_v54  ;;  %v559_v9 = vrot.slane %v2769_v36, 2  ;;  %v2463_v53 = vld [vmem:[%s3249_s1 + $0x1c0] sm:$0xff]  }
  0x27   : > { %2116 = vmatprep.subr.bf16.mxu1 %v2426_v25  ;;  %v2746_v25 = vpack.c.bf16 %v2728_v14, %v2718_v10  ;;  %v2453_v10 = vld [vmem:[%s3249_s1 + $0x148] sm:$0xff]   ;;  %v500_v14 = vsel %vm470_vm0, %v497_v2, %v499_v3 }
  0x29   : > { %2053 = vmatpush3.bf16.msra.mxu0 %v2427_v26  ;;  %v549_v26 = vrot.slane %v272_v6, 2  ;;  %v556_v6 = vrot.slane %v2773_v38, 2  ;;  %v2904_v38 = vld [vmem:[%s2671_s5 + $0xa8] sm:$0xff] }
  0x2a   : > { %2117 = vmatpush3.bf16.msra.mxu1 %v2428_v27  ;;  %2054 = vmatprep.subr.bf16.mxu0 %v2429_v28  ;;  %v489_v27 = vrot.slane %v275_v24, 1  ;;  %v2441_v28 = vld [vmem:[%s3249_s1 + $0x160] sm:$0xff]   ;;  %v506_v52 = vrot.slane %v2904_v38, 1 }
  0x2b   : > { %2118 = vmatprep.subr.bf16.mxu1 %v2430_v29  ;;  %v2442_v29 = vld [vmem:[%s3249_s1 + $0x1f0] sm:$0xff]   ;;  %v550_v34 = vsel %vm535_vm1, %v547_v20, %v549_v26 }
  0x2c   : > { %v2458_v26 = vld [vmem:[%s3249_s1 + $0x190] sm:$0xff]  }
  0x2d   : > { %2055 = vmatpush3.bf16.msra.mxu0 %v2431_v30  ;;  %v488_v30 = vsel %vm470_vm0, %v486_v22, %v487_v23  ;;  %v2456_v22 = vld [vmem:[%s3249_s1 + $0x198] sm:$0xff]  }
  0x2e   : > { %2119 = vmatpush3.bf16.msra.mxu1 %v2432_v31  ;;  %2168 = vmatprep.subr.bf16.mxu0 %v2433_v45  ;;  %v490_v31 = vsel %vm470_vm0, %v487_v23, %v489_v27  ;;  %v2786_v45 = vpack.c.bf16 %v550_v34, %v548_v33  ;;  %v2457_v23 = vld [vmem:[%s3249_s1 + $0x1d0] sm:$0xff]   ;;  %v564_v34 = vrot.slane %v2820_v59, 2 }
  0x2f   : > { %2232 = vmatprep.subr.bf16.mxu1 %v2438_v11  ;;  %v2851_v11 = vld [vmem:[%s2671_s5 + $0xa0] sm:$0x3] }
  0x30   : > { %1105 = vmatmul.mubr.bf16.vlgmr.msra.gmra.mxu0 %v438_v49  ;;  %v554_v49 = vrot.slane %v275_v24, 2 }
  0x31   : > { %2169 = vmatpush3.bf16.msra.mxu0 %v2434_v50  ;;  %1202 = vmatmul.mubr.bf16.vlgmr.msra.gmra.mxu1 %v592_v1  ;;  %v2447_v50 = vld [vmem:[%s3249_s1 + $0x118] sm:$0xff]   ;;  %v496_v1 = vrot.slane %v2808_v54, 1 }
  0x32   : > { %2170 = vmatprep.subr.bf16.mxu0 %v2435_v0  ;;  %1112 = vmatprep.mubr.bf16.mxu0 %v2707_v4  ;;  %v555_v58 = vsel %vm535_vm1, %v552_v40, %v554_v49  ;;  %v567_v40 = vrot.slane %v2863_v16, 2 }
  0x33   : > { %1209 = vmatprep.mubr.bf16.mxu1 %v2701_v62  ;;  %2233 = vmatpush3.bf16.msra.mxu1 %v2440_v18  ;;  %v2830_v0 = vpack.c.bf16 %v555_v58, %v553_v57  ;;  %v498_v13 = vsel %vm470_vm0, %v496_v1, %v497_v2  ;;  %v2464_v57 = vld [vmem:[%s3249_s1 + $0x180] sm:$0xff]   ;;  %v289_v1 = vld [vmem:[%s2671_s5 + $0xc8] sm:$0xff] }
  0x34   : > { %2234 = vmatprep.subr.bf16.mxu1 %v2442_v29  ;;  %v2877_v24 = vpack.c.bf16 %v500_v14, %v498_v13  ;;  %v502_v29 = vrot.slane %v2863_v16, 1  ;;  %v605_v3 = vrot.slane %v289_v1, 1  ;;  %v290_v13 = vld [vmem:[%s2671_s5 + $0xd0] sm:$0x3] }
  0x35   : > { %2171 = vmatpush3.bf16.msra.mxu0 %v2436_v5  ;;  %v2452_v5 = vld [vmem:[%s3249_s1 + $0x1a0] sm:$0xff]  }
  0x36   : > { %2172 = vmatprep.subr.bf16.mxu0 %v2437_v7  ;;  %v557_v7 = vrot.slane %v2776_v39, 2  ;;  %v2907_v39 = vld [vmem:[%s2671_s5 + $0xb8] sm:$0x3] }
  0x37   : > { %2235 = vmatpush3.bf16.msra.mxu1 %v2444_v35  ;;  %v2459_v35 = vld [vmem:[%s3249_s1 + $0x140] sm:$0xff]   ;;  %v509_v59 = vrot.slane %v2907_v39, 1 }
  0x38   : > { %1113 = vmatmul.mubr.bf16.gmra.mxu0 %v2684_v41  ;;  %v2779_v41 = vpack.c.bf16 %v490_v31, %v488_v30  ;;  %2236 = vmatprep.subr.bf16.mxu1 %v2446_v47  ;;  %v558_v18 = vsel %vm535_vm1, %v556_v6, %v557_v7  ;;  %v560_v20 = vsel %vm535_vm1, %v557_v7, %v559_v9  ;;  %v504_v30 = vrot.slane %v2851_v11, 1 }
  0x39   : > { %1120 = vmatprep.mubr.bf16.mxu0 %v2737_v19  ;;  %2173 = vmatpush3.bf16.msra.mxu0 %v2439_v15  ;;  %v2860_v15 = vld [vmem:[%s2671_s5 + $0x90] sm:$0xff]  ;;  %v2882_v27 = vpack.c.bf16 %v560_v20, %v558_v18  ;;  %v561_v31 = vrot.slane %v2808_v54, 2  ;;  %v613_v9 = vrot.slane %v289_v1, 2 }
  0x3a   : > { %1210 = vmatmul.mubr.bf16.gmra.mxu1 %v2739_v21  ;;  %2174 = vmatprep.subr.bf16.mxu0 %v2441_v28  ;;  %v501_v28 = vrot.slane %v2860_v15, 1  ;;  %v2891_v33 = vpack.c.bf16 %v2863_v16, %v2860_v15  ;;  %v566_v36 = vrot.slane %v2860_v15, 2  ;;  %v505_v43 = vsel %vm470_vm0, %v502_v29, %v504_v30 }
  0x3b   : > { %1217 = vmatprep.mubr.bf16.mxu1 %v2746_v25  ;;  %2237 = vmatpush3.bf16.msra.mxu1 %v2448_v51  ;;  %v2462_v51 = vld [vmem:[%s3249_s1 + $0x188] sm:$0xff]  }
  0x3c   : > { %2238 = vmatprep.subr.bf16.mxu1 %v2450_v60  ;;  %v503_v42 = vsel %vm470_vm0, %v501_v28, %v502_v29  ;;  %v2943_v60 = vld [vmem:[%s3249_s1 + $0x238] sm:$0xff]   ;;  %v2975_v28 = vld [vmem:[%s2671_s5 + $0xe0] sm:$0xff]  ;;  %v293_v29 = vld [vmem:[%s2671_s5 + $0xe8] sm:$0x3] }
  0x3d   : > { %2175 = vmatpush3.bf16.msra.mxu0 %v2443_v32  ;;  %v562_v32 = vrot.slane %v2811_v55, 2  ;;  %v2930_v54 = vpack.c.bf16 %v505_v43, %v503_v42 }
  0x3e   : > { %2176 = vmatprep.subr.bf16.mxu0 %v2445_v44  ;;  %v2914_v44 = vld [vmem:[%s2671_s5 + $0xb0] sm:$0xff] }
  0x3f   : > { %2239 = vmatpush3.bf16.msra.mxu1 %v2452_v5  ;;  %v563_v47 = vsel %vm535_vm1, %v561_v31, %v562_v32  ;;  %v565_v49 = vsel %vm535_vm1, %v562_v32, %v564_v34  ;;  %v507_v55 = vrot.slane %v2914_v44, 1  ;;  %v568_v5 = vsel %vm535_vm1, %v566_v36, %v567_v40 }
  0x40   : > { %1121 = vmatmul.mubr.bf16.gmra.mxu0 %v2701_v62  ;;  %2240 = vmatprep.subr.bf16.mxu1 %v2454_v12  ;;  %v2937_v58 = vpack.c.bf16 %v565_v49, %v563_v47  ;;  %v571_v12 = vrot.slane %v2904_v38, 2  ;;  %v572_v14 = vrot.slane %v2914_v44, 2  ;;  %v625_v32 = vrot.slane %v2975_v28, 1 }
  0x41   : > { %1128 = vmatprep.mubr.bf16.mxu0 %v2779_v41  ;;  %2177 = vmatpush3.bf16.msra.mxu0 %v2447_v50  ;;  %v569_v50 = vrot.slane %v2851_v11, 2  ;;  %v510_v11 = vsel %vm470_vm0, %v507_v55, %v509_v59  ;;  %v627_v34 = vrot.slane %v293_v29, 1 }
  0x42   : > { %1218 = vmatmul.mubr.bf16.gmra.mxu1 %v2786_v45  ;;  %2178 = vmatprep.subr.bf16.mxu0 %v2449_v56  ;;  %v288_v56 = vld [vmem:[%s2671_s5 + $0xc0] sm:$0xff]  ;;  %v573_v49 = vsel %vm535_vm1, %v571_v12, %v572_v14 }
  0x43   : > { %1225 = vmatprep.mubr.bf16.mxu1 %v2794_v48  ;;  %2241 = vmatpush3.bf16.msra.mxu1 %v2456_v22  ;;  %v604_v2 = vrot.slane %v288_v56, 1  ;;  %v570_v6 = vsel %vm535_vm1, %v567_v40, %v569_v50  ;;  %v612_v7 = vrot.slane %v288_v56, 2  ;;  %v2968_v20 = vpack.c.bf16 %v289_v1, %v288_v56 }
  0x44   : > { %2242 = vmatprep.subr.bf16.mxu1 %v2457_v23  ;;  %v2963_v15 = vpack.c.bf16 %v570_v6, %v568_v5  ;;  %v615_v23 = vrot.slane %v290_v13, 2  ;;  %v2993_v43 = vsel %vm470_vm0, %v625_v32, %v627_v34 }
  0x45   : > { %2179 = vmatpush3.bf16.msra.mxu0 %v2451_v63  ;;  %v2947_v63 = vpack.c.bf16 %v2914_v44, %v2904_v38  ;;  %v606_v16 = vsel %vm470_vm0, %v604_v2, %v605_v3  ;;  %v614_v22 = vsel %vm535_vm1, %v612_v7, %v613_v9  ;;  %v633_v44 = vrot.slane %v2975_v28, 2 }
  0x46   : > { %2180 = vmatprep.subr.bf16.mxu0 %v2453_v10  ;;  %v508_v10 = vsel %vm470_vm0, %v506_v52, %v507_v55  ;;  %v2466_v55 = vld [vmem:[%s3249_s1 + $0x230] sm:$0xff]  }
  0x47   : > { %2243 = vmatpush3.bf16.msra.mxu1 %v2458_v26  ;;  %v2966_v18 = vpack.c.bf16 %v510_v11, %v508_v10  ;;  %v2972_v26 = vld [vmem:[%s2671_s5 + $0xd8] sm:$0xff] }
  0x48   : > { %1129 = vmatmul.mubr.bf16.gmra.mxu0 %v2746_v25  ;;  %2244 = vmatprep.subr.bf16.mxu1 %v2460_v37  ;;  %v624_v31 = vrot.slane %v2972_v26, 1  ;;  %v616_v37 = vsel %vm535_vm1, %v613_v9, %v615_v23  ;;  %v632_v38 = vrot.slane %v2972_v26, 2 }
  0x49   : > { %1136 = vmatprep.mubr.bf16.mxu0 %v2825_v61  ;;  %2181 = vmatpush3.bf16.msra.mxu0 %v2455_v17  ;;  %v607_v17 = vrot.slane %v290_v13, 1  ;;  %v2987_v40 = vpack.c.bf16 %v616_v37, %v614_v22 }
  0x4a   : > { %1226 = vmatmul.mubr.bf16.gmra.mxu1 %v2830_v0  ;;  %2182 = vmatprep.subr.bf16.mxu0 %v2459_v35  ;;  %v574_v35 = vrot.slane %v2907_v39, 2  ;;  %v2990_v42 = vsel %vm470_vm0, %v624_v31, %v625_v32  ;;  %v3001_v47 = vsel %vm535_vm1, %v632_v38, %v633_v44 }
  0x4b   : > { %1233 = vmatprep.mubr.bf16.mxu1 %v2842_v8  ;;  %2245 = vmatpush3.bf16.msra.mxu1 %v2462_v51  ;;  %v608_v30 = vsel %vm470_vm0, %v605_v3, %v607_v17  ;;  %v631_v39 = vpack.c.bf16 %v2993_v43, %v2990_v42 }
  0x4c   : > { %2246 = vmatprep.subr.bf16.mxu1 %v2463_v53  ;;  %v2982_v36 = vpack.c.bf16 %v608_v30, %v606_v16  ;;  %v575_v50 = vsel %vm535_vm1, %v572_v14, %v574_v35 }
  0x4d   : > { %2183 = vmatpush3.bf16.msra.mxu0 %v2461_v46  ;;  %v635_v46 = vrot.slane %v293_v29, 2  ;;  %v3011_v53 = vpack.c.bf16 %v575_v50, %v573_v49 }
  0x4e   : > { %2312 = vmatprep.subr.bf16.mxu0 %v2943_v60 }
  0x4f   : > { %2247 = vmatpush3.bf16.msra.mxu1 %v2464_v57  ;;  %v3007_v51 = vsel %vm535_vm1, %v633_v44, %v635_v46 }
  0x50   : > { %1137 = vmatmul.mubr.bf16.gmra.mxu0 %v2794_v48  ;;  %2344 = vmatprep.subr.bf16.mxu1 %v2943_v60  ;;  %v639_v52 = vpack.c.bf16 %v3007_v51, %v3001_v47 }
  0x51   : > { %1144 = vmatprep.mubr.bf16.mxu0 %v2877_v24 }
  0x52   : > { %1234 = vmatmul.mubr.bf16.gmra.mxu1 %v2882_v27 }
  0x53   : > { %1241 = vmatprep.mubr.bf16.mxu1 %v2891_v33 }
  0x58   : > { %1145 = vmatmul.mubr.bf16.gmra.mxu0 %v2842_v8 }
  0x59   : > { %1152 = vmatprep.mubr.bf16.mxu0 %v2930_v54 }
  0x5a   : > { %1242 = vmatmul.mubr.bf16.gmra.mxu1 %v2937_v58 }
  0x5b   : > { %1249 = vmatprep.mubr.bf16.mxu1 %v2947_v63 }
  0x60   : > { %1153 = vmatmul.mubr.bf16.gmra.mxu0 %v2891_v33 }
  0x61   : > { %1160 = vmatprep.mubr.bf16.mxu0 %v2966_v18 }
  0x62   : > { %1250 = vmatmul.mubr.bf16.gmra.mxu1 %v2963_v15 }
  0x63   : > { %1257 = vmatprep.mubr.bf16.mxu1 %v2968_v20 }
  0x68   : > { %1161 = vmatmul.mubr.bf16.gmra.mxu0 %v2947_v63 }
  0x69   : > { %1298 = vmatprep.mubr.bf16.mxu0 %v2739_v21  ;;  %v2467_v21 = vld [vmem:[%s3249_s1 + $0x228] sm:$0xff]  }
  0x6a   : > { %1258 = vmatmul.mubr.bf16.gmra.mxu1 %v3011_v53 }
  0x6b   : > { %1395 = vmatprep.mubr.bf16.mxu1 %v2737_v19 }
  0x70   : > { %1299 = vmatmul.mubr.bf16.vlgmr.msra.gmra.mxu0 %v2707_v4  ;;  %v2468_v4 = vld [vmem:[%s3249_s1 + $0x220] sm:$0xff]  }
  0x71   : > { %2313 = vmatpush3.bf16.msra.mxu0 %v2943_v60  ;;  %1306 = vmatprep.mubr.bf16.mxu0 %v2786_v45 }
  0x72   : > { %1396 = vmatmul.mubr.bf16.vlgmr.msra.gmra.mxu1 %v2701_v62  ;;  %2314 = vmatprep.subr.bf16.mxu0 %v2466_v55  ;;  %v2469_v62 = vld [vmem:[%s3249_s1 + $0x218] sm:$0xff]  }
  0x73   : > { %1403 = vmatprep.mubr.bf16.mxu1 %v2779_v41  ;;  %2352 = vmatpush3.bf16.msra.mxu1 %v2943_v60 }
  0x74   : > { %2345 = vmatprep.subr.bf16.mxu1 %v2466_v55 }
  0x75   : > { %2315 = vmatpush3.bf16.msra.mxu0 %v2466_v55 }
  0x76   : > { %2316 = vmatprep.subr.bf16.mxu0 %v2467_v21 }
  0x77   : > { %2353 = vmatpush3.bf16.msra.mxu1 %v2466_v55 }
  0x78   : > { %1307 = vmatmul.mubr.bf16.gmra.mxu0 %v2737_v19  ;;  %2346 = vmatprep.subr.bf16.mxu1 %v2467_v21  ;;  %v2470_v19 = vld [vmem:[%s3249_s1 + $0x210] sm:$0xff]  }
  0x79   : > { %1314 = vmatprep.mubr.bf16.mxu0 %v2830_v0  ;;  %2317 = vmatpush3.bf16.msra.mxu0 %v2467_v21 }
  0x7a   : > { %1404 = vmatmul.mubr.bf16.gmra.mxu1 %v2746_v25  ;;  %2318 = vmatprep.subr.bf16.mxu0 %v2468_v4  ;;  %v2471_v25 = vld [vmem:[%s3249_s1 + $0x208] sm:$0xff]  }
  0x7b   : > { %1411 = vmatprep.mubr.bf16.mxu1 %v2825_v61  ;;  %2354 = vmatpush3.bf16.msra.mxu1 %v2467_v21 }
  0x7c   : > { %2347 = vmatprep.subr.bf16.mxu1 %v2468_v4 }
  0x7d   : > { %2319 = vmatpush3.bf16.msra.mxu0 %v2468_v4 }
  0x7e   : > { %2320 = vmatprep.subr.bf16.mxu0 %v2469_v62 }
  0x7f   : > { %2355 = vmatpush3.bf16.msra.mxu1 %v2468_v4 }
  0x80   : > { %1315 = vmatmul.mubr.bf16.gmra.mxu0 %v2779_v41  ;;  %2348 = vmatprep.subr.bf16.mxu1 %v2469_v62  ;;  %v2472_v41 = vld [vmem:[%s3249_s1 + $0x200] sm:$0xff]  }
  0x81   : > { %1322 = vmatprep.mubr.bf16.mxu0 %v2882_v27  ;;  %2321 = vmatpush3.bf16.msra.mxu0 %v2469_v62 }
  0x82   : > { %1412 = vmatmul.mubr.bf16.gmra.mxu1 %v2794_v48  ;;  %2322 = vmatprep.subr.bf16.mxu0 %v2470_v19  ;;  %v620_v48 = vpack.c.bf16 %v2975_v28, %v2972_v26 }
  0x83   : > { %1419 = vmatprep.mubr.bf16.mxu1 %v2877_v24  ;;  %2356 = vmatpush3.bf16.msra.mxu1 %v2469_v62 }
  0x84   : > { %2349 = vmatprep.subr.bf16.mxu1 %v2470_v19 }
  0x85   : > { %2323 = vmatpush3.bf16.msra.mxu0 %v2470_v19 }
  0x86   : > { %2324 = vmatprep.subr.bf16.mxu0 %v2471_v25 }
  0x87   : > { %2357 = vmatpush3.bf16.msra.mxu1 %v2470_v19 }
  0x88   : > { %1323 = vmatmul.mubr.bf16.gmra.mxu0 %v2825_v61  ;;  %2350 = vmatprep.subr.bf16.mxu1 %v2471_v25 }
  0x89   : > { %1330 = vmatprep.mubr.bf16.mxu0 %v2937_v58  ;;  %2325 = vmatpush3.bf16.msra.mxu0 %v2471_v25 }
  0x8a   : > { %1420 = vmatmul.mubr.bf16.gmra.mxu1 %v2842_v8  ;;  %2326 = vmatprep.subr.bf16.mxu0 %v2472_v41 }
  0x8b   : > { %1427 = vmatprep.mubr.bf16.mxu1 %v2930_v54  ;;  %2358 = vmatpush3.bf16.msra.mxu1 %v2471_v25 }
  0x8c   : > { %2351 = vmatprep.subr.bf16.mxu1 %v2472_v41 }
  0x8d   : > { %2327 = vmatpush3.bf16.msra.mxu0 %v2472_v41 }
  0x8f   : > { %2359 = vmatpush3.bf16.msra.mxu1 %v2472_v41 }
  0x90   : > { %1331 = vmatmul.mubr.bf16.gmra.mxu0 %v2877_v24 }
  0x91   : > { %1338 = vmatprep.mubr.bf16.mxu0 %v2963_v15 }
  0x92   : > { %1428 = vmatmul.mubr.bf16.gmra.mxu1 %v2891_v33 }
  0x93   : > { %1435 = vmatprep.mubr.bf16.mxu1 %v2966_v18 }
  0x98   : > { %1339 = vmatmul.mubr.bf16.gmra.mxu0 %v2930_v54 }
  0x99   : > { %1346 = vmatprep.mubr.bf16.mxu0 %v3011_v53 }
  0x9a   : > { %1436 = vmatmul.mubr.bf16.gmra.mxu1 %v2947_v63 }
  0x9b   : > { %1443 = vmatprep.mubr.bf16.mxu1 %v2982_v36 }
  0xa0   : > { %1347 = vmatmul.mubr.bf16.gmra.mxu0 %v2966_v18 }
  0xa1   : > { %1354 = vmatprep.mubr.bf16.mxu0 %v2987_v40 }
  0xa2   : > { %1444 = vmatmul.mubr.bf16.gmra.mxu1 %v2968_v20 }
  0xa3   : > { %1451 = vmatprep.mubr.bf16.mxu1 %v631_v39 }
  0xa8   : > { %1355 = vmatmul.mubr.bf16.gmra.mxu0 %v2982_v36 }
  0xa9   : > { %2328 = vmatprep.mubr.bf16.mxu0 %v2786_v45 }
  0xaa   : > { %1452 = vmatmul.mubr.bf16.gmra.mxu1 %v620_v48 }
  0xab   : > { %2336 = vmatprep.mubr.bf16.mxu1 %v2963_v15 }
  0xb0   : > { %2329 = vmatmul.mubr.bf16.vlgmr.msra.gmra.mxu0 %v2830_v0 }
  0xb1   : > { %2332 = vmatprep.mubr.bf16.mxu0 %v2882_v27 }
  0xb2   : > { %2337 = vmatmul.mubr.bf16.vlgmr.msra.gmra.mxu1 %v3011_v53 }
  0xb3   : > { %2340 = vmatprep.mubr.bf16.mxu1 %v2987_v40 }
  0xb8   : > { %2333 = vmatmul.mubr.bf16.gmra.mxu0 %v2937_v58 }
  0xba   : > { %2341 = vmatmul.mubr.bf16.gmra.mxu1 %v639_v52 }
  0xf0   : > { %v2056_v61 = vpop.f32.mrf.mxu0 }
  0xf1   : > { %v2120_v8 = vpop.f32.mrf.mxu1 }
  0xf2   : > { %v2057_v45 = vpop.f32.mrf.mxu0 }
  0xf3   : > { %v2058_v24 = vadd.f32 %v2057_v45, %v2056_v61  ;;  %v2121_v33 = vpop.f32.mrf.mxu1 }
  0xf4   : > { %v2059_v54 = vpop.f32.mrf.mxu0  ;;  %v2122_v56 = vadd.f32 %v2121_v33, %v2120_v8 }
  0xf5   : > { %v2123_v0 = vpop.f32.mrf.mxu1 }
  0xf6   : > { %v2060_v57 = vpop.f32.mrf.mxu0  ;;  %v3083_v27 = vadd.f32 %v2122_v56, %v2058_v24 }
  0xf7   : > { %v2061_v59 = vadd.f32 %v2060_v57, %v2059_v54  ;;  %v2124_v60 = vpop.f32.mrf.mxu1 }
  0xf8   : > { %v2062_v63 = vpop.f32.mrf.mxu0  ;;  %v2125_v1 = vadd.f32 %v2124_v60, %v2123_v0 }
  0xfa   : > { %v2126_v58 = vpop.f32.mrf.mxu1  ;;  %v2063_v2 = vpop.f32.mrf.mxu0  ;;  %v3085_v3 = vadd.f32 %v2125_v1, %v2061_v59 }
  0xfb   : > { %v2064_v5 = vadd.f32 %v2063_v2, %v2062_v63 }
  0xfc   : > { %v2127_v6 = vpop.f32.mrf.mxu1  ;;  %v2065_v7 = vpop.f32.mrf.mxu0 }
  0xfd   : > { %v2128_v9 = vadd.f32 %v2127_v6, %v2126_v58 }
  0xfe   : > { %v2129_v10 = vpop.f32.mrf.mxu1  ;;  %v2066_v11 = vpop.f32.mrf.mxu0 }
  0xff   : > { %v3087_v12 = vadd.f32 %v2128_v9, %v2064_v5  ;;  %v2067_v13 = vadd.f32 %v2066_v11, %v2065_v7 }
 0x100   : > { %v2130_v14 = vpop.f32.mrf.mxu1  ;;  %v2068_v15 = vpop.f32.mrf.mxu0 }
 0x101   : > { %v2131_v16 = vadd.f32 %v2130_v14, %v2129_v10 }
 0x102   : > { %v2132_v17 = vpop.f32.mrf.mxu1  ;;  %v2069_v18 = vpop.f32.mrf.mxu0 }
 0x103   : > { %v3089_v20 = vadd.f32 %v2131_v16, %v2067_v13  ;;  %v2070_v22 = vadd.f32 %v2069_v18, %v2068_v15 }
 0x104   : > { %v2133_v23 = vpop.f32.mrf.mxu1  ;;  %v2071_v26 = vpop.f32.mrf.mxu0 }
 0x105   : > { %v2134_v28 = vadd.f32 %v2133_v23, %v2132_v17 }
 0x106   : > { %v2135_v29 = vpop.f32.mrf.mxu1  ;;  %v2072_v30 = vpop.f32.mrf.mxu0 }
 0x107   : > { %v3091_v31 = vadd.f32 %v2134_v28, %v2070_v22  ;;  %v2073_v32 = vadd.f32 %v2072_v30, %v2071_v26 }
 0x108   : > { %v2136_v34 = vpop.f32.mrf.mxu1  ;;  %v2074_v35 = vpop.f32.mrf.mxu0 }
 0x109   : > { %v2137_v36 = vadd.f32 %v2136_v34, %v2135_v29 }
 0x10a   : > { %v2138_v37 = vpop.f32.mrf.mxu1  ;;  %v2075_v38 = vpop.f32.mrf.mxu0 }
 0x10b   : > { %v3093_v40 = vadd.f32 %v2137_v36, %v2073_v32  ;;  %v2076_v42 = vadd.f32 %v2075_v38, %v2074_v35 }
 0x10c   : > { %v2139_v43 = vpop.f32.mrf.mxu1  ;;  %v2077_v44 = vpop.f32.mrf.mxu0 }
 0x10d   : > { %v2140_v39 = vadd.f32 %v2139_v43, %v2138_v37 }
 0x10e   : > { %v2141_v46 = vpop.f32.mrf.mxu1  ;;  %v2078_v47 = vpop.f32.mrf.mxu0 }
 0x10f   : > { %v3095_v49 = vadd.f32 %v2140_v39, %v2076_v42  ;;  %v2079_v50 = vadd.f32 %v2078_v47, %v2077_v44 }
 0x110   : > { %v2142_v51 = vpop.f32.mrf.mxu1  ;;  %v2080_v52 = vpop.f32.mrf.mxu0 }
 0x111   : > { %v2143_v53 = vadd.f32 %v2142_v51, %v2141_v46 }
 0x112   : > { %v2144_v55 = vpop.f32.mrf.mxu1  ;;  %v2081_v21 = vpop.f32.mrf.mxu0 }
 0x113   : > { %v3097_v4 = vadd.f32 %v2143_v53, %v2079_v50  ;;  %v2082_v62 = vadd.f32 %v2081_v21, %v2080_v52 }
 0x114   : > { %v2145_v19 = vpop.f32.mrf.mxu1  ;;  %v2083_v25 = vpop.f32.mrf.mxu0 }
 0x115   : > { %3253 = vst [vmem:[#allocation2_spill] sm:$0xff] %v3097_v4  ;;  %v2146_v41 = vadd.f32 %v2145_v19, %v2144_v55 }
 0x116   : > { %v2147_v48 = vpop.f32.mrf.mxu1  ;;  %v2084_v61 = vpop.f32.mrf.mxu0 }
 0x117   : > { %v3099_v8 = vadd.f32 %v2146_v41, %v2082_v62  ;;  %v2085_v45 = vadd.f32 %v2084_v61, %v2083_v25 }
 0x118   : > { %v2148_v24 = vpop.f32.mrf.mxu1  ;;  %v2086_v33 = vpop.f32.mrf.mxu0 }
 0x119   : > { %v2149_v54 = vadd.f32 %v2148_v24, %v2147_v48 }
 0x11a   : > { %v2150_v56 = vpop.f32.mrf.mxu1  ;;  %v2087_v0 = vpop.f32.mrf.mxu0 }
 0x11b   : > { %v3101_v57 = vadd.f32 %v2149_v54, %v2085_v45  ;;  %v2088_v59 = vadd.f32 %v2087_v0, %v2086_v33 }
 0x11c   : > { %v2151_v60 = vpop.f32.mrf.mxu1  ;;  %v2089_v63 = vpop.f32.mrf.mxu0 }
 0x11d   : > { %v2152_v1 = vadd.f32 %v2151_v60, %v2150_v56 }
 0x11e   : > { %v2153_v58 = vpop.f32.mrf.mxu1  ;;  %v2090_v2 = vpop.f32.mrf.mxu0 }
 0x11f   : > { %v3103_v5 = vadd.f32 %v2152_v1, %v2088_v59  ;;  %v2091_v6 = vadd.f32 %v2090_v2, %v2089_v63 }
 0x120   : > { %v2154_v7 = vpop.f32.mrf.mxu1  ;;  %v2092_v9 = vpop.f32.mrf.mxu0 }
 0x121   : > { %v2155_v10 = vadd.f32 %v2154_v7, %v2153_v58 }
 0x122   : > { %v2156_v11 = vpop.f32.mrf.mxu1  ;;  %v2093_v13 = vpop.f32.mrf.mxu0 }
 0x123   : > { %v3105_v14 = vadd.f32 %v2155_v10, %v2091_v6  ;;  %v2094_v15 = vadd.f32 %v2093_v13, %v2092_v9 }
 0x124   : > { %v2157_v16 = vpop.f32.mrf.mxu1  ;;  %v2095_v17 = vpop.f32.mrf.mxu0 }
 0x125   : > { %v2158_v18 = vadd.f32 %v2157_v16, %v2156_v11 }
 0x126   : > { %v2159_v22 = vpop.f32.mrf.mxu1  ;;  %v2096_v23 = vpop.f32.mrf.mxu0 }
 0x127   : > { %v3107_v26 = vadd.f32 %v2158_v18, %v2094_v15  ;;  %v2097_v28 = vadd.f32 %v2096_v23, %v2095_v17 }
 0x128   : > { %v2160_v29 = vpop.f32.mrf.mxu1  ;;  %v2098_v30 = vpop.f32.mrf.mxu0 }
 0x129   : > { %3254 = vst [vmem:[#allocation3_spill] sm:$0xff] %v3107_v26  ;;  %v2161_v32 = vadd.f32 %v2160_v29, %v2159_v22 }
 0x12a   : > { %v2162_v34 = vpop.f32.mrf.mxu1  ;;  %v2099_v35 = vpop.f32.mrf.mxu0 }
 0x12b   : > { %v3109_v36 = vadd.f32 %v2161_v32, %v2097_v28  ;;  %v2100_v37 = vadd.f32 %v2099_v35, %v2098_v30 }
 0x12c   : > { %v2163_v38 = vpop.f32.mrf.mxu1  ;;  %v2101_v42 = vpop.f32.mrf.mxu0 }
 0x12d   : > { %3255 = vst [vmem:[#allocation4_spill] sm:$0xff] %v3109_v36  ;;  %v2164_v43 = vadd.f32 %v2163_v38, %v2162_v34 }
 0x12e   : > { %v2165_v44 = vpop.f32.mrf.mxu1  ;;  %v2102_v39 = vpop.f32.mrf.mxu0 }
 0x12f   : > { %v3111_v46 = vadd.f32 %v2164_v43, %v2100_v37  ;;  %v2103_v47 = vadd.f32 %v2102_v39, %v2101_v42 }
 0x130   : > { %v2166_v50 = vpop.f32.mrf.mxu1  ;;  %v2184_v51 = vpop.f32.mrf.mxu0 }
 0x131   : > { %3256 = vst [vmem:[#allocation5_spill] sm:$0xff] %v3111_v46  ;;  %v2167_v52 = vadd.f32 %v2166_v50, %v2165_v44 }
 0x132   : > { %v2248_v53 = vpop.f32.mrf.mxu1  ;;  %v2185_v55 = vpop.f32.mrf.mxu0 }
 0x133   : > { %v3113_v21 = vadd.f32 %v2167_v52, %v2103_v47  ;;  %v2186_v62 = vadd.f32 %v2185_v55, %v2184_v51 }
 0x134   : > { %v2249_v19 = vpop.f32.mrf.mxu1  ;;  %v2187_v25 = vpop.f32.mrf.mxu0 }
 0x135   : > { %3257 = vst [vmem:[#allocation6_spill] sm:$0xff] %v3113_v21  ;;  %v1301_v41 = vadd.f32 %v2186_v62, %v3083_v27  ;;  %v2250_v48 = vadd.f32 %v2249_v19, %v2248_v53 }
 0x136   : > { %v3116_v61 = vpop.f32.mrf.mxu1  ;;  %v2188_v45 = vpop.f32.mrf.mxu0 }
 0x137   : > { %v3118_v24 = vadd.f32 %v2250_v48, %v1301_v41 }
 0x138   : > { %v2252_v33 = vpop.f32.mrf.mxu1  ;;  %v2190_v54 = vpop.f32.mrf.mxu0 }
 0x139   : > { %3258 = vst [vmem:[#allocation7_spill] sm:$0xff] %v3118_v24  ;;  %v2189_v24 = vadd.f32 %v2188_v45, %v2187_v25 }
 0x13a   : > { %v2254_v56 = vpop.f32.mrf.mxu1  ;;  %v2191_v0 = vpop.f32.mrf.mxu0 }
 0x13b   : > { %v2192_v26 = vadd.f32 %v2191_v0, %v2190_v54 }
 0x13c   : > { %v2255_v59 = vpop.f32.mrf.mxu1  ;;  %v2193_v60 = vpop.f32.mrf.mxu0 }
 0x13d   : > { %v1309_v25 = vadd.f32 %v2192_v26, %v3087_v12  ;;  %v2256_v45 = vadd.f32 %v2255_v59, %v2254_v56 }
 0x13e   : > { %v3120_v63 = vpop.f32.mrf.mxu1  ;;  %v2194_v1 = vpop.f32.mrf.mxu0 }
 0x13f   : > { %v2195_v4 = vadd.f32 %v2194_v1, %v2193_v60 }
 0x140   : > { %v2258_v58 = vpop.f32.mrf.mxu1  ;;  %v2196_v2 = vpop.f32.mrf.mxu0 }
 0x141   : > { %v1312_v1 = vadd.f32 %v2195_v4, %v3089_v20 }
 0x142   : > { %v3122_v6 = vpop.f32.mrf.mxu1  ;;  %v2197_v27 = vpop.f32.mrf.mxu0 }
 0x144   : > { %v3124_v7 = vpop.f32.mrf.mxu1  ;;  %v2199_v9 = vpop.f32.mrf.mxu0 }
 0x146   : > { %v3126_v10 = vpop.f32.mrf.mxu1  ;;  %v2200_v11 = vpop.f32.mrf.mxu0 }
 0x148   : > { %v3128_v13 = vpop.f32.mrf.mxu1  ;;  %v2202_v15 = vpop.f32.mrf.mxu0 }
 0x14a   : > { %v3130_v16 = vpop.f32.mrf.mxu1  ;;  %v2203_v17 = vpop.f32.mrf.mxu0 }
 0x14c   : > { %v2267_v18 = vpop.f32.mrf.mxu1  ;;  %v2205_v22 = vpop.f32.mrf.mxu0 }
 0x14d   : > { %v2268_v4 = vadd.f32 %v2267_v18, %v3130_v16 }
 0x14e   : > { %v3132_v23 = vpop.f32.mrf.mxu1  ;;  %v2206_v28 = vpop.f32.mrf.mxu0 }
 0x14f   : > { %3259 = vst [vmem:[#allocation8_spill] sm:$0xff] %v3132_v23  ;;  %v2207_v56 = vadd.f32 %v2206_v28, %v2205_v22 }
 0x150   : > { %v3134_v29 = vpop.f32.mrf.mxu1  ;;  %v2208_v30 = vpop.f32.mrf.mxu0 }
 0x151   : > { %3260 = vst [vmem:[#allocation9_spill] sm:$0xff] %v3134_v29 }
 0x152   : > { %v2272_v32 = vpop.f32.mrf.mxu1  ;;  %v2209_v34 = vpop.f32.mrf.mxu0 }
 0x153   : > { %v2210_v54 = vadd.f32 %v2209_v34, %v2208_v30  ;;  %v3270_v30 = vld [vmem:[#allocation2_spill] sm:$0xff] }
 0x154   : > { %v2273_v35 = vpop.f32.mrf.mxu1  ;;  %v2211_v37 = vpop.f32.mrf.mxu0 }
 0x155   : > { %v1333_v59 = vadd.f32 %v2210_v54, %v3099_v8 }
 0x156   : > { %v3136_v38 = vpop.f32.mrf.mxu1  ;;  %v2212_v42 = vpop.f32.mrf.mxu0 }
 0x157   : > { %3261 = vst [vmem:[#allocation10_spill] sm:$0xff] %v3136_v38  ;;  %v1304_v38 = vadd.f32 %v2189_v24, %v3085_v3  ;;  %v2262_v3 = vadd.f32 %v3124_v7, %v3122_v6  ;;  %v2213_v12 = vadd.f32 %v2212_v42, %v2211_v37 }
 0x158   : > { %v3138_v43 = vpop.f32.mrf.mxu1  ;;  %v2214_v44 = vpop.f32.mrf.mxu0  ;;  %v3272_v37 = vld [vmem:[#allocation9_spill] sm:$0xff] }
 0x159   : > { %3262 = vst [vmem:[#allocation11_spill] sm:$0xff] %v3138_v43  ;;  %v2201_v43 = vadd.f32 %v2200_v11, %v2199_v9 }
 0x15a   : > { %v2278_v39 = vpop.f32.mrf.mxu1  ;;  %v2215_v47 = vpop.f32.mrf.mxu0 }
 0x15c   : > { %v2279_v50 = vpop.f32.mrf.mxu1  ;;  %v2217_v51 = vpop.f32.mrf.mxu0 }
 0x15d   : > { %v2280_v7 = vadd.f32 %v2279_v50, %v2278_v39 }
 0x15e   : > { %v2281_v52 = vpop.f32.mrf.mxu1  ;;  %v2218_v53 = vpop.f32.mrf.mxu0 }
 0x15f   : > { %v2219_v9 = vadd.f32 %v2218_v53, %v2217_v51 }
 0x160   : > { %v2282_v55 = vpop.f32.mrf.mxu1  ;;  %v2220_v62 = vpop.f32.mrf.mxu0  ;;  %v3269_v16 = vld [vmem:[#allocation11_spill] sm:$0xff] }
 0x162   : > { %v3140_v19 = vpop.f32.mrf.mxu1  ;;  %v2221_v41 = vpop.f32.mrf.mxu0 }
 0x163   : > { %3263 = vst [vmem:[#allocation12_spill] sm:$0xff] %v3140_v19  ;;  %v2198_v19 = vadd.f32 %v2197_v27, %v2196_v2  ;;  %v2259_v2 = vadd.f32 %v2258_v58, %v3120_v63  ;;  %v2216_v27 = vadd.f32 %v2215_v47, %v2214_v44  ;;  %v2274_v63 = vadd.f32 %v2273_v35, %v2272_v32 }
 0x164   : > { %v3143_v48 = vpop.f32.mrf.mxu1  ;;  %v3145_v36 = vpop.f32.mrf.mxu0  ;;  %v1406_v58 = vadd.f32 %v2256_v45, %v1309_v25  ;;  %v2222_v8 = vadd.f32 %v2221_v41, %v2220_v62  ;;  %v1328_v32 = vadd.f32 %v2207_v56, %v3270_v30  ;;  %v3276_v41 = vld [vmem:[#allocation7_spill] sm:$0xff] }
 0x165   : > { %3264 = vst [vmem:[#allocation13_spill] sm:$0xff] %v3143_v48  ;;  %3265 = vst [vmem:[#allocation14_spill] sm:$0xff] %v3145_v36  ;;  %v1317_v11 = vadd.f32 %v2198_v19, %v3091_v31  ;;  %v1341_v6 = vadd.f32 %v2216_v27, %v3103_v5  ;;  %v1409_v28 = vadd.f32 %v2259_v2, %v1312_v1  ;;  %v3271_v5 = vld [vmem:[#allocation8_spill] sm:$0xff] }
 0x166   : > { %v3147_v21 = vpop.f32.mrf.mxu1  ;;  %v3149_v46 = vpop.f32.mrf.mxu0 }
 0x167   : > { %3266 = vst [vmem:[#allocation15_spill] sm:$0xff] %v3147_v21  ;;  %3267 = vst [vmem:[#allocation16_spill] sm:$0xff] %v3149_v46  ;;  %v2204_v21 = vadd.f32 %v2203_v17, %v2202_v15  ;;  %v2253_v46 = vadd.f32 %v2252_v33, %v3116_v61  ;;  %v1320_v61 = vadd.f32 %v2201_v43, %v3093_v40 }
 0x168   : > { %v3151_v29 = vpop.f32.mrf.mxu1  ;;  %v2226_v23 = vpop.f32.mrf.mxu0  ;;  %v2265_v33 = vadd.f32 %v3128_v13, %v3126_v10  ;;  %v1344_v10 = vadd.f32 %v2219_v9, %v3105_v14  ;;  %v2283_v13 = vadd.f32 %v2282_v55, %v2281_v52  ;;  %v2271_v14 = vadd.f32 %v3272_v37, %v3271_v5  ;;  %v3273_v52 = vld [vmem:[#allocation3_spill] sm:$0xff] }
 0x169   : > { %v1325_v20 = vadd.f32 %v2204_v21, %v3095_v49  ;;  %v1401_v40 = vadd.f32 %v2253_v46, %v1304_v38  ;;  %v1336_v49 = vadd.f32 %v2213_v12, %v3101_v57  ;;  %v3268_v21 = vld [vmem:[#allocation10_spill] sm:$0xff]  ;;  %v1414_v46 = vadd.f32 %v2262_v3, %v1317_v11  ;;  %v3279_v11 = vld [vmem:[#allocation5_spill] sm:$0xff] }
 0x16a   : > { %v3155_v48 = vpop.f32.mrf.mxu1  ;;  %v2227_v36 = vpop.f32.mrf.mxu0  ;;  %v2277_v17 = vadd.f32 %v3269_v16, %v3268_v21  ;;  %v3182_v35 = vadd.f32 %v2265_v33, %v1320_v61  ;;  %v1430_v57 = vadd.f32 %v2274_v63, %v1333_v59  ;;  %v1438_v47 = vadd.f32 %v2280_v7, %v1341_v6  ;;  %v3274_v55 = vld [vmem:[#allocation12_spill] sm:$0xff]  ;;  %v3280_v12 = vld [vmem:[#allocation6_spill] sm:$0xff] }
 0x16b   : > { %v1422_v34 = vadd.f32 %v2268_v4, %v1325_v20  ;;  %v2228_v38 = vadd.f32 %v2227_v36, %v2226_v23  ;;  %v1441_v51 = vadd.f32 %v2283_v13, %v1344_v10  ;;  %v1349_v53 = vadd.f32 %v2222_v8, %v3273_v52  ;;  %v3281_v13 = vld [vmem:[#allocation4_spill] sm:$0xff] }
 0x16c   : > { %v2291_v0 = vpop.f32.mrf.mxu1  ;;  %v2229_v60 = vpop.f32.mrf.mxu0  ;;  %v3275_v62 = vld [vmem:[#allocation13_spill] sm:$0xff]  ;;  %v1433_v45 = vadd.f32 %v2277_v17, %v1336_v49  ;;  %v3277_v54 = vld [vmem:[#allocation14_spill] sm:$0xff] }
 0x16d   : > { %v2286_v19 = vadd.f32 %v3275_v62, %v3274_v55  ;;  %v1357_v3 = vadd.f32 %v2228_v38, %v3279_v11  ;;  %v2292_v61 = vadd.f32 %v2291_v0, %v3155_v48 }
 0x16e   : > { %v2293_v26 = vpop.f32.mrf.mxu1  ;;  %v2230_v24 = vpop.f32.mrf.mxu0  ;;  %v3282_v49 = vld [vmem:[#allocation15_spill] sm:$0xff] }
 0x16f   : > { %v2231_v42 = vadd.f32 %v2230_v24, %v2229_v60  ;;  %v3278_v60 = vld [vmem:[#allocation16_spill] sm:$0xff]  ;;  %v2289_v21 = vadd.f32 %v3151_v29, %v3282_v49  ;;  %v1454_v5 = vadd.f32 %v2292_v61, %v1357_v3  ;;  %v1446_v29 = vadd.f32 %v2286_v19, %v1349_v53 }
 0x170   : > { %v2294_v31 = vpop.f32.mrf.mxu1  ;;  %v2330_v15 = vpop.f32.mrf.mxu0  ;;  %v2225_v1 = vadd.f32 %v3278_v60, %v3277_v54 }
 0x171   : > { %v1503_v39 = vadd.f32 %v2330_v15, %v1406_v58  ;;  %v1360_v24 = vadd.f32 %v2231_v42, %v3280_v12  ;;  %v2295_v56 = vadd.f32 %v2294_v31, %v2293_v26  ;;  %v1425_v31 = vadd.f32 %v2271_v14, %v1328_v32 }
 0x172   : > { %v2338_v18 = vpop.f32.mrf.mxu1  ;;  %v1494_v22 = vpop.f32.mrf.mxu0 }
 0x173   : > { %v1495_v25 = vadd.f32 %v1494_v22, %v3276_v41  ;;  %v3197_v2 = vadd.f32 %v2338_v18, %v1438_v47  ;;  %v1661_v16 = vmul.f32 %v1503_v39, %v1503_v39  ;;  %v1457_v38 = vadd.f32 %v2295_v56, %v1360_v24 }
 0x174   : > { %v1526_v43 = vpop.f32.mrf.mxu1  ;;  %v2331_v44 = vpop.f32.mrf.mxu0 }
 0x175   : > { %v1506_v50 = vadd.f32 %v2331_v44, %v1409_v28  ;;  %v1527_v59 = vadd.f32 %v1526_v43, %v1430_v57  ;;  %v1659_v15 = vmul.f32 %v1495_v25, %v1495_v25 }
 0x176   : > { %v2339_v36 = vpop.f32.mrf.mxu1  ;;  %v1497_v23 = vpop.f32.mrf.mxu0 }
 0x177   : > { %v2001_v27 = vpack.c.bf16 %v1506_v50, %v1503_v39  ;;  %v3199_v9 = vadd.f32 %v2339_v36, %v1441_v51  ;;  %v1498_v33 = vadd.f32 %v1497_v23, %v1401_v40  ;;  %v1352_v40 = vadd.f32 %v2225_v1, %v3281_v13 }
 0x178   : > { %v1529_v20 = vpop.f32.mrf.mxu1  ;;  %v2334_v4 = vpop.f32.mrf.mxu0  ;;  %v1662_v42 = vmul.f32 %v1506_v50, %v1506_v50  ;;  %v1667_v3 = vmul.f32 %v1527_v59, %v1527_v59 }
 0x179   : > { %2033 = vst [vmem:[%s3193_s29 + $0x8] sm:$0xff] %v2001_v27   ;;  %v2021_v63 = vpack.c.bf16 %v3199_v9, %v3197_v2  ;;  %v1530_v58 = vadd.f32 %v1529_v20, %v1433_v45  ;;  %v1996_v6 = vpack.c.bf16 %v1498_v33, %v1495_v25  ;;  %v1637_v7 = vadd.f32 %v1498_v33, %v1495_v25 }
 0x17a   : > { %v1660_v10 = vmul.f32 %v1498_v33, %v1498_v33  ;;  %v2342_v48 = vpop.f32.mrf.mxu1  ;;  %v1510_v0 = vpop.f32.mrf.mxu0  ;;  %v1519_v30 = vadd.f32 %v2334_v4, %v1422_v34  ;;  %v1449_v51 = vadd.f32 %v2289_v21, %v1352_v40  ;;  %v1669_v4 = vmul.f32 %v3197_v2, %v3197_v2 }
 0x17b   : > { %2037 = vst [vmem:[%s3193_s29 + $0x28] sm:$0xff] %v2021_v63   ;;  %v2016_v26 = vpack.c.bf16 %v1530_v58, %v1527_v59  ;;  %1997 = vst [vmem:[%s3193_s29] sm:$0xff] %v1996_v6   ;;  %v1638_v17 = vadd.f32 %v1637_v7, %v1503_v39  ;;  %v1511_v18 = vadd.f32 %v1510_v0, %v1414_v46 }
 0x17c   : > { %v1675_v8 = vadd.f32 %v1660_v10, %v1659_v15  ;;  %v1542_v22 = vpop.f32.mrf.mxu1  ;;  %v2335_v28 = vpop.f32.mrf.mxu0  ;;  %v1551_v32 = vadd.f32 %v2342_v48, %v1454_v5  ;;  %v1665_v54 = vmul.f32 %v1519_v30, %v1519_v30  ;;  %v1668_v24 = vmul.f32 %v1530_v58, %v1530_v58 }
 0x17d   : > { %2036 = vst [vmem:[%s3193_s29 + $0x20] sm:$0xff] %v2016_v26   ;;  %v1522_v37 = vadd.f32 %v2335_v28, %v1425_v31  ;;  %v1639_v43 = vadd.f32 %v1638_v17, %v1506_v50  ;;  %v1663_v52 = vmul.f32 %v1511_v18, %v1511_v18  ;;  %v1543_v41 = vadd.f32 %v1542_v22, %v1446_v29 }
 0x17e   : > { %v1676_v57 = vadd.f32 %v1675_v8, %v1661_v16  ;;  %v2343_v44 = vpop.f32.mrf.mxu1  ;;  %v1513_v47 = vpop.f32.mrf.mxu0  ;;  %v1670_v15 = vmul.f32 %v3199_v9, %v3199_v9  ;;  %v1673_v40 = vmul.f32 %v1551_v32, %v1551_v32 }
 0x17f   : > { %v2011_v14 = vpack.c.bf16 %v1522_v37, %v1519_v30  ;;  %v1554_v39 = vadd.f32 %v2343_v44, %v1457_v38  ;;  %v1640_v46 = vadd.f32 %v1639_v43, %v1511_v18  ;;  %v1514_v34 = vadd.f32 %v1513_v47, %v3182_v35 }
 0x180   : > { %v1677_v55 = vadd.f32 %v1676_v57, %v1662_v42  ;;  %v1545_v62 = vpop.f32.mrf.mxu1  ;;  %v1666_v27 = vmul.f32 %v1522_v37, %v1522_v37  ;;  %v1671_v10 = vmul.f32 %v1543_v41, %v1543_v41 }
 0x181   : > { %2035 = vst [vmem:[%s3193_s29 + $0x18] sm:$0xff] %v2011_v14   ;;  %v2031_v25 = vpack.c.bf16 %v1554_v39, %v1551_v32  ;;  %v1546_v50 = vadd.f32 %v1545_v62, %v1449_v51  ;;  %v2006_v19 = vpack.c.bf16 %v1514_v34, %v1511_v18  ;;  %v1641_v36 = vadd.f32 %v1640_v46, %v1514_v34 }
 0x182   : > { %v1678_v53 = vadd.f32 %v1677_v55, %v1663_v52  ;;  %v1664_v23 = vmul.f32 %v1514_v34, %v1514_v34  ;;  %v1674_v26 = vmul.f32 %v1554_v39, %v1554_v39 }
 0x183   : > { %2039 = vst [vmem:[%s3193_s29 + $0x38] sm:$0xff] %v2031_v25   ;;  %v2026_v45 = vpack.c.bf16 %v1546_v50, %v1543_v41  ;;  %2034 = vst [vmem:[%s3193_s29 + $0x10] sm:$0xff] %v2006_v19   ;;  %v1642_v60 = vadd.f32 %v1641_v36, %v1519_v30 }
 0x184   : > { %v1679_v1 = vadd.f32 %v1678_v53, %v1664_v23 }
 0x185   : > { %2038 = vst [vmem:[%s3193_s29 + $0x30] sm:$0xff] %v2026_v45   ;;  %v1643_v11 = vadd.f32 %v1642_v60, %v1522_v37 }
 0x186   : > { %v1680_v35 = vadd.f32 %v1679_v1, %v1665_v54 }
 0x187   : > { %v1644_v61 = vadd.f32 %v1643_v11, %v1527_v59 }
 0x188   : > { %v1681_v12 = vadd.f32 %v1680_v35, %v1666_v27 }
 0x189   : > { %v1645_v20 = vadd.f32 %v1644_v61, %v1530_v58  ;;  %v1672_v58 = vmul.f32 %v1546_v50, %v1546_v50 }
 0x18a   : > { %v1682_v33 = vadd.f32 %v1681_v12, %v1667_v3 }
 0x18b   : > { %v1646_v56 = vadd.f32 %v1645_v20, %v3197_v2 }
 0x18c   : > { %v1683_v63 = vadd.f32 %v1682_v33, %v1668_v24 }
 0x18d   : > { %v1647_v6 = vadd.f32 %v1646_v56, %v3199_v9 }
 0x18e   : > { %v1684_v7 = vadd.f32 %v1683_v63, %v1669_v4 }
 0x18f   : > { %v1648_v59 = vadd.f32 %v1647_v6, %v1543_v41 }
 0x190   : > { %v1685_v48 = vadd.f32 %v1684_v7, %v1670_v15 }
 0x191   : > { %v1649_v0 = vadd.f32 %v1648_v59, %v1546_v50 }
 0x192   : > { %v1686_v13 = vadd.f32 %v1685_v48, %v1671_v10 }
 0x193   : > { %v1650_v49 = vadd.f32 %v1649_v0, %v1551_v32 }
 0x194   : > { %v1687_v21 = vadd.f32 %v1686_v13, %v1672_v58 }
 0x195   : > { %v1651_v2 = vadd.f32 %v1650_v49, %v1554_v39 }
 0x196   : > { %v1688_v31 = vadd.f32 %v1687_v21, %v1673_v40 }
 0x197   : > { %v1652_v16 = vrot.slane %v1651_v2, 4 }
 0x198   : > { %v1689_v17 = vadd.f32 %v1688_v31, %v1674_v26 }
 0x199   : > { %v1653_v9 = vadd.f32 %v1652_v16, %v1651_v2 }
 0x19a   : > { %v1690_v8 = vrot.slane %v1689_v17, 4 }
 0x19b   : > { %v1654_v18 = vrot.slane %v1653_v9, 2 }
 0x19c   : > { %v1691_v22 = vadd.f32 %v1690_v8, %v1689_v17 }
 0x19d   : > { %v1655_v28 = vadd.f32 %v1654_v18, %v1653_v9 }
 0x19e   : > { %v1692_v30 = vrot.slane %v1691_v22, 2 }
 0x19f   : > { %v1656_v5 = vrot.slane %v1655_v28, 1 }
 0x1a0   : > { %v1693_v37 = vadd.f32 %v1692_v30, %v1691_v22 }
 0x1a1   : > { %v1657_v38 = vadd.f32 %v1656_v5, %v1655_v28 }
 0x1a2   : > { %v1694_v42 = vrot.slane %v1693_v37, 1 }
 0x1a3   : > { %1658 = vst [vmem:[%s252_s9] sm:$0x1] %v1657_v38 }
 0x1a4   : > { %v1695_v57 = vadd.f32 %v1694_v42, %v1693_v37 }
 0x1a6   : > { %1696 = vst [vmem:[%s259_s12] sm:$0x1] %v1695_v57 }
 0x1a7 PF: > { %s15_s19 = sadd.s32 1, %s2511_s19   ;;  %s3283_s15 = smov %s2503_s17 }
 0x1a8   : > { %p12_p8 = scmp.ge.s32.totalorder %s15_s19, 6   ;;  %s3284_s16 = smov %s2507_s18 }
 0x1a9   : > { %s3285_s17 = smov %s3288_s20  ;;  %s3286_s18 = smov %s3292_s21 }
 0x1aa   :  { %14 = sbr.rel (!%p12_p8) target bundleno = 3 (0x3), region = 83 }

// kernel: basic_block_forward.4
= control target key start
LH: loop header
LB: loop body
LE: loop exit
PB: predicated region body
PF: predicated region fallthrough
CT: control target
= control target key end

     0   :  { %s3634_s21 = smov 0   ;;  %s3636_s22 = smov 0   ;;  %s4555_s0 = inlined_call_operand.vmem [shape: bf16[2,16,16,128], index: 0, kind: input, shape index: {}]   ;;  %s4556_s1 = inlined_call_operand.vmem [shape: bf16[1152,128], index: 1, kind: input, shape index: {}]   ;;  %s4557_s2 = inlined_call_operand.vmem [shape: f32[1,128], index: 2, kind: input, shape index: {}]   ;;  %s4558_s3 = inlined_call_operand.vmem [shape: f32[1,128], index: 3, kind: input, shape index: {}]   ;;  %s4559_s4 = inlined_call_operand.vmem [shape: bf16[2,16,16,128], index: 4, kind: output, shape index: {0}]   ;;  %s4560_s5 = inlined_call_operand.vmem [shape: f32[2,2,1,128], index: 5, kind: output, shape index: {1}]   ;;  %s4561_s6 = inlined_call_operand.vmem [shape: f32[2,2,1,128], index: 6, kind: output, shape index: {2}]  }
   0x1   :  { %s3638_s23 = smov 0   ;;  %s3640_s24 = smov 0  }
   0x2   :  { %s3642_s25 = smov 0  }
   0x3 LB: > { %s26_s26 = sadd.s32 1, %s3588_s23  ;;  %s29_s27 = sadd.s32 1, %s3592_s24  ;;  %s3596_s25 = sphi %s3642_s25, %s17_s25   ;;  %s3592_s24 = sphi %s3640_s24, %s4611_s24   ;;  %s3588_s23 = sphi %s3638_s23, %s4610_s23   ;;  %s3584_s22 = sphi %s3636_s22, %s4609_s22   ;;  %s3580_s21 = sphi %s3634_s21, %s4608_s21  }
   0x4   : > { %p27_p0 = scmp.ge.s32.totalorder %s26_s26, 2  ;;  %p2714_p1 = scmp.ge.s32.totalorder %s3596_s25, 1 }
   0x5   : > { %p235_p2 = scmp.lt.s32.totalorder %s3596_s25, 5 }
   0x6   : > { %s4613_s26 = smov (%p27_p0, %s26_s26), 0  ;;  %s4615_s27 = smov (!%p27_p0, %s29_s27), %s3592_s24 }
   0x7   : > { %p236_p3 = pnand %p2714_p1, %p235_p2  ;;  %p31_p4 = scmp.ge.s32.totalorder %s4615_s27, 2 }
   0x9   : > { %s4617_s27 = smov (%p31_p4, %s4615_s27), 0  ;;  %239 = sbr.rel (%p236_p3) target bundleno = 515 (0x203), region = 36 }
   0xe   : > { %p284_p5 = scmp.lt.s32.totalorder %s3584_s22, 1  ;;  %s2717_s28 = sshll.u32 %s3580_s21, 3 }
   0xf   : > { %p292_p6 = scmp.lt.s32.totalorder %s2717_s28, 15  ;;  %p302_p7 = scmp.lt.s32.totalorder %s3580_s21, 1 }
  0x10   : > { %s4619_s22 = smov (!%p284_p5, %s3584_s22), 1  ;;  %p2723_p8 = scmp.ne.s32.totalorder %s3580_s21, 0 }
  0x11   : > { %s4621_s28 = smov (!%p292_p6, %s2717_s28), 15  ;;  %s2891_s29 = sshll.u32 %s4619_s22, 7 }
  0x12   : > { %s2719_s30 = sshll.u32 %s4619_s22, 5  ;;  %s3671_s9 = scalar_lea.vmem %s4555_s0, %s2891_s29 }
  0x13   : > { %s2718_s10 = sshll.u32 %s4621_s28, 1  ;;  %s2721_s16 = sshll.u32 %s4619_s22, 1 }
  0x14   : > { %s296_s11 = sadd.s32 %s2719_s30, %s2718_s10 }
  0x15   : > { %s2720_s12 = sshll.u32 %s296_s11, 2 }
  0x16   : > { %s3676_s15 = scalar_lea.vmem %s4559_s4, %s2720_s12  ;;  %318 = sbr.rel (%p2723_p8) target bundleno = 106 (0x6a), region = 40 }
  0x17   : > { %s303_s17 = scalar_select %p302_p7, %s3580_s21, 1 }
  0x19   : > { %s3679_s18 = sadd.s32 %s2721_s16, %s303_s17 }
  0x1a   : > { %s306_s7 = scalar_lea.vmem %s4560_s5, %s3679_s18  ;;  %s313_s28 = scalar_lea.vmem %s4561_s6, %s3679_s18 }
  0x1b   : > { %vm323_vm0 = vcmask 1040384   ;;  %vm324_vm1 = vsmask.f32 256  ;;  %v326_v0 = vld [vmem:[#allocation2 + $0x10] sm:$0x1]  ;;  %v3598_v1 = vmov 0  }
  0x1c   : > { %320 = vst [vmem:[#allocation2 + $0x4] sm:$0xf] %v3598_v1  ;;  %319 = vst [vmem:[#allocation2] sm:$0xf] %v3598_v1  ;;  %v334_v3 = vld [vmem:[#allocation2 + $0x164] sm:$0x1] }
  0x1d   : > { %321 = vst [vmem:[#allocation2 + $0x8] sm:$0xf] %v3598_v1  ;;  %322 = vst [vmem:[#allocation2 + $0xc] sm:$0xf] %v3598_v1  ;;  %vm337_vm3 = vcmask 1043459   ;;  %v2942_v49 = vld [vmem:[%s3671_s9] sm:$0xff]  }
  0x1e   : > { %330 = vst [vmem:[#allocation2 + $0x154] sm:$0xf] %v3598_v1  ;;  %331 = vst [vmem:[#allocation2 + $0x158] sm:$0xf] %v3598_v1  ;;  %vm338_vm4 = vsmask.f32 7950 }
  0x1f   : > { %332 = vst [vmem:[#allocation2 + $0x15c] sm:$0xf] %v3598_v1  ;;  %333 = vst [vmem:[#allocation2 + $0x160] sm:$0xf] %v3598_v1  ;;  %v343_v7 = vld [vmem:[#allocation2 + $0x18] sm:$0x8] }
  0x20   : > { %vm3690_vm2 = vmand %vm323_vm0, %vm324_vm1  ;;  %v346_v8 = vld [vmem:[#allocation2 + $0x2c] sm:$0x8]  ;;  %v349_v11 = vld [vmem:[#allocation2 + $0x40] sm:$0x8] }
  0x21   : > { %v327_v4 = vsel %vm3690_vm2, 0, %v326_v0  ;;  %v335_v5 = vsel %vm3690_vm2, 0, %v334_v3  ;;  %vm3698_vm5 = vmand %vm337_vm3, %vm338_vm4  ;;  %v352_v12 = vld [vmem:[#allocation2 + $0x54] sm:$0x8]  ;;  %v355_v15 = vld [vmem:[#allocation2 + $0x68] sm:$0x8] }
  0x22   : > { %328 = vst [vmem:[#allocation2 + $0x10] sm:$0x1] %v327_v4  ;;  %336 = vst [vmem:[#allocation2 + $0x164] sm:$0x1] %v335_v5  ;;  %v344_v9 = vsel %vm3698_vm5, 0, %v343_v7  ;;  %v347_v10 = vsel %vm3698_vm5, 0, %v346_v8  ;;  %v2943_v7 = vunpack.c.l.bf16 %v2942_v49  ;;  %v2944_v8 = vunpack.c.h.bf16 %v2942_v49 }
  0x23   : > { %345 = vst [vmem:[#allocation2 + $0x18] sm:$0x8] %v344_v9  ;;  %348 = vst [vmem:[#allocation2 + $0x2c] sm:$0x8] %v347_v10  ;;  %v350_v13 = vsel %vm3698_vm5, 0, %v349_v11  ;;  %v353_v14 = vsel %vm3698_vm5, 0, %v352_v12 }
  0x24   : > { %v358_v16 = vld [vmem:[#allocation2 + $0x7c] sm:$0x8]  ;;  %351 = vst [vmem:[#allocation2 + $0x40] sm:$0x8] %v350_v13  ;;  %354 = vst [vmem:[#allocation2 + $0x54] sm:$0x8] %v353_v14 }
  0x25   : > { %v356_v17 = vsel %vm3698_vm5, 0, %v355_v15  ;;  %v359_v18 = vsel %vm3698_vm5, 0, %v358_v16  ;;  %v361_v19 = vld [vmem:[#allocation2 + $0x90] sm:$0x8]  ;;  %v364_v20 = vld [vmem:[#allocation2 + $0xa4] sm:$0x8] }
  0x26   : > { %357 = vst [vmem:[#allocation2 + $0x68] sm:$0x8] %v356_v17  ;;  %360 = vst [vmem:[#allocation2 + $0x7c] sm:$0x8] %v359_v18  ;;  %v362_v21 = vsel %vm3698_vm5, 0, %v361_v19  ;;  %v365_v22 = vsel %vm3698_vm5, 0, %v364_v20 }
  0x27   : > { %v367_v23 = vld [vmem:[#allocation2 + $0xb8] sm:$0x8]  ;;  %v370_v24 = vld [vmem:[#allocation2 + $0xcc] sm:$0x8]  ;;  %363 = vst [vmem:[#allocation2 + $0x90] sm:$0x8] %v362_v21 }
  0x28   : > { %366 = vst [vmem:[#allocation2 + $0xa4] sm:$0x8] %v365_v22  ;;  %v368_v25 = vsel %vm3698_vm5, 0, %v367_v23  ;;  %v371_v26 = vsel %vm3698_vm5, 0, %v370_v24  ;;  %v373_v27 = vld [vmem:[#allocation2 + $0xe0] sm:$0x8] }
  0x29   : > { %v376_v28 = vld [vmem:[#allocation2 + $0xf4] sm:$0x8]  ;;  %v340_v29 = vld [vmem:[#allocation2 + $0x4] sm:$0x8]  ;;  %369 = vst [vmem:[#allocation2 + $0xb8] sm:$0x8] %v368_v25 }
  0x2a   : > { %372 = vst [vmem:[#allocation2 + $0xcc] sm:$0x8] %v371_v26  ;;  %v374_v30 = vsel %vm3698_vm5, 0, %v373_v27  ;;  %v377_v31 = vsel %vm3698_vm5, 0, %v376_v28  ;;  %v379_v32 = vld [vmem:[#allocation2 + $0x108] sm:$0x8] }
  0x2b   : > { %v341_v33 = vsel %vm3698_vm5, 0, %v340_v29  ;;  %375 = vst [vmem:[#allocation2 + $0xe0] sm:$0x8] %v374_v30  ;;  %378 = vst [vmem:[#allocation2 + $0xf4] sm:$0x8] %v377_v31  ;;  %v380_v34 = vsel %vm3698_vm5, 0, %v379_v32 }
  0x2c   : > { %v382_v35 = vld [vmem:[#allocation2 + $0x11c] sm:$0x8]  ;;  %v385_v36 = vld [vmem:[#allocation2 + $0x130] sm:$0x8]  ;;  %342 = vst [vmem:[#allocation2 + $0x4] sm:$0x8] %v341_v33 }
  0x2d   : > { %381 = vst [vmem:[#allocation2 + $0x108] sm:$0x8] %v380_v34  ;;  %v383_v37 = vsel %vm3698_vm5, 0, %v382_v35  ;;  %v386_v38 = vsel %vm3698_vm5, 0, %v385_v36  ;;  %v388_v39 = vld [vmem:[#allocation2 + $0x144] sm:$0x8] }
  0x2e   : > { %v391_v40 = vld [vmem:[#allocation2 + $0x158] sm:$0x8]  ;;  %384 = vst [vmem:[#allocation2 + $0x11c] sm:$0x8] %v383_v37  ;;  %387 = vst [vmem:[#allocation2 + $0x130] sm:$0x8] %v386_v38 }
  0x2f   : > { %v389_v41 = vsel %vm3698_vm5, 0, %v388_v39  ;;  %v392_v42 = vsel %vm3698_vm5, 0, %v391_v40  ;;  %v394_v43 = vld [vmem:[#allocation2 + $0x10] sm:$0x1]  ;;  %v397_v44 = vld [vmem:[#allocation2 + $0x24] sm:$0x1] }
  0x30   : > { %390 = vst [vmem:[#allocation2 + $0x144] sm:$0x8] %v389_v41  ;;  %393 = vst [vmem:[#allocation2 + $0x158] sm:$0x8] %v392_v42  ;;  %v395_v45 = vsel %vm3690_vm2, 0, %v394_v43  ;;  %v398_v46 = vsel %vm3690_vm2, 0, %v397_v44 }
  0x31   : > { %v400_v47 = vld [vmem:[#allocation2 + $0x38] sm:$0x1]  ;;  %v403_v48 = vld [vmem:[#allocation2 + $0x4c] sm:$0x1]  ;;  %396 = vst [vmem:[#allocation2 + $0x10] sm:$0x1] %v395_v45 }
  0x32   : > { %399 = vst [vmem:[#allocation2 + $0x24] sm:$0x1] %v398_v46  ;;  %v401_v50 = vsel %vm3690_vm2, 0, %v400_v47  ;;  %v404_v51 = vsel %vm3690_vm2, 0, %v403_v48  ;;  %v406_v52 = vld [vmem:[#allocation2 + $0x60] sm:$0x1] }
  0x33   : > { %v409_v53 = vld [vmem:[#allocation2 + $0x74] sm:$0x1]  ;;  %402 = vst [vmem:[#allocation2 + $0x38] sm:$0x1] %v401_v50  ;;  %405 = vst [vmem:[#allocation2 + $0x4c] sm:$0x1] %v404_v51 }
  0x34   : > { %v407_v54 = vsel %vm3690_vm2, 0, %v406_v52  ;;  %v410_v55 = vsel %vm3690_vm2, 0, %v409_v53  ;;  %v412_v56 = vld [vmem:[#allocation2 + $0x88] sm:$0x1]  ;;  %v415_v57 = vld [vmem:[#allocation2 + $0x9c] sm:$0x1] }
  0x35   : > { %408 = vst [vmem:[#allocation2 + $0x60] sm:$0x1] %v407_v54  ;;  %411 = vst [vmem:[#allocation2 + $0x74] sm:$0x1] %v410_v55  ;;  %v413_v58 = vsel %vm3690_vm2, 0, %v412_v56  ;;  %v416_v59 = vsel %vm3690_vm2, 0, %v415_v57 }
  0x36   : > { %v418_v60 = vld [vmem:[#allocation2 + $0xb0] sm:$0x1]  ;;  %v421_v61 = vld [vmem:[#allocation2 + $0xc4] sm:$0x1]  ;;  %414 = vst [vmem:[#allocation2 + $0x88] sm:$0x1] %v413_v58 }
  0x37   : > { %417 = vst [vmem:[#allocation2 + $0x9c] sm:$0x1] %v416_v59  ;;  %v419_v62 = vsel %vm3690_vm2, 0, %v418_v60  ;;  %v422_v63 = vsel %vm3690_vm2, 0, %v421_v61  ;;  %v424_v0 = vld [vmem:[#allocation2 + $0xd8] sm:$0x1] }
  0x38   : > { %v427_v1 = vld [vmem:[#allocation2 + $0xec] sm:$0x1]  ;;  %420 = vst [vmem:[#allocation2 + $0xb0] sm:$0x1] %v419_v62  ;;  %423 = vst [vmem:[#allocation2 + $0xc4] sm:$0x1] %v422_v63 }
  0x39   : > { %v425_v3 = vsel %vm3690_vm2, 0, %v424_v0  ;;  %v428_v4 = vsel %vm3690_vm2, 0, %v427_v1  ;;  %v430_v5 = vld [vmem:[#allocation2 + $0x100] sm:$0x1]  ;;  %v433_v6 = vld [vmem:[#allocation2 + $0x114] sm:$0x1] }
  0x3a   : > { %426 = vst [vmem:[#allocation2 + $0xd8] sm:$0x1] %v425_v3  ;;  %429 = vst [vmem:[#allocation2 + $0xec] sm:$0x1] %v428_v4  ;;  %v431_v9 = vsel %vm3690_vm2, 0, %v430_v5  ;;  %v434_v10 = vsel %vm3690_vm2, 0, %v433_v6 }
  0x3b   : > { %v436_v11 = vld [vmem:[#allocation2 + $0x128] sm:$0x1]  ;;  %v439_v12 = vld [vmem:[#allocation2 + $0x13c] sm:$0x1]  ;;  %432 = vst [vmem:[#allocation2 + $0x100] sm:$0x1] %v431_v9 }
  0x3c   : > { %435 = vst [vmem:[#allocation2 + $0x114] sm:$0x1] %v434_v10  ;;  %v437_v13 = vsel %vm3690_vm2, 0, %v436_v11  ;;  %v440_v14 = vsel %vm3690_vm2, 0, %v439_v12  ;;  %v442_v15 = vld [vmem:[#allocation2 + $0x150] sm:$0x1] }
  0x3d   : > { %v445_v16 = vld [vmem:[#allocation2 + $0x164] sm:$0x1]  ;;  %438 = vst [vmem:[#allocation2 + $0x128] sm:$0x1] %v437_v13  ;;  %441 = vst [vmem:[#allocation2 + $0x13c] sm:$0x1] %v440_v14 }
  0x3e   : > { %v443_v17 = vsel %vm3690_vm2, 0, %v442_v15  ;;  %v446_v18 = vsel %vm3690_vm2, 0, %v445_v16  ;;  %v3778_v19 = vld [vmem:[%s4557_s2] ss:$0 sm:$0xff]  ;;  %v3085_v23 = vld [vmem:[%s3671_s9 + $0x8] sm:$0xff]   ;;  %v3086_v24 = vld [vmem:[%s3671_s9 + $0x10] sm:$0xff]  }
  0x3f   : > { %v3783_v20 = vld [vmem:[%s4558_s3] ss:$0 sm:$0xff]  ;;  %444 = vst [vmem:[#allocation2 + $0x150] sm:$0x1] %v443_v17  ;;  %447 = vst [vmem:[#allocation2 + $0x164] sm:$0x1] %v446_v18  ;;  %v520_v21 = vmul.f32 %v2943_v7, %v3778_v19  ;;  %v521_v22 = vmul.f32 %v2944_v8, %v3778_v19  ;;  %v2947_v25 = vunpack.c.l.bf16 %v3085_v23  ;;  %v2948_v26 = vunpack.c.h.bf16 %v3085_v23 }
  0x40   : > { %v3087_v2 = vld [vmem:[%s3671_s9 + $0x18] sm:$0xff]   ;;  %v2951_v27 = vunpack.c.l.bf16 %v3086_v24  ;;  %v2952_v28 = vunpack.c.h.bf16 %v3086_v24  ;;  %v3088_v45 = vld [vmem:[%s3671_s9 + $0x20] sm:$0xff]   ;;  %v3089_v50 = vld [vmem:[%s3671_s9 + $0x28] sm:$0xff]  }
  0x41   : > { %v558_v29 = vadd.f32 %v3783_v20, %v520_v21  ;;  %v559_v30 = vadd.f32 %v3783_v20, %v521_v22  ;;  %v2955_v31 = vunpack.c.l.bf16 %v3087_v2  ;;  %v2956_v32 = vunpack.c.h.bf16 %v3087_v2  ;;  %v3090_v59 = vld [vmem:[%s3671_s9 + $0x30] sm:$0xff]   ;;  %v3091_v60 = vld [vmem:[%s3671_s9 + $0x38] sm:$0xff]   ;;  %v3092_v24 = vld [vmem:[%s3671_s9 + $0x40] sm:$0xff]  }
  0x42   : > { %v522_v33 = vmul.f32 %v2947_v25, %v3778_v19  ;;  %v523_v34 = vmul.f32 %v2948_v26, %v3778_v19  ;;  %v524_v35 = vmul.f32 %v2951_v27, %v3778_v19  ;;  %v525_v36 = vmul.f32 %v2952_v28, %v3778_v19  ;;  %v3093_v28 = vld [vmem:[%s3671_s9 + $0x48] sm:$0xff]  }
  0x43   : > { %v590_v37 = vmax.f32 %v558_v29, 0.0  ;;  %v591_v38 = vmax.f32 %v559_v30, 0.0  ;;  %v526_v39 = vmul.f32 %v2955_v31, %v3778_v19  ;;  %v527_v40 = vmul.f32 %v2956_v32, %v3778_v19 }
  0x44   : > { %v560_v41 = vadd.f32 %v3783_v20, %v522_v33  ;;  %v561_v42 = vadd.f32 %v3783_v20, %v523_v34  ;;  %v562_v43 = vadd.f32 %v3783_v20, %v524_v35  ;;  %v563_v44 = vadd.f32 %v3783_v20, %v525_v36 }
  0x45   : > { %v2892_v46 = vpack.c.bf16 %v590_v37, %v590_v37  ;;  %v2893_v47 = vpack.c.bf16 %v591_v38, %v591_v38  ;;  %v564_v48 = vadd.f32 %v3783_v20, %v526_v39  ;;  %v565_v49 = vadd.f32 %v3783_v20, %v527_v40  ;;  %v3094_v37 = vld [vmem:[%s3671_s9 + $0x50] sm:$0xff]  }
  0x46   : > { %v592_v51 = vmax.f32 %v560_v41, 0.0  ;;  %v593_v52 = vmax.f32 %v561_v42, 0.0  ;;  %v594_v53 = vmax.f32 %v562_v43, 0.0  ;;  %v595_v54 = vmax.f32 %v563_v44, 0.0  ;;  %v3095_v42 = vld [vmem:[%s3671_s9 + $0x58] sm:$0xff]  }
  0x47   : > { %751 = vst [vmem:[#allocation2 + $0x1c] sm:$0xf] %v2892_v46  ;;  %752 = vst [vmem:[#allocation2 + $0x20] sm:$0xf] %v2893_v47  ;;  %v596_v55 = vmax.f32 %v564_v48, 0.0  ;;  %v597_v56 = vmax.f32 %v565_v49, 0.0  ;;  %v2959_v57 = vunpack.c.l.bf16 %v3088_v45  ;;  %v2960_v58 = vunpack.c.h.bf16 %v3088_v45 }
  0x48   : > { %v3008_v61 = vpack.c.bf16 %v593_v52, %v592_v51  ;;  %v2896_v62 = vpack.c.bf16 %v594_v53, %v594_v53  ;;  %v2897_v63 = vpack.c.bf16 %v595_v54, %v595_v54  ;;  %v2963_v0 = vunpack.c.l.bf16 %v3089_v50 }
  0x49   : > { %v3013_v1 = vpack.c.bf16 %v597_v56, %v596_v55  ;;  %v528_v3 = vmul.f32 %v2959_v57, %v3778_v19  ;;  %v529_v4 = vmul.f32 %v2960_v58, %v3778_v19  ;;  %v2964_v5 = vunpack.c.h.bf16 %v3089_v50 }
  0x4a   : > { %3100 = vst [vmem:[#allocation2 + $0x30] sm:$0xff] %v3008_v61   ;;  %755 = vst [vmem:[#allocation2 + $0x44] sm:$0xf] %v2896_v62  ;;  %v530_v6 = vmul.f32 %v2963_v0, %v3778_v19  ;;  %v2967_v7 = vunpack.c.l.bf16 %v3090_v59  ;;  %v2968_v8 = vunpack.c.h.bf16 %v3090_v59  ;;  %v2971_v9 = vunpack.c.l.bf16 %v3091_v60 }
  0x4b   : > { %756 = vst [vmem:[#allocation2 + $0x48] sm:$0xf] %v2897_v63  ;;  %3101 = vst [vmem:[#allocation2 + $0x58] sm:$0xff] %v3013_v1   ;;  %v566_v10 = vadd.f32 %v3783_v20, %v528_v3  ;;  %v567_v11 = vadd.f32 %v3783_v20, %v529_v4  ;;  %v531_v12 = vmul.f32 %v2964_v5, %v3778_v19  ;;  %v2972_v13 = vunpack.c.h.bf16 %v3091_v60  ;;  %v3096_v63 = vld [vmem:[%s3671_s9 + $0x60] sm:$0xff]  }
  0x4c   : > { %v568_v14 = vadd.f32 %v3783_v20, %v530_v6  ;;  %v532_v15 = vmul.f32 %v2967_v7, %v3778_v19  ;;  %v533_v16 = vmul.f32 %v2968_v8, %v3778_v19  ;;  %v534_v17 = vmul.f32 %v2971_v9, %v3778_v19  ;;  %v3097_v9 = vld [vmem:[%s3671_s9 + $0x68] sm:$0xff]  }
  0x4d   : > { %v598_v18 = vmax.f32 %v566_v10, 0.0  ;;  %v599_v21 = vmax.f32 %v567_v11, 0.0  ;;  %v569_v22 = vadd.f32 %v3783_v20, %v531_v12  ;;  %v535_v23 = vmul.f32 %v2972_v13, %v3778_v19 }
  0x4e   : > { %v600_v2 = vmax.f32 %v568_v14, 0.0  ;;  %v570_v25 = vadd.f32 %v3783_v20, %v532_v15  ;;  %v571_v26 = vadd.f32 %v3783_v20, %v533_v16  ;;  %v572_v27 = vadd.f32 %v3783_v20, %v534_v17  ;;  %v3098_v14 = vld [vmem:[%s3671_s9 + $0x70] sm:$0xff]  }
  0x4f   : > { %v2900_v29 = vpack.c.bf16 %v598_v18, %v598_v18  ;;  %v2901_v30 = vpack.c.bf16 %v599_v21, %v599_v21  ;;  %v601_v31 = vmax.f32 %v569_v22, 0.0  ;;  %v573_v32 = vadd.f32 %v3783_v20, %v535_v23 }
  0x50   : > { %v602_v33 = vmax.f32 %v570_v25, 0.0  ;;  %v603_v34 = vmax.f32 %v571_v26, 0.0  ;;  %v604_v35 = vmax.f32 %v572_v27, 0.0  ;;  %v2975_v36 = vunpack.c.l.bf16 %v3092_v24 }
  0x51   : > { %759 = vst [vmem:[#allocation2 + $0x6c] sm:$0xf] %v2900_v29  ;;  %760 = vst [vmem:[#allocation2 + $0x70] sm:$0xf] %v2901_v30  ;;  %v3018_v38 = vpack.c.bf16 %v601_v31, %v600_v2  ;;  %v605_v39 = vmax.f32 %v573_v32, 0.0  ;;  %v2976_v40 = vunpack.c.h.bf16 %v3092_v24  ;;  %v2979_v41 = vunpack.c.l.bf16 %v3093_v28  ;;  %v3099_v2 = vld [vmem:[%s3671_s9 + $0x78] sm:$0xff]  }
  0x52   : > { %v2904_v43 = vpack.c.bf16 %v602_v33, %v602_v33  ;;  %v2905_v44 = vpack.c.bf16 %v603_v34, %v603_v34  ;;  %v536_v45 = vmul.f32 %v2975_v36, %v3778_v19  ;;  %v2980_v46 = vunpack.c.h.bf16 %v3093_v28 }
  0x53   : > { %3102 = vst [vmem:[#allocation2 + $0x80] sm:$0xff] %v3018_v38   ;;  %v3023_v47 = vpack.c.bf16 %v605_v39, %v604_v35  ;;  %v537_v48 = vmul.f32 %v2976_v40, %v3778_v19  ;;  %v538_v49 = vmul.f32 %v2979_v41, %v3778_v19  ;;  %v2983_v50 = vunpack.c.l.bf16 %v3094_v37 }
  0x54   : > { %763 = vst [vmem:[#allocation2 + $0x94] sm:$0xf] %v2904_v43  ;;  %764 = vst [vmem:[#allocation2 + $0x98] sm:$0xf] %v2905_v44  ;;  %v574_v51 = vadd.f32 %v3783_v20, %v536_v45  ;;  %v539_v52 = vmul.f32 %v2980_v46, %v3778_v19  ;;  %v2984_v53 = vunpack.c.h.bf16 %v3094_v37  ;;  %v2987_v54 = vunpack.c.l.bf16 %v3095_v42 }
  0x55   : > { %3103 = vst [vmem:[#allocation2 + $0xa8] sm:$0xff] %v3023_v47   ;;  %v575_v55 = vadd.f32 %v3783_v20, %v537_v48  ;;  %v576_v56 = vadd.f32 %v3783_v20, %v538_v49  ;;  %v540_v57 = vmul.f32 %v2983_v50, %v3778_v19  ;;  %v2988_v58 = vunpack.c.h.bf16 %v3095_v42 }
  0x56   : > { %v606_v59 = vmax.f32 %v574_v51, 0.0  ;;  %v577_v60 = vadd.f32 %v3783_v20, %v539_v52  ;;  %v541_v61 = vmul.f32 %v2984_v53, %v3778_v19  ;;  %v542_v62 = vmul.f32 %v2987_v54, %v3778_v19 }
  0x57   : > { %v607_v0 = vmax.f32 %v575_v55, 0.0  ;;  %v608_v1 = vmax.f32 %v576_v56, 0.0  ;;  %v578_v3 = vadd.f32 %v3783_v20, %v540_v57  ;;  %v543_v4 = vmul.f32 %v2988_v58, %v3778_v19 }
  0x58   : > { %v2908_v5 = vpack.c.bf16 %v606_v59, %v606_v59  ;;  %v609_v6 = vmax.f32 %v577_v60, 0.0  ;;  %v579_v7 = vadd.f32 %v3783_v20, %v541_v61  ;;  %v580_v8 = vadd.f32 %v3783_v20, %v542_v62 }
  0x59   : > { %v2909_v10 = vpack.c.bf16 %v607_v0, %v607_v0  ;;  %v610_v11 = vmax.f32 %v578_v3, 0.0  ;;  %v581_v12 = vadd.f32 %v3783_v20, %v543_v4  ;;  %v2991_v13 = vunpack.c.l.bf16 %v3096_v63 }
  0x5a   : > { %767 = vst [vmem:[#allocation2 + $0xbc] sm:$0xf] %v2908_v5  ;;  %v3028_v15 = vpack.c.bf16 %v609_v6, %v608_v1  ;;  %v611_v16 = vmax.f32 %v579_v7, 0.0  ;;  %v612_v17 = vmax.f32 %v580_v8, 0.0  ;;  %v2992_v18 = vunpack.c.h.bf16 %v3096_v63 }
  0x5b   : > { %768 = vst [vmem:[#allocation2 + $0xc0] sm:$0xf] %v2909_v10  ;;  %v2912_v21 = vpack.c.bf16 %v610_v11, %v610_v11  ;;  %v613_v22 = vmax.f32 %v581_v12, 0.0  ;;  %v544_v23 = vmul.f32 %v2991_v13, %v3778_v19  ;;  %v2995_v24 = vunpack.c.l.bf16 %v3097_v9 }
  0x5c   : > { %3104 = vst [vmem:[#allocation2 + $0xd0] sm:$0xff] %v3028_v15   ;;  %v2913_v25 = vpack.c.bf16 %v611_v16, %v611_v16  ;;  %v545_v26 = vmul.f32 %v2992_v18, %v3778_v19  ;;  %v2996_v27 = vunpack.c.h.bf16 %v3097_v9  ;;  %v2999_v28 = vunpack.c.l.bf16 %v3098_v14 }
  0x5d   : > { %771 = vst [vmem:[#allocation2 + $0xe4] sm:$0xf] %v2912_v21  ;;  %v3033_v29 = vpack.c.bf16 %v613_v22, %v612_v17  ;;  %v582_v30 = vadd.f32 %v3783_v20, %v544_v23  ;;  %v546_v31 = vmul.f32 %v2995_v24, %v3778_v19  ;;  %v3000_v32 = vunpack.c.h.bf16 %v3098_v14 }
  0x5e   : > { %772 = vst [vmem:[#allocation2 + $0xe8] sm:$0xf] %v2913_v25  ;;  %v583_v33 = vadd.f32 %v3783_v20, %v545_v26  ;;  %v547_v34 = vmul.f32 %v2996_v27, %v3778_v19  ;;  %v548_v35 = vmul.f32 %v2999_v28, %v3778_v19  ;;  %v3003_v36 = vunpack.c.l.bf16 %v3099_v2 }
  0x5f   : > { %3105 = vst [vmem:[#allocation2 + $0xf8] sm:$0xff] %v3033_v29   ;;  %v614_v37 = vmax.f32 %v582_v30, 0.0  ;;  %v584_v38 = vadd.f32 %v3783_v20, %v546_v31  ;;  %v549_v39 = vmul.f32 %v3000_v32, %v3778_v19  ;;  %v3004_v40 = vunpack.c.h.bf16 %v3099_v2 }
  0x60   : > { %v615_v41 = vmax.f32 %v583_v33, 0.0  ;;  %v585_v42 = vadd.f32 %v3783_v20, %v547_v34  ;;  %v586_v43 = vadd.f32 %v3783_v20, %v548_v35  ;;  %v550_v44 = vmul.f32 %v3003_v36, %v3778_v19 }
  0x61   : > { %v2916_v45 = vpack.c.bf16 %v614_v37, %v614_v37  ;;  %v616_v46 = vmax.f32 %v584_v38, 0.0  ;;  %v587_v47 = vadd.f32 %v3783_v20, %v549_v39  ;;  %v551_v48 = vmul.f32 %v3004_v40, %v3778_v19 }
  0x62   : > { %v2917_v49 = vpack.c.bf16 %v615_v41, %v615_v41  ;;  %v617_v50 = vmax.f32 %v585_v42, 0.0  ;;  %v618_v51 = vmax.f32 %v586_v43, 0.0  ;;  %v588_v52 = vadd.f32 %v3783_v20, %v550_v44 }
  0x63   : > { %775 = vst [vmem:[#allocation2 + $0x10c] sm:$0xf] %v2916_v45  ;;  %v619_v53 = vmax.f32 %v587_v47, 0.0  ;;  %v589_v54 = vadd.f32 %v3783_v20, %v551_v48 }
  0x64   : > { %776 = vst [vmem:[#allocation2 + $0x110] sm:$0xf] %v2917_v49  ;;  %v3038_v55 = vpack.c.bf16 %v617_v50, %v616_v46  ;;  %v2920_v56 = vpack.c.bf16 %v618_v51, %v618_v51  ;;  %v620_v57 = vmax.f32 %v588_v52, 0.0 }
  0x65   : > { %v2921_v58 = vpack.c.bf16 %v619_v53, %v619_v53  ;;  %v621_v59 = vmax.f32 %v589_v54, 0.0 }
  0x66   : > { %3106 = vst [vmem:[#allocation2 + $0x120] sm:$0xff] %v3038_v55   ;;  %779 = vst [vmem:[#allocation2 + $0x134] sm:$0xf] %v2920_v56 }
  0x67   : > { %780 = vst [vmem:[#allocation2 + $0x138] sm:$0xf] %v2921_v58  ;;  %v3043_v60 = vpack.c.bf16 %v621_v59, %v620_v57 }
  0x69   : > { %3107 = vst [vmem:[#allocation2 + $0x148] sm:$0xff] %v3043_v60  }
  0x6a PF: > { %v3476_v19 = vld [vmem:[%s4556_s1 + $0x78] sm:$0xff]   ;;  %v3480_v63 = vld [vmem:[%s4556_s1 + $0x70] sm:$0xff]   ;;  %v3484_v4 = vld [vmem:[%s4556_s1 + $0x68] sm:$0xff]   ;;  %s2924_s22 = smul.u32 160, %s3580_s21  ;;  %vm971_vm6 = vsmask.f32 256 }
  0x6b   : > { %v3477_v20 = vld [vmem:[%s4556_s1 + $0xf8] sm:$0xff]   ;;  %3115 = vmatprep.subr.bf16.mxu0 %v3476_v19  ;;  %v3481_v0 = vld [vmem:[%s4556_s1 + $0xf0] sm:$0xff]   ;;  %v3485_v5 = vld [vmem:[%s4556_s1 + $0xe8] sm:$0xff]   ;;  %vm972_vm7 = vsmask.f32 4368 }
  0x6c   : > { %v3478_v61 = vld [vmem:[%s4556_s1 + $0x38] sm:$0xff]   ;;  %3179 = vmatprep.subr.bf16.mxu1 %v3477_v20  ;;  %v3482_v1 = vld [vmem:[%s4556_s1 + $0x30] sm:$0xff]   ;;  %v3486_v6 = vld [vmem:[%s4556_s1 + $0x28] sm:$0xff]   ;;  %s3961_s29 = scalar_lea.vmem [#allocation2], %s2924_s22  ;;  %vm1150_vm9 = vsmask.f32 3328 }
  0x6d   : > { %v3479_v62 = vld [vmem:[%s4556_s1 + $0xb8] sm:$0xff]   ;;  %3116 = vmatpush3.bf16.msra.mxu0 %v3478_v61  ;;  %v3483_v3 = vld [vmem:[%s4556_s1 + $0xb0] sm:$0xff]   ;;  %v3487_v7 = vld [vmem:[%s4556_s1 + $0xa8] sm:$0xff]   ;;  %vm1151_vm10 = vsmask.f32 7440 }
  0x6e   : > { %3180 = vmatpush3.bf16.msra.mxu1 %v3479_v62  ;;  %3117 = vmatprep.subr.bf16.mxu0 %v3480_v63  ;;  %v3488_v8 = vld [vmem:[%s4556_s1 + $0x60] sm:$0xff]   ;;  %v3492_v12 = vld [vmem:[%s4556_s1 + $0x58] sm:$0xff]   ;;  %v3496_v16 = vld [vmem:[%s4556_s1 + $0x50] sm:$0xff]  }
  0x6f   : > { %3181 = vmatprep.subr.bf16.mxu1 %v3481_v0  ;;  %v3489_v9 = vld [vmem:[%s4556_s1 + $0xe0] sm:$0xff]   ;;  %v3493_v13 = vld [vmem:[%s4556_s1 + $0xd8] sm:$0xff]   ;;  %v3497_v17 = vld [vmem:[%s4556_s1 + $0xd0] sm:$0xff]  }
  0x70   : > { %v3490_v10 = vld [vmem:[%s4556_s1 + $0x20] sm:$0xff]   ;;  %v3494_v14 = vld [vmem:[%s4556_s1 + $0x18] sm:$0xff]   ;;  %v3498_v18 = vld [vmem:[%s4556_s1 + $0x10] sm:$0xff]  }
  0x71   : > { %3118 = vmatpush3.bf16.msra.mxu0 %v3482_v1  ;;  %v3491_v11 = vld [vmem:[%s4556_s1 + $0xa0] sm:$0xff]   ;;  %v3495_v15 = vld [vmem:[%s4556_s1 + $0x98] sm:$0xff]   ;;  %v3499_v21 = vld [vmem:[%s4556_s1 + $0x90] sm:$0xff]  }
  0x72   : > { %3182 = vmatpush3.bf16.msra.mxu1 %v3483_v3  ;;  %3119 = vmatprep.subr.bf16.mxu0 %v3484_v4  ;;  %v3500_v22 = vld [vmem:[%s4556_s1 + $0x48] sm:$0xff]   ;;  %v3504_v25 = vld [vmem:[%s4556_s1 + $0x40] sm:$0xff]   ;;  %v791_v31 = vld [vmem:[%s3961_s29 + $0x18] sm:$0xf] }
  0x73   : > { %3183 = vmatprep.subr.bf16.mxu1 %v3485_v5  ;;  %v3501_v23 = vld [vmem:[%s4556_s1 + $0xc8] sm:$0xff]   ;;  %v3505_v26 = vld [vmem:[%s4556_s1 + $0xc0] sm:$0xff]   ;;  %v3967_v36 = vld [vmem:[%s3961_s29 + $0x1c] sm:$0xf]  ;;  %v997_v45 = vshrl.u32 %v791_v31, 16 }
  0x74   : > { %v3502_v24 = vld [vmem:[%s4556_s1 + $0x8] sm:$0xff]   ;;  %v3506_v27 = vld [vmem:[%s4556_s1] sm:$0xff]   ;;  %v1002_v46 = vshrl.u32 %v3967_v36, 16  ;;  %v790_v52 = vld [vmem:[%s3961_s29 + $0x10] sm:$0x1]  ;;  %v1005_v58 = vshll.u32 %v3967_v36, 16 }
  0x75   : > { %3120 = vmatpush3.bf16.msra.mxu0 %v3486_v6  ;;  %v3503_v2 = vld [vmem:[%s4556_s1 + $0x88] sm:$0xff]   ;;  %v3507_v28 = vld [vmem:[%s4556_s1 + $0x80] sm:$0xff]   ;;  %v3509_v53 = vld [vmem:[%s4556_s1 + $0x178] sm:$0xff]   ;;  %v2762_v56 = vrot.slane %v997_v45, 11 }
  0x76   : > { %3184 = vmatpush3.bf16.msra.mxu1 %v3487_v7  ;;  %3121 = vmatprep.subr.bf16.mxu0 %v3488_v8  ;;  %v788_v29 = vld [vmem:[%s3961_s29 + $0x8] sm:$0xf]  ;;  %v789_v30 = vld [vmem:[%s3961_s29 + $0xc] sm:$0xf]  ;;  %v3970_v42 = vld [vmem:[%s3961_s29 + $0x20] sm:$0xf] }
  0x77   : > { %3185 = vmatprep.subr.bf16.mxu1 %v3489_v9  ;;  %v980_v32 = vshrl.u32 %v788_v29, 16  ;;  %v983_v33 = vshll.u32 %v788_v29, 16  ;;  %v989_v34 = vshrl.u32 %v789_v30, 16  ;;  %v992_v35 = vshll.u32 %v789_v30, 16  ;;  %v787_v47 = vld [vmem:[%s3961_s29 + $0x4] sm:$0xf]  ;;  %vm3980_vm8 = vmor %vm971_vm6, %vm972_vm7 }
  0x78   : > { %v2779_v37 = vcombine.low %v788_v29, %v789_v30  ;;  %v1004_v57 = vrot.slane %v1002_v46, 7  ;;  %v1011_v60 = vshrl.u32 %v3970_v42, 16  ;;  %v1014_v19 = vshll.u32 %v3970_v42, 16  ;;  %v795_v1 = vld [vmem:[%s3961_s29 + $0x2c] sm:$0xf]  ;;  %v3510_v6 = vld [vmem:[%s4556_s1 + $0x138] sm:$0xff]   ;;  %vm4010_vm11 = vmor %vm1150_vm9, %vm1151_vm10 }
  0x79   : > { %3122 = vmatpush3.bf16.msra.mxu0 %v3490_v10  ;;  %v982_v38 = vrot.slane %v980_v32, 7  ;;  %v991_v39 = vrot.slane %v989_v34, 7  ;;  %v1153_v40 = vrot.slane %v980_v32, 4  ;;  %v1154_v41 = vrot.slane %v983_v33, 5  ;;  %v3994_v7 = vld [vmem:[%s3961_s29 + $0x30] sm:$0xf] }
  0x7a   : > { %3186 = vmatpush3.bf16.msra.mxu1 %v3491_v11  ;;  %3123 = vmatprep.subr.bf16.mxu0 %v3492_v12  ;;  %v1157_v43 = vrot.slane %v992_v35, 5  ;;  %v1159_v44 = vrot.slane %v989_v34, 4  ;;  %v975_v20 = vshrl.u32 %v787_v47, 16  ;;  %v1007_v62 = vor.u32 %v1005_v58, %v1004_v57  ;;  %v4003_v11 = vld [vmem:[%s3961_s29 + $0x34] sm:$0xf]  ;;  %v3515_v34 = vld [vmem:[%s4556_s1 + $0x168] sm:$0xff]  }
  0x7b   : > { %3187 = vmatprep.subr.bf16.mxu1 %v3493_v13  ;;  %1941 = vmatprep.mubr.bf16.mxu0 %v2779_v37  ;;  %v985_v48 = vor.u32 %v983_v33, %v982_v38  ;;  %v987_v49 = vrot.slane %v982_v38, 4  ;;  %v994_v50 = vor.u32 %v992_v35, %v991_v39  ;;  %v1155_v51 = vor.u32 %v1154_v41, %v1153_v40  ;;  %v3512_v12 = vld [vmem:[%s4556_s1 + $0x170] sm:$0xff]   ;;  %v799_v33 = vld [vmem:[%s3961_s29 + $0x40] sm:$0xf]  ;;  %v4036_v39 = vld [vmem:[%s3961_s29 + $0x44] sm:$0xf] }
  0x7c   : > { %v1160_v54 = vor.u32 %v1159_v44, %v1157_v43  ;;  %v1009_v63 = vrot.slane %v1004_v57, 4  ;;  %v1168_v0 = vrot.slane %v1005_v58, 5  ;;  %v1013_v3 = vrot.slane %v1011_v60, 7  ;;  %v3513_v32 = vld [vmem:[%s4556_s1 + $0x130] sm:$0xff]   ;;  %v4039_v40 = vld [vmem:[%s3961_s29 + $0x48] sm:$0xf] }
  0x7d   : > { %3124 = vmatpush3.bf16.msra.mxu0 %v3494_v14  ;;  %v1156_v59 = vrot.slane %v1155_v51, 4  ;;  %v2761_v4 = vrot.slane %v975_v20, 11  ;;  %v995_v5 = vsel %vm3980_vm8, %v987_v49, %v994_v50  ;;  %v1008_v8 = vsel %vm3980_vm8, %v2762_v56, %v1007_v62  ;;  %v3516_v45 = vld [vmem:[%s4556_s1 + $0x1f8] sm:$0xff]   ;;  %v3517_v50 = vld [vmem:[%s4556_s1 + $0x128] sm:$0xff]   ;;  %v3520_v20 = vld [vmem:[%s4556_s1 + $0x160] sm:$0xff]  }
  0x7e   : > { %3188 = vmatpush3.bf16.msra.mxu1 %v3495_v15  ;;  %3125 = vmatprep.subr.bf16.mxu0 %v3496_v16  ;;  %v1161_v61 = vrot.slane %v1160_v54, 4  ;;  %v1163_v9 = vshll.u32 %v790_v52, 16  ;;  %v4000_v10 = vcombine.low %v3967_v36, %v3970_v42  ;;  %v1016_v13 = vor.u32 %v1014_v19, %v1013_v3  ;;  %v3518_v56 = vld [vmem:[%s4556_s1 + $0x1b8] sm:$0xff]  }
  0x7f   : > { %3189 = vmatprep.subr.bf16.mxu1 %v3497_v17  ;;  %v986_v14 = vsel %vm3980_vm8, %v2761_v4, %v985_v48  ;;  %v1019_v16 = vshrl.u32 %v795_v1, 16  ;;  %v1024_v17 = vshrl.u32 %v3994_v7, 16  ;;  %v1036_v30 = vshll.u32 %v4003_v11, 16 }
  0x80   : > { %v1167_v31 = vrot.slane %v1002_v46, 4  ;;  %v1171_v42 = vrot.slane %v1014_v19, 5  ;;  %v4048_v48 = vcombine.low %v3994_v7, %v4003_v11  ;;  %v1041_v49 = vshrl.u32 %v799_v33, 16  ;;  %v798_v19 = vld [vmem:[%s3961_s29 + $0x38] sm:$0x1] }
  0x81   : > { %3126 = vmatpush3.bf16.msra.mxu0 %v3498_v18  ;;  %v794_v18 = vld [vmem:[%s3961_s29 + $0x24] sm:$0x1]  ;;  %v1046_v54 = vshrl.u32 %v4036_v39, 16  ;;  %v1058_v3 = vshll.u32 %v4039_v40, 16  ;;  %v1181_v4 = vrot.slane %v1024_v17, 4 }
  0x82   : > { %3190 = vmatpush3.bf16.msra.mxu1 %v3499_v21  ;;  %3127 = vmatprep.subr.bf16.mxu0 %v3500_v22  ;;  %v2771_v21 = vcombine.low %v986_v14, %v995_v5  ;;  %v1158_v22 = vsel %vm4010_vm11, %v1156_v59, %v1157_v43  ;;  %v1169_v41 = vor.u32 %v1168_v0, %v1167_v31  ;;  %v1173_v43 = vrot.slane %v1011_v60, 4 }
  0x83   : > { %3191 = vmatprep.subr.bf16.mxu1 %v3501_v23  ;;  %v1165_v23 = vrot.slane %v1163_v9, 5  ;;  %v1177_v44 = vshll.u32 %v794_v18, 16  ;;  %v2764_v58 = vrot.slane %v1041_v49, 11  ;;  %v1049_v59 = vshll.u32 %v4036_v39, 16 }
  0x84   : > { %v1170_v51 = vrot.slane %v1169_v41, 4  ;;  %v1174_v52 = vor.u32 %v1173_v43, %v1171_v42  ;;  %v1055_v60 = vshrl.u32 %v4039_v40, 16  ;;  %v1048_v0 = vrot.slane %v1046_v54, 7 }
  0x85   : > { %3128 = vmatpush3.bf16.msra.mxu0 %v3502_v24  ;;  %v1027_v24 = vshll.u32 %v3994_v7, 16  ;;  %v1166_v29 = vsel %vm4010_vm11, %v1161_v61, %v1165_v23  ;;  %v1185_v9 = vrot.slane %v1036_v30, 5  ;;  %v1196_v43 = vrot.slane %v1049_v59, 5 }
  0x86   : > { %3192 = vmatpush3.bf16.msra.mxu1 %v3503_v2  ;;  %3129 = vmatprep.subr.bf16.mxu0 %v3504_v25  ;;  %v1017_v2 = vsel %vm3980_vm8, %v1009_v63, %v1016_v13  ;;  %v2763_v25 = vrot.slane %v1019_v16, 11  ;;  %v2787_v35 = vcombine.low %v1158_v22, %v1166_v29  ;;  %v1172_v62 = vsel %vm4010_vm11, %v1170_v51, %v1171_v42  ;;  %v4077_v13 = vld [vmem:[%s3961_s29 + $0x58] sm:$0xf]  ;;  %v3521_v22 = vld [vmem:[%s4556_s1 + $0x1f0] sm:$0xff]   ;;  %v802_v29 = vld [vmem:[%s3961_s29 + $0x4c] sm:$0x1] }
  0x87   : > { %3193 = vmatprep.subr.bf16.mxu1 %v3505_v26  ;;  %v1026_v26 = vrot.slane %v1024_v17, 7  ;;  %v1175_v63 = vrot.slane %v1174_v52, 4  ;;  %v1057_v1 = vrot.slane %v1055_v60, 7  ;;  %v1182_v5 = vrot.slane %v1027_v24, 5 }
  0x88   : > { %v1051_v7 = vor.u32 %v1049_v59, %v1048_v0  ;;  %v1071_v33 = vshll.u32 %v4077_v13, 16  ;;  %v1195_v42 = vrot.slane %v1046_v54, 4  ;;  %v1205_v54 = vshll.u32 %v802_v29, 16 }
  0x89   : > { %3130 = vmatpush3.bf16.msra.mxu0 %v3506_v27  ;;  %v1033_v27 = vshrl.u32 %v4003_v11, 16  ;;  %v1029_v36 = vor.u32 %v1027_v24, %v1026_v26  ;;  %v1031_v37 = vrot.slane %v1026_v26, 4  ;;  %v1060_v16 = vor.u32 %v1058_v3, %v1057_v1  ;;  %v3526_v1 = vld [vmem:[%s4556_s1 + $0x1e8] sm:$0xff]  }
  0x8a   : > { %3194 = vmatpush3.bf16.msra.mxu1 %v3507_v28  ;;  %3243 = vmatprep.subr.bf16.mxu0 %v3509_v53  ;;  %v2772_v28 = vcombine.low %v1008_v8, %v1017_v2  ;;  %v1179_v53 = vrot.slane %v1177_v44, 5  ;;  %v1053_v8 = vrot.slane %v1048_v0, 4  ;;  %v1183_v17 = vor.u32 %v1182_v5, %v1181_v4 }
  0x8b   : > { %v1035_v38 = vrot.slane %v1033_v27, 7  ;;  %v1030_v46 = vsel %vm3980_vm8, %v2763_v25, %v1029_v36  ;;  %3307 = vmatprep.subr.bf16.mxu1 %v3516_v45  ;;  %v1187_v18 = vrot.slane %v1033_v27, 4  ;;  %v1052_v23 = vsel %vm3980_vm8, %v2764_v58, %v1051_v7  ;;  %v806_v7 = vld [vmem:[%s3961_s29 + $0x60] sm:$0x1] }
  0x8c   : > { %1942 = vmatmul.mubr.bf16.vlgmr.msra.gmra.mxu0 %v2771_v21  ;;  %2038 = vmatprep.mubr.bf16.mxu1 %v2772_v28  ;;  %v4085_v21 = vld [vmem:[%s3961_s29 + $0x5c] sm:$0xf]  ;;  %v1191_v24 = vshll.u32 %v798_v19, 16  ;;  %v4094_v2 = vcombine.low %v4036_v39, %v4039_v40  ;;  %v1061_v11 = vsel %vm3980_vm8, %v1053_v8, %v1060_v16  ;;  %v1184_v26 = vrot.slane %v1183_v17, 4  ;;  %v3523_v39 = vld [vmem:[%s4556_s1 + $0x1b0] sm:$0xff]  }
  0x8d   : > { %3244 = vmatpush3.bf16.msra.mxu0 %v3510_v6  ;;  %1949 = vmatprep.mubr.bf16.mxu0 %v4000_v10  ;;  %v1038_v47 = vor.u32 %v1036_v30, %v1035_v38  ;;  %v1180_v6 = vsel %vm4010_vm11, %v1175_v63, %v1179_v53  ;;  %v1188_v27 = vor.u32 %v1187_v18, %v1185_v9  ;;  %v1077_v38 = vshrl.u32 %v4085_v21, 16  ;;  %v3525_v40 = vld [vmem:[%s4556_s1 + $0x158] sm:$0xff]  }
  0x8e   : > { %3245 = vmatprep.subr.bf16.mxu0 %v3512_v12  ;;  %2039 = vmatmul.mubr.bf16.vlgmr.msra.gmra.mxu1 %v2787_v35  ;;  %v803_v12 = vld [vmem:[%s3961_s29 + $0x54] sm:$0xf]  ;;  %v4079_v14 = vcombine.low %v1172_v62, %v1180_v6  ;;  %v4101_v30 = vcombine.low %v1052_v23, %v1061_v11  ;;  %v1193_v31 = vrot.slane %v1191_v24, 5  ;;  %v1186_v35 = vsel %vm4010_vm11, %v1184_v26, %v1185_v9  ;;  %v3527_v8 = vld [vmem:[%s4556_s1 + $0x118] sm:$0xff]  }
  0x8f   : > { %v1039_v57 = vsel %vm3980_vm8, %v1031_v37, %v1038_v47  ;;  %3308 = vmatpush3.bf16.msra.mxu1 %v3518_v56  ;;  %v1063_v25 = vshrl.u32 %v803_v12, 16  ;;  %v1189_v36 = vrot.slane %v1188_v27, 4  ;;  %v1080_v41 = vshll.u32 %v4085_v21, 16  ;;  %v4124_v56 = vld [vmem:[%s3961_s29 + $0x6c] sm:$0xf] }
  0x90   : > { %v4065_v61 = vcombine.low %v1030_v46, %v1039_v57  ;;  %3309 = vmatprep.subr.bf16.mxu1 %v3521_v22  ;;  %v1199_v44 = vrot.slane %v1058_v3, 5  ;;  %v1079_v49 = vrot.slane %v1077_v38, 7  ;;  %v1197_v52 = vor.u32 %v1196_v43, %v1195_v42  ;;  %v4127_v57 = vld [vmem:[%s3961_s29 + $0x70] sm:$0xf] }
  0x91   : > { %3246 = vmatpush3.bf16.msra.mxu0 %v3513_v32  ;;  %v2765_v32 = vrot.slane %v1063_v25, 11  ;;  %v1194_v45 = vsel %vm4010_vm11, %v1189_v36, %v1193_v31  ;;  %v1201_v53 = vrot.slane %v1055_v60, 4  ;;  %v4134_v19 = vcombine.low %v4077_v13, %v4085_v21 }
  0x92   : > { %3247 = vmatprep.subr.bf16.mxu0 %v3515_v34  ;;  %2046 = vmatprep.mubr.bf16.mxu1 %v4065_v61  ;;  %v3522_v34 = vld [vmem:[%s4556_s1 + $0x120] sm:$0xff]   ;;  %v4119_v51 = vcombine.low %v1186_v35, %v1194_v45  ;;  %v1082_v59 = vor.u32 %v1080_v41, %v1079_v49  ;;  %v1198_v60 = vrot.slane %v1197_v52, 4  ;;  %v1207_v63 = vrot.slane %v1205_v54, 5 }
  0x93   : > { %3310 = vmatpush3.bf16.msra.mxu1 %v3523_v39  ;;  %v1202_v62 = vor.u32 %v1201_v53, %v1199_v44  ;;  %v1090_v0 = vshrl.u32 %v4124_v56, 16  ;;  %v1093_v5 = vshll.u32 %v4124_v56, 16  ;;  %v1099_v6 = vshrl.u32 %v4127_v57, 16 }
  0x94   : > { %1950 = vmatmul.mubr.bf16.gmra.mxu0 %v2772_v28  ;;  %v1068_v28 = vshrl.u32 %v4077_v13, 16  ;;  %v1200_v12 = vsel %vm4010_vm11, %v1198_v60, %v1199_v44  ;;  %3311 = vmatprep.subr.bf16.mxu1 %v3526_v1  ;;  %v1102_v18 = vshll.u32 %v4127_v57, 16  ;;  %v1210_v22 = vrot.slane %v1071_v33, 5  ;;  %v810_v44 = vld [vmem:[%s3961_s29 + $0x74] sm:$0x1] }
  0x95   : > { %1957 = vmatprep.mubr.bf16.mxu0 %v4048_v48  ;;  %3248 = vmatpush3.bf16.msra.mxu0 %v3517_v50  ;;  %v807_v50 = vld [vmem:[%s3961_s29 + $0x68] sm:$0xf]  ;;  %v1203_v13 = vrot.slane %v1202_v62, 4  ;;  %v1092_v16 = vrot.slane %v1090_v0, 7  ;;  %v1101_v17 = vrot.slane %v1099_v6, 7  ;;  %v1213_v11 = vrot.slane %v1080_v41, 5 }
  0x96   : > { %3249 = vmatprep.subr.bf16.mxu0 %v3520_v20  ;;  %2047 = vmatmul.mubr.bf16.gmra.mxu1 %v4079_v14  ;;  %v1070_v37 = vrot.slane %v1068_v28, 7  ;;  %v1085_v20 = vshrl.u32 %v807_v50, 16  ;;  %v1209_v21 = vrot.slane %v1068_v28, 4  ;;  %v1215_v31 = vrot.slane %v1077_v38, 4  ;;  %v3528_v28 = vld [vmem:[%s4556_s1 + $0x1a8] sm:$0xff]   ;;  %v3530_v50 = vld [vmem:[%s4556_s1 + $0x150] sm:$0xff]  }
  0x97   : > { %2054 = vmatprep.mubr.bf16.mxu1 %v4101_v30  ;;  %v1208_v23 = vsel %vm4010_vm11, %v1203_v13, %v1207_v63  ;;  %v1095_v24 = vor.u32 %v1093_v5, %v1092_v16  ;;  %v1097_v25 = vrot.slane %v1092_v16, 4  ;;  %v1104_v27 = vor.u32 %v1102_v18, %v1101_v17  ;;  %3312 = vmatpush3.bf16.msra.mxu1 %v3528_v28  ;;  %v815_v17 = vld [vmem:[%s3961_s29 + $0x90] sm:$0xf]  ;;  %v3536_v28 = vld [vmem:[%s4556_s1 + $0x1d8] sm:$0xff]  }
  0x98   : > { %v1073_v46 = vor.u32 %v1071_v33, %v1070_v37  ;;  %v1075_v47 = vrot.slane %v1070_v37, 4  ;;  %v2766_v4 = vrot.slane %v1085_v20, 11  ;;  %v4162_v26 = vcombine.low %v1200_v12, %v1208_v23  ;;  %v4169_v33 = vld [vmem:[%s3961_s29 + $0x80] sm:$0xf]  ;;  %v4179_v37 = vld [vmem:[%s3961_s29 + $0x84] sm:$0xf] }
  0x99   : > { %3250 = vmatpush3.bf16.msra.mxu0 %v3522_v34  ;;  %v1211_v29 = vor.u32 %v1210_v22, %v1209_v21  ;;  %v1219_v35 = vshll.u32 %v806_v7, 16  ;;  %v4176_v36 = vcombine.low %v4124_v56, %v4127_v57  ;;  %v1105_v39 = vsel %vm3980_vm8, %v1097_v25, %v1104_v27  ;;  %v4220_v21 = vld [vmem:[%s3961_s29 + $0x98] sm:$0xf] }
  0x9a   : > { %v1074_v58 = vsel %vm3980_vm8, %v2765_v32, %v1073_v46  ;;  %v1083_v3 = vsel %vm3980_vm8, %v1075_v47, %v1082_v59  ;;  %3251 = vmatprep.subr.bf16.mxu0 %v3525_v40  ;;  %v811_v32 = vld [vmem:[%s3961_s29 + $0x7c] sm:$0xf]  ;;  %v1096_v34 = vsel %vm3980_vm8, %v2766_v4, %v1095_v24  ;;  %v1216_v42 = vor.u32 %v1215_v31, %v1213_v11  ;;  %v3532_v4 = vld [vmem:[%s4556_s1 + $0x110] sm:$0xff]   ;;  %v3535_v24 = vld [vmem:[%s4556_s1 + $0x148] sm:$0xff]  }
  0x9b   : > { %v4152_v9 = vcombine.low %v1074_v58, %v1083_v3  ;;  %v1107_v38 = vshrl.u32 %v811_v32, 16  ;;  %v1212_v41 = vrot.slane %v1211_v29, 4  ;;  %v1112_v43 = vshrl.u32 %v4169_v33, 16  ;;  %v3531_v58 = vld [vmem:[%s4556_s1 + $0x1e0] sm:$0xff]   ;;  %v814_v31 = vld [vmem:[%s3961_s29 + $0x88] sm:$0x1] }
  0x9c   : > { %1958 = vmatmul.mubr.bf16.gmra.mxu0 %v4065_v61  ;;  %v4186_v45 = vcombine.low %v1096_v34, %v1105_v39  ;;  %v1221_v46 = vrot.slane %v1219_v35, 5  ;;  %v1115_v49 = vshll.u32 %v4169_v33, 16  ;;  %v1217_v53 = vrot.slane %v1216_v42, 4  ;;  %3313 = vmatprep.subr.bf16.mxu1 %v3531_v58 }
  0x9d   : > { %1965 = vmatprep.mubr.bf16.mxu0 %v4094_v2  ;;  %3252 = vmatpush3.bf16.msra.mxu0 %v3527_v8  ;;  %v2767_v47 = vrot.slane %v1107_v38, 11  ;;  %v1214_v52 = vsel %vm4010_vm11, %v1212_v41, %v1213_v11  ;;  %v1114_v54 = vrot.slane %v1112_v43, 7  ;;  %v1121_v56 = vshrl.u32 %v4179_v37, 16 }
  0x9e   : > { %2055 = vmatmul.mubr.bf16.gmra.mxu1 %v4119_v51  ;;  %v1124_v59 = vshll.u32 %v4179_v37, 16  ;;  %v1223_v20 = vrot.slane %v1090_v0, 4  ;;  %v1224_v40 = vrot.slane %v1093_v5, 5  ;;  %v1227_v60 = vrot.slane %v1102_v18, 5  ;;  %3253 = vmatprep.subr.bf16.mxu0 %v3530_v50  ;;  %v3533_v0 = vld [vmem:[%s4556_s1 + $0x1a0] sm:$0xff]  }
  0x9f   : > { %2062 = vmatprep.mubr.bf16.mxu1 %v4152_v9  ;;  %v1222_v62 = vsel %vm4010_vm11, %v1217_v53, %v1221_v46  ;;  %v1117_v63 = vor.u32 %v1115_v49, %v1114_v54  ;;  %v1119_v1 = vrot.slane %v1114_v54, 4  ;;  %v1123_v3 = vrot.slane %v1121_v56, 7  ;;  %3314 = vmatpush3.bf16.msra.mxu1 %v3533_v0  ;;  %v4217_v18 = vld [vmem:[%s3961_s29 + $0x94] sm:$0xf]  ;;  %v3537_v53 = vld [vmem:[%s4556_s1 + $0x108] sm:$0xff]  }
  0xa0   : > { %v1225_v5 = vor.u32 %v1224_v40, %v1223_v20  ;;  %v1229_v7 = vrot.slane %v1099_v6, 4  ;;  %v1233_v8 = vshll.u32 %v810_v44, 16  ;;  %v4211_v12 = vcombine.low %v1214_v52, %v1222_v62  ;;  %3315 = vmatprep.subr.bf16.mxu1 %v3536_v28  ;;  %v3538_v40 = vld [vmem:[%s4556_s1 + $0x198] sm:$0xff]   ;;  %v3540_v0 = vld [vmem:[%s4556_s1 + $0x190] sm:$0xff]  }
  0xa1   : > { %v1118_v13 = vsel %vm3980_vm8, %v2767_v47, %v1117_v63  ;;  %v1126_v16 = vor.u32 %v1124_v59, %v1123_v3  ;;  %3254 = vmatpush3.bf16.msra.mxu0 %v3532_v4  ;;  %v1129_v23 = vshrl.u32 %v815_v17, 16  ;;  %v1134_v11 = vshrl.u32 %v4217_v18, 16 }
  0xa2   : > { %v1226_v22 = vrot.slane %v1225_v5, 4  ;;  %v1230_v57 = vor.u32 %v1229_v7, %v1227_v60  ;;  %v1235_v6 = vrot.slane %v1233_v8, 5  ;;  %v1137_v27 = vshll.u32 %v4217_v18, 16  ;;  %3255 = vmatprep.subr.bf16.mxu0 %v3535_v24  ;;  %v819_v5 = vld [vmem:[%s3961_s29 + $0xa4] sm:$0xf] }
  0xa3   : > { %v1127_v25 = vsel %vm3980_vm8, %v1119_v1, %v1126_v16  ;;  %v1143_v29 = vshrl.u32 %v4220_v21, 16  ;;  %v2768_v38 = vrot.slane %v1129_v23, 11  ;;  %v1136_v39 = vrot.slane %v1134_v11, 7  ;;  %3316 = vmatpush3.bf16.msra.mxu1 %v3538_v40  ;;  %v4273_v7 = vld [vmem:[%s3961_s29 + $0xa8] sm:$0xf] }
  0xa4   : > { %1966 = vmatmul.mubr.bf16.gmra.mxu0 %v4101_v30  ;;  %v4236_v32 = vcombine.low %v1118_v13, %v1127_v25  ;;  %v1228_v34 = vsel %vm4010_vm11, %v1226_v22, %v1227_v60  ;;  %v1231_v35 = vrot.slane %v1230_v57, 4  ;;  %v1146_v42 = vshll.u32 %v4220_v21, 16  ;;  %v4276_v8 = vld [vmem:[%s3961_s29 + $0xac] sm:$0xf] }
  0xa5   : > { %1973 = vmatprep.mubr.bf16.mxu0 %v4134_v19  ;;  %v1145_v41 = vrot.slane %v1143_v29, 7  ;;  %v1237_v44 = vrot.slane %v1112_v43, 4  ;;  %v1238_v47 = vrot.slane %v1115_v49, 5  ;;  %v1241_v50 = vrot.slane %v1124_v59, 5  ;;  %3256 = vmatpush3.bf16.msra.mxu0 %v3537_v53 }
  0xa6   : > { %2063 = vmatmul.mubr.bf16.gmra.mxu1 %v4162_v26  ;;  %v1236_v46 = vsel %vm4010_vm11, %v1231_v35, %v1235_v6  ;;  %v1243_v52 = vrot.slane %v1121_v56, 4  ;;  %v4250_v54 = vcombine.low %v4169_v33, %v4179_v37  ;;  %v1139_v58 = vor.u32 %v1137_v27, %v1136_v39  ;;  %v3539_v56 = vld [vmem:[%s4556_s1 + $0x1d0] sm:$0xff]   ;;  %v818_v6 = vld [vmem:[%s3961_s29 + $0x9c] sm:$0x1] }
  0xa7   : > { %2070 = vmatprep.mubr.bf16.mxu1 %v4186_v45  ;;  %v1141_v20 = vrot.slane %v1136_v39, 4  ;;  %v1148_v43 = vor.u32 %v1146_v42, %v1145_v41  ;;  %v1239_v60 = vor.u32 %v1238_v47, %v1237_v44  ;;  %v1247_v59 = vshll.u32 %v814_v31, 16  ;;  %3317 = vmatprep.subr.bf16.mxu1 %v3539_v56  ;;  %v3544_v47 = vld [vmem:[%s4556_s1 + $0x100] sm:$0xff]   ;;  %v3548_v56 = vld [vmem:[%s4556_s1 + $0x238] sm:$0xff]  }
  0xa8   : > { %v1244_v49 = vor.u32 %v1243_v52, %v1241_v50  ;;  %v4258_v33 = vcombine.low %v1228_v34, %v1236_v46  ;;  %v1140_v37 = vsel %vm3980_vm8, %v2768_v38, %v1139_v58  ;;  %v1266_v13 = vshrl.u32 %v819_v5, 16  ;;  %3318 = vmatpush3.bf16.msra.mxu1 %v3540_v0  ;;  %v3543_v46 = vld [vmem:[%s4556_s1 + $0x1c8] sm:$0xff]   ;;  %v3546_v58 = vld [vmem:[%s4556_s1 + $0x1c0] sm:$0xff]  }
  0xa9   : > { %v1149_v62 = vsel %vm3980_vm8, %v1141_v20, %v1148_v43  ;;  %v1240_v1 = vrot.slane %v1239_v60, 4  ;;  %v1249_v4 = vrot.slane %v1247_v59, 5  ;;  %v1251_v16 = vrot.slane %v1134_v11, 4  ;;  %v3542_v11 = vld [vmem:[%s4556_s1 + $0x140] sm:$0xff]   ;;  %3319 = vmatprep.subr.bf16.mxu1 %v3543_v46 }
  0xaa   : > { %v4265_v63 = vcombine.low %v1140_v37, %v1149_v62  ;;  %v1245_v3 = vrot.slane %v1244_v49, 4  ;;  %v1271_v22 = vshrl.u32 %v4273_v7, 16  ;;  %v1274_v57 = vshll.u32 %v4273_v7, 16  ;;  %3257 = vmatprep.subr.bf16.mxu0 %v3542_v11  ;;  %v3547_v49 = vld [vmem:[%s4556_s1 + $0x180] sm:$0xff]  }
  0xab   : > { %v1242_v17 = vsel %vm4010_vm11, %v1240_v1, %v1241_v50  ;;  %v2769_v24 = vrot.slane %v1266_v13, 11  ;;  %v1280_v25 = vshrl.u32 %v4276_v8, 16  ;;  %v1283_v31 = vshll.u32 %v4276_v8, 16  ;;  %3258 = vmatpush3.bf16.msra.mxu0 %v3544_v47 }
  0xac   : > { %1974 = vmatmul.mubr.bf16.gmra.mxu0 %v4152_v9  ;;  %v1250_v23 = vsel %vm4010_vm11, %v1245_v3, %v1249_v4  ;;  %v1273_v28 = vrot.slane %v1271_v22, 7  ;;  %v1252_v34 = vrot.slane %v1137_v27, 5  ;;  %v1255_v35 = vrot.slane %v1146_v42, 5  ;;  %3387 = vmatprep.subr.bf16.mxu0 %v3548_v56  ;;  %v3549_v3 = vld [vmem:[%s4556_s1 + $0x230] sm:$0xff]   ;;  %v3550_v4 = vld [vmem:[%s4556_s1 + $0x228] sm:$0xff]  }
  0xad   : > { %1981 = vmatprep.mubr.bf16.mxu0 %v4176_v36  ;;  %v1257_v38 = vrot.slane %v1143_v29, 4  ;;  %v4296_v39 = vcombine.low %v4217_v18, %v4220_v21  ;;  %v1282_v41 = vrot.slane %v1280_v25, 7  ;;  %v1261_v44 = vshll.u32 %v818_v6, 16  ;;  %v3545_v21 = vld [vmem:[%s4556_s1 + $0x188] sm:$0xff]  }
  0xae   : > { %2071 = vmatmul.mubr.bf16.gmra.mxu1 %v4211_v12  ;;  %v1276_v27 = vor.u32 %v1274_v57, %v1273_v28  ;;  %v1278_v29 = vrot.slane %v1273_v28, 4  ;;  %v1253_v42 = vor.u32 %v1252_v34, %v1251_v16  ;;  %v4311_v50 = vcombine.low %v1242_v17, %v1250_v23  ;;  %v824_v17 = vld [vmem:[%s3961_s29 + $0xbc] sm:$0xf] }
  0xaf   : > { %2078 = vmatprep.mubr.bf16.mxu1 %v4236_v32  ;;  %v1258_v18 = vor.u32 %v1257_v38, %v1255_v35  ;;  %v1285_v52 = vor.u32 %v1283_v31, %v1282_v41  ;;  %v1263_v53 = vrot.slane %v1261_v44, 5  ;;  %3320 = vmatpush3.bf16.msra.mxu1 %v3545_v21  ;;  %v1293_v0 = vrot.slane %v1280_v25, 4 }
  0xb0   : > { %v1277_v20 = vsel %vm3980_vm8, %v2769_v24, %v1276_v27  ;;  %v1254_v43 = vrot.slane %v1253_v42, 4  ;;  %3321 = vmatprep.subr.bf16.mxu1 %v3546_v58  ;;  %v1307_v24 = vshrl.u32 %v824_v17, 16  ;;  %v1310_v28 = vshll.u32 %v824_v17, 16 }
  0xb1   : > { %v1259_v40 = vrot.slane %v1258_v18, 4  ;;  %v1286_v60 = vsel %vm3980_vm8, %v1278_v29, %v1285_v52  ;;  %v826_v52 = vld [vmem:[%s3961_s29 + $0xc4] sm:$0x1] }
  0xb2   : > { %v4327_v59 = vcombine.low %v1277_v20, %v1286_v60  ;;  %v1256_v37 = vsel %vm4010_vm11, %v1254_v43, %v1255_v35  ;;  %v1309_v34 = vrot.slane %v1307_v24, 7  ;;  %v1323_v42 = vrot.slane %v1307_v24, 4 }
  0xb3   : > { %v1264_v62 = vsel %vm4010_vm11, %v1259_v40, %v1263_v53  ;;  %3322 = vmatpush3.bf16.msra.mxu1 %v3547_v49  ;;  %v1324_v18 = vrot.slane %v1310_v28, 5  ;;  %v1333_v20 = vshll.u32 %v826_v52, 16 }
  0xb4   : > { %1982 = vmatmul.mubr.bf16.gmra.mxu0 %v4186_v45  ;;  %3419 = vmatprep.subr.bf16.mxu1 %v3548_v56  ;;  %v4338_v1 = vcombine.low %v1256_v37, %v1264_v62  ;;  %v1312_v44 = vor.u32 %v1310_v28, %v1309_v34  ;;  %v1314_v46 = vrot.slane %v1309_v34, 4 }
  0xb5   : > { %1989 = vmatprep.mubr.bf16.mxu0 %v4250_v54  ;;  %v1325_v53 = vor.u32 %v1324_v18, %v1323_v42  ;;  %v1335_v40 = vrot.slane %v1333_v20, 5 }
  0xb6   : > { %2079 = vmatmul.mubr.bf16.gmra.mxu1 %v4258_v33 }
  0xb7   : > { %2086 = vmatprep.mubr.bf16.mxu1 %v4265_v63  ;;  %v1326_v43 = vrot.slane %v1325_v53, 4 }
  0xbc   : > { %1990 = vmatmul.mubr.bf16.gmra.mxu0 %v4236_v32 }
  0xbd   : > { %1997 = vmatprep.mubr.bf16.mxu0 %v4296_v39 }
  0xbe   : > { %2087 = vmatmul.mubr.bf16.gmra.mxu1 %v4311_v50 }
  0xbf   : > { %2094 = vmatprep.mubr.bf16.mxu1 %v4327_v59 }
  0xc4   : > { %1998 = vmatmul.mubr.bf16.gmra.mxu0 %v4265_v63 }
  0xc5   : > { %2135 = vmatprep.mubr.bf16.mxu0 %v4079_v14  ;;  %v3555_v14 = vld [vmem:[%s4556_s1 + $0x208] sm:$0xff]  }
  0xc6   : > { %2095 = vmatmul.mubr.bf16.gmra.mxu1 %v4338_v1 }
  0xc7   : > { %2232 = vmatprep.mubr.bf16.mxu1 %v4048_v48 }
  0xcc   : > { %2136 = vmatmul.mubr.bf16.vlgmr.msra.gmra.mxu0 %v4000_v10  ;;  %v3551_v10 = vld [vmem:[%s4556_s1 + $0x220] sm:$0xff]  }
  0xcd   : > { %3388 = vmatpush3.bf16.msra.mxu0 %v3548_v56  ;;  %2143 = vmatprep.mubr.bf16.mxu0 %v4119_v51 }
  0xce   : > { %3389 = vmatprep.subr.bf16.mxu0 %v3549_v3  ;;  %2233 = vmatmul.mubr.bf16.vlgmr.msra.gmra.mxu1 %v4065_v61  ;;  %v3552_v61 = vld [vmem:[%s4556_s1 + $0x218] sm:$0xff]  }
  0xcf   : > { %2240 = vmatprep.mubr.bf16.mxu1 %v4094_v2  ;;  %3427 = vmatpush3.bf16.msra.mxu1 %v3548_v56 }
  0xd0   : > { %3420 = vmatprep.subr.bf16.mxu1 %v3549_v3 }
  0xd1   : > { %3390 = vmatpush3.bf16.msra.mxu0 %v3549_v3 }
  0xd2   : > { %3391 = vmatprep.subr.bf16.mxu0 %v3550_v4 }
  0xd3   : > { %3428 = vmatpush3.bf16.msra.mxu1 %v3549_v3 }
  0xd4   : > { %2144 = vmatmul.mubr.bf16.gmra.mxu0 %v4048_v48  ;;  %3421 = vmatprep.subr.bf16.mxu1 %v3550_v4  ;;  %v3553_v48 = vld [vmem:[%s4556_s1 + $0x210] sm:$0xff]  }
  0xd5   : > { %2151 = vmatprep.mubr.bf16.mxu0 %v4162_v26  ;;  %3392 = vmatpush3.bf16.msra.mxu0 %v3550_v4 }
  0xd6   : > { %3393 = vmatprep.subr.bf16.mxu0 %v3551_v10  ;;  %2241 = vmatmul.mubr.bf16.gmra.mxu1 %v4101_v30  ;;  %v1287_v30 = vrot.slane %v1271_v22, 4  ;;  %v825_v22 = vld [vmem:[%s3961_s29 + $0xc0] sm:$0xf] }
  0xd7   : > { %2248 = vmatprep.mubr.bf16.mxu1 %v4134_v19  ;;  %3429 = vmatpush3.bf16.msra.mxu1 %v3550_v4  ;;  %v1316_v25 = vshrl.u32 %v825_v22, 16  ;;  %v1319_v35 = vshll.u32 %v825_v22, 16 }
  0xd8   : > { %3422 = vmatprep.subr.bf16.mxu1 %v3551_v10 }
  0xd9   : > { %3394 = vmatpush3.bf16.msra.mxu0 %v3551_v10  ;;  %v1329_v21 = vrot.slane %v1316_v25, 4 }
  0xda   : > { %3395 = vmatprep.subr.bf16.mxu0 %v3552_v61 }
  0xdb   : > { %3430 = vmatpush3.bf16.msra.mxu1 %v3551_v10 }
  0xdc   : > { %2152 = vmatmul.mubr.bf16.gmra.mxu0 %v4094_v2  ;;  %3423 = vmatprep.subr.bf16.mxu1 %v3552_v61  ;;  %v3557_v2 = vld [vmem:[%s4556_s1 + $0x200] sm:$0xff]  }
  0xdd   : > { %2159 = vmatprep.mubr.bf16.mxu0 %v4211_v12  ;;  %3396 = vmatpush3.bf16.msra.mxu0 %v3552_v61 }
  0xde   : > { %3397 = vmatprep.subr.bf16.mxu0 %v3553_v48  ;;  %2249 = vmatmul.mubr.bf16.gmra.mxu1 %v4152_v9  ;;  %v1291_v9 = vrot.slane %v1283_v31, 5  ;;  %v823_v31 = vld [vmem:[%s3961_s29 + $0xb8] sm:$0xf] }
  0xdf   : > { %2256 = vmatprep.mubr.bf16.mxu1 %v4176_v36  ;;  %3431 = vmatpush3.bf16.msra.mxu1 %v3552_v61  ;;  %v1302_v38 = vshrl.u32 %v823_v31, 16 }
  0xe0   : > { %3424 = vmatprep.subr.bf16.mxu1 %v3553_v48  ;;  %v1294_v13 = vor.u32 %v1293_v0, %v1291_v9 }
  0xe1   : > { %3398 = vmatpush3.bf16.msra.mxu0 %v3553_v48  ;;  %v2770_v41 = vrot.slane %v1302_v38, 11 }
  0xe2   : > { %3399 = vmatprep.subr.bf16.mxu0 %v3555_v14  ;;  %v1295_v6 = vrot.slane %v1294_v13, 4 }
  0xe3   : > { %3432 = vmatpush3.bf16.msra.mxu1 %v3553_v48 }
  0xe4   : > { %2160 = vmatmul.mubr.bf16.gmra.mxu0 %v4134_v19  ;;  %3425 = vmatprep.subr.bf16.mxu1 %v3555_v14  ;;  %v1288_v19 = vrot.slane %v1274_v57, 5 }
  0xe5   : > { %2167 = vmatprep.mubr.bf16.mxu0 %v4258_v33  ;;  %3400 = vmatpush3.bf16.msra.mxu0 %v3555_v14 }
  0xe6   : > { %3401 = vmatprep.subr.bf16.mxu0 %v3557_v2  ;;  %2257 = vmatmul.mubr.bf16.gmra.mxu1 %v4186_v45  ;;  %v822_v45 = vld [vmem:[%s3961_s29 + $0xb0] sm:$0x1]  ;;  %v1289_v5 = vor.u32 %v1288_v19, %v1287_v30 }
  0xe7   : > { %2264 = vmatprep.mubr.bf16.mxu1 %v4250_v54  ;;  %3433 = vmatpush3.bf16.msra.mxu1 %v3555_v14  ;;  %v1297_v16 = vshll.u32 %v822_v45, 16 }
  0xe8   : > { %3426 = vmatprep.subr.bf16.mxu1 %v3557_v2  ;;  %v1290_v57 = vrot.slane %v1289_v5, 4 }
  0xe9   : > { %3402 = vmatpush3.bf16.msra.mxu0 %v3557_v2  ;;  %v1299_v23 = vrot.slane %v1297_v16, 5 }
  0xeb   : > { %3434 = vmatpush3.bf16.msra.mxu1 %v3557_v2  ;;  %v1300_v11 = vsel %vm4010_vm11, %v1295_v6, %v1299_v23 }
  0xec   : > { %2168 = vmatmul.mubr.bf16.gmra.mxu0 %v4176_v36  ;;  %v2796_v36 = vcombine.low %v4273_v7, %v4276_v8  ;;  %v2799_v8 = vcombine.low %v824_v17, %v825_v22 }
  0xed   : > { %2175 = vmatprep.mubr.bf16.mxu0 %v4311_v50 }
  0xee   : > { %2265 = vmatmul.mubr.bf16.gmra.mxu1 %v4236_v32  ;;  %v1292_v32 = vsel %vm4010_vm11, %v1290_v57, %v1291_v9 }
  0xef   : > { %2272 = vmatprep.mubr.bf16.mxu1 %v4296_v39  ;;  %v2797_v7 = vcombine.low %v1292_v32, %v1300_v11 }
  0xf4   : > { %2176 = vmatmul.mubr.bf16.gmra.mxu0 %v4250_v54  ;;  %v1318_v54 = vrot.slane %v1316_v25, 7 }
  0xf5   : > { %2183 = vmatprep.mubr.bf16.mxu0 %v4338_v1 }
  0xf6   : > { %2273 = vmatmul.mubr.bf16.gmra.mxu1 %v4265_v63  ;;  %v1321_v47 = vor.u32 %v1319_v35, %v1318_v54  ;;  %v1313_v63 = vsel %vm3980_vm8, %v2770_v41, %v1312_v44 }
  0xf7   : > { %2280 = vmatprep.mubr.bf16.mxu1 %v2796_v36 }
  0xf8   : > { %v1322_v27 = vsel %vm3980_vm8, %v1314_v46, %v1321_v47 }
  0xf9   : > { %v2798_v29 = vcombine.low %v1313_v63, %v1322_v27 }
  0xfc   : > { %2184 = vmatmul.mubr.bf16.gmra.mxu0 %v4296_v39  ;;  %v1327_v39 = vrot.slane %v1319_v35, 5 }
  0xfd   : > { %2191 = vmatprep.mubr.bf16.mxu0 %v2797_v7 }
  0xfe   : > { %2281 = vmatmul.mubr.bf16.gmra.mxu1 %v4327_v59  ;;  %v1330_v58 = vor.u32 %v1329_v21, %v1327_v39 }
  0xff   : > { %2288 = vmatprep.mubr.bf16.mxu1 %v2799_v8 }
 0x100   : > { %v1331_v55 = vrot.slane %v1330_v58, 4 }
 0x102   : > { %v1336_v60 = vsel %vm4010_vm11, %v1331_v55, %v1335_v40 }
 0x104   : > { %2192 = vmatmul.mubr.bf16.gmra.mxu0 %v2796_v36 }
 0x105   : > { %3403 = vmatprep.mubr.bf16.mxu0 %v4119_v51  ;;  %v1328_v51 = vsel %vm4010_vm11, %v1326_v43, %v1327_v39 }
 0x106   : > { %2289 = vmatmul.mubr.bf16.gmra.mxu1 %v2798_v29 }
 0x107   : > { %3411 = vmatprep.mubr.bf16.mxu1 %v4311_v50  ;;  %v2800_v50 = vcombine.low %v1328_v51, %v1336_v60 }
 0x10c   : > { %3404 = vmatmul.mubr.bf16.vlgmr.msra.gmra.mxu0 %v4162_v26 }
 0x10d   : > { %3407 = vmatprep.mubr.bf16.mxu0 %v4211_v12 }
 0x10e   : > { %3412 = vmatmul.mubr.bf16.vlgmr.msra.gmra.mxu1 %v4338_v1 }
 0x10f   : > { %3415 = vmatprep.mubr.bf16.mxu1 %v2797_v7 }
 0x114   : > { %3408 = vmatmul.mubr.bf16.gmra.mxu0 %v4258_v33 }
 0x116   : > { %3416 = vmatmul.mubr.bf16.gmra.mxu1 %v2800_v50 }
 0x14c   : > { %v3131_v49 = vpop.f32.mrf.mxu0 }
 0x14e   : > { %v3132_v26 = vpop.f32.mrf.mxu0  ;;  %v3195_v59 = vpop.f32.mrf.mxu1 }
 0x14f   : > { %v3133_v56 = vadd.f32 %v3132_v26, %v3131_v49 }
 0x150   : > { %v3134_v37 = vpop.f32.mrf.mxu0  ;;  %v3196_v62 = vpop.f32.mrf.mxu1 }
 0x151   : > { %v3197_v12 = vadd.f32 %v3196_v62, %v3195_v59 }
 0x152   : > { %v3135_v3 = vpop.f32.mrf.mxu0  ;;  %v3198_v1 = vpop.f32.mrf.mxu1 }
 0x153   : > { %v3136_v4 = vadd.f32 %v3135_v3, %v3134_v37  ;;  %v4423_v10 = vadd.f32 %v3197_v12, %v3133_v56 }
 0x154   : > { %v3137_v61 = vpop.f32.mrf.mxu0  ;;  %v3199_v48 = vpop.f32.mrf.mxu1 }
 0x155   : > { %v3200_v15 = vadd.f32 %v3199_v48, %v3198_v1 }
 0x156   : > { %v3138_v14 = vpop.f32.mrf.mxu0  ;;  %v3201_v2 = vpop.f32.mrf.mxu1 }
 0x157   : > { %v3139_v30 = vadd.f32 %v3138_v14, %v3137_v61  ;;  %v4425_v33 = vadd.f32 %v3200_v15, %v3136_v4 }
 0x158   : > { %v3140_v19 = vpop.f32.mrf.mxu0  ;;  %v3202_v9 = vpop.f32.mrf.mxu1 }
 0x159   : > { %v3203_v0 = vadd.f32 %v3202_v9, %v3201_v2 }
 0x15a   : > { %v3141_v45 = vpop.f32.mrf.mxu0  ;;  %v3204_v5 = vpop.f32.mrf.mxu1 }
 0x15b   : > { %v3142_v13 = vadd.f32 %v3141_v45, %v3140_v19  ;;  %v4427_v16 = vadd.f32 %v3203_v0, %v3139_v30 }
 0x15c   : > { %v3143_v17 = vpop.f32.mrf.mxu0  ;;  %v3205_v22 = vpop.f32.mrf.mxu1 }
 0x15d   : > { %v3206_v57 = vadd.f32 %v3205_v22, %v3204_v5 }
 0x15e   : > { %v3144_v6 = vpop.f32.mrf.mxu0  ;;  %v3207_v23 = vpop.f32.mrf.mxu1 }
 0x15f   : > { %v3145_v36 = vadd.f32 %v3144_v6, %v3143_v17  ;;  %v4429_v24 = vadd.f32 %v3206_v57, %v3142_v13 }
 0x160   : > { %v3146_v25 = vpop.f32.mrf.mxu0  ;;  %v3208_v31 = vpop.f32.mrf.mxu1 }
 0x161   : > { %v3209_v32 = vadd.f32 %v3208_v31, %v3207_v23 }
 0x162   : > { %v3147_v11 = vpop.f32.mrf.mxu0  ;;  %v3210_v28 = vpop.f32.mrf.mxu1 }
 0x163   : > { %v3148_v34 = vadd.f32 %v3147_v11, %v3146_v25  ;;  %v4431_v54 = vadd.f32 %v3209_v32, %v3145_v36 }
 0x164   : > { %v3149_v35 = vpop.f32.mrf.mxu0  ;;  %v3211_v38 = vpop.f32.mrf.mxu1 }
 0x165   : > { %v3212_v7 = vadd.f32 %v3211_v38, %v3210_v28 }
 0x166   : > { %v3150_v8 = vpop.f32.mrf.mxu0  ;;  %v3213_v41 = vpop.f32.mrf.mxu1 }
 0x167   : > { %v3151_v44 = vadd.f32 %v3150_v8, %v3149_v35  ;;  %v4433_v46 = vadd.f32 %v3212_v7, %v3148_v34 }
 0x168   : > { %v3152_v47 = vpop.f32.mrf.mxu0  ;;  %v3214_v63 = vpop.f32.mrf.mxu1 }
 0x169   : > { %4570 = vst [vmem:[#allocation3_spill] sm:$0xff] %v4433_v46  ;;  %v3215_v27 = vadd.f32 %v3214_v63, %v3213_v41 }
 0x16a   : > { %v3153_v29 = vpop.f32.mrf.mxu0  ;;  %v3216_v42 = vpop.f32.mrf.mxu1 }
 0x16b   : > { %v3154_v18 = vadd.f32 %v3153_v29, %v3152_v47  ;;  %v4435_v21 = vadd.f32 %v3215_v27, %v3151_v44 }
 0x16c   : > { %v3155_v39 = vpop.f32.mrf.mxu0  ;;  %v3217_v52 = vpop.f32.mrf.mxu1 }
 0x16d   : > { %4571 = vst [vmem:[#allocation4_spill] sm:$0xff] %v4435_v21  ;;  %v3218_v53 = vadd.f32 %v3217_v52, %v3216_v42 }
 0x16e   : > { %v3156_v58 = vpop.f32.mrf.mxu0  ;;  %v3219_v20 = vpop.f32.mrf.mxu1 }
 0x16f   : > { %v3157_v43 = vadd.f32 %v3156_v58, %v3155_v39  ;;  %v4437_v55 = vadd.f32 %v3218_v53, %v3154_v18 }
 0x170   : > { %v3158_v40 = vpop.f32.mrf.mxu0  ;;  %v3220_v51 = vpop.f32.mrf.mxu1 }
 0x171   : > { %4572 = vst [vmem:[#allocation5_spill] sm:$0xff] %v4437_v55  ;;  %v3221_v60 = vadd.f32 %v3220_v51, %v3219_v20 }
 0x172   : > { %v3159_v50 = vpop.f32.mrf.mxu0  ;;  %v3222_v49 = vpop.f32.mrf.mxu1 }
 0x173   : > { %v3160_v26 = vadd.f32 %v3159_v50, %v3158_v40  ;;  %v4439_v59 = vadd.f32 %v3221_v60, %v3157_v43 }
 0x174   : > { %v3161_v56 = vpop.f32.mrf.mxu0  ;;  %v3223_v37 = vpop.f32.mrf.mxu1 }
 0x175   : > { %4573 = vst [vmem:[#allocation6_spill] sm:$0xff] %v4439_v59  ;;  %v3224_v62 = vadd.f32 %v3223_v37, %v3222_v49 }
 0x176   : > { %v3162_v12 = vpop.f32.mrf.mxu0  ;;  %v3225_v3 = vpop.f32.mrf.mxu1 }
 0x177   : > { %v3163_v1 = vadd.f32 %v3162_v12, %v3161_v56  ;;  %v4441_v4 = vadd.f32 %v3224_v62, %v3160_v26 }
 0x178   : > { %v3164_v61 = vpop.f32.mrf.mxu0  ;;  %v3226_v48 = vpop.f32.mrf.mxu1 }
 0x179   : > { %4574 = vst [vmem:[#allocation7_spill] sm:$0xff] %v4441_v4  ;;  %v3227_v15 = vadd.f32 %v3226_v48, %v3225_v3 }
 0x17a   : > { %v3165_v14 = vpop.f32.mrf.mxu0  ;;  %v3228_v2 = vpop.f32.mrf.mxu1 }
 0x17b   : > { %v3166_v30 = vadd.f32 %v3165_v14, %v3164_v61  ;;  %v4443_v19 = vadd.f32 %v3227_v15, %v3163_v1 }
 0x17c   : > { %v3167_v9 = vpop.f32.mrf.mxu0  ;;  %v3229_v0 = vpop.f32.mrf.mxu1 }
 0x17d   : > { %4575 = vst [vmem:[#allocation8_spill] sm:$0xff] %v4443_v19  ;;  %v3230_v45 = vadd.f32 %v3229_v0, %v3228_v2 }
 0x17e   : > { %v3168_v5 = vpop.f32.mrf.mxu0  ;;  %v3231_v13 = vpop.f32.mrf.mxu1 }
 0x17f   : > { %v3169_v17 = vadd.f32 %v3168_v5, %v3167_v9  ;;  %v4445_v22 = vadd.f32 %v3230_v45, %v3166_v30 }
 0x180   : > { %v3170_v57 = vpop.f32.mrf.mxu0  ;;  %v3232_v6 = vpop.f32.mrf.mxu1 }
 0x181   : > { %4576 = vst [vmem:[#allocation9_spill] sm:$0xff] %v4445_v22  ;;  %v3233_v23 = vadd.f32 %v3232_v6, %v3231_v13 }
 0x182   : > { %v3171_v36 = vpop.f32.mrf.mxu0  ;;  %v3234_v25 = vpop.f32.mrf.mxu1 }
 0x183   : > { %v3172_v31 = vadd.f32 %v3171_v36, %v3170_v57  ;;  %v4447_v32 = vadd.f32 %v3233_v23, %v3169_v17 }
 0x184   : > { %v3173_v11 = vpop.f32.mrf.mxu0  ;;  %v3235_v28 = vpop.f32.mrf.mxu1 }
 0x185   : > { %4577 = vst [vmem:[#allocation10_spill] sm:$0xff] %v4447_v32  ;;  %v3236_v34 = vadd.f32 %v3235_v28, %v3234_v25 }
 0x186   : > { %v3174_v35 = vpop.f32.mrf.mxu0  ;;  %v3237_v38 = vpop.f32.mrf.mxu1 }
 0x187   : > { %v3175_v7 = vadd.f32 %v3174_v35, %v3173_v11  ;;  %v4449_v8 = vadd.f32 %v3236_v34, %v3172_v31 }
 0x188   : > { %v3176_v41 = vpop.f32.mrf.mxu0  ;;  %v3238_v44 = vpop.f32.mrf.mxu1 }
 0x189   : > { %4578 = vst [vmem:[#allocation11_spill] sm:$0xff] %v4449_v8  ;;  %v3239_v47 = vadd.f32 %v3238_v44, %v3237_v38 }
 0x18a   : > { %v3177_v63 = vpop.f32.mrf.mxu0  ;;  %v3240_v27 = vpop.f32.mrf.mxu1 }
 0x18b   : > { %v3178_v29 = vadd.f32 %v3177_v63, %v3176_v41  ;;  %v4451_v42 = vadd.f32 %v3239_v47, %v3175_v7 }
 0x18c   : > { %v3259_v18 = vpop.f32.mrf.mxu0  ;;  %v3241_v39 = vpop.f32.mrf.mxu1 }
 0x18d   : > { %4579 = vst [vmem:[#allocation12_spill] sm:$0xff] %v4451_v42  ;;  %v3242_v52 = vadd.f32 %v3241_v39, %v3240_v27 }
 0x18e   : > { %v3260_v53 = vpop.f32.mrf.mxu0  ;;  %v3323_v58 = vpop.f32.mrf.mxu1 }
 0x18f   : > { %v3261_v20 = vadd.f32 %v3260_v53, %v3259_v18  ;;  %v4453_v43 = vadd.f32 %v3242_v52, %v3178_v29 }
 0x190   : > { %v3262_v40 = vpop.f32.mrf.mxu0  ;;  %v3324_v60 = vpop.f32.mrf.mxu1 }
 0x191   : > { %4580 = vst [vmem:[#allocation13_spill] sm:$0xff] %v4453_v43  ;;  %v4456_v51 = vadd.f32 %v3261_v20, %v4423_v10  ;;  %v3325_v22 = vadd.f32 %v3324_v60, %v3323_v58 }
 0x192   : > { %v3263_v50 = vpop.f32.mrf.mxu0  ;;  %v3326_v49 = vpop.f32.mrf.mxu1 }
 0x193   : > { %v3264_v42 = vadd.f32 %v3263_v50, %v3262_v40 }
 0x194   : > { %v3265_v26 = vpop.f32.mrf.mxu0  ;;  %v3327_v56 = vpop.f32.mrf.mxu1 }
 0x195   : > { %v2141_v4 = vadd.f32 %v3264_v42, %v4425_v33  ;;  %v3328_v21 = vadd.f32 %v3327_v56, %v3326_v49 }
 0x196   : > { %v3266_v37 = vpop.f32.mrf.mxu0  ;;  %v3329_v62 = vpop.f32.mrf.mxu1 }
 0x198   : > { %v3268_v12 = vpop.f32.mrf.mxu0  ;;  %v3330_v3 = vpop.f32.mrf.mxu1 }
 0x19a   : > { %v3269_v1 = vpop.f32.mrf.mxu0  ;;  %v3332_v61 = vpop.f32.mrf.mxu1 }
 0x19b   : > { %v3270_v59 = vadd.f32 %v3269_v1, %v3268_v12 }
 0x19c   : > { %v3271_v48 = vpop.f32.mrf.mxu0  ;;  %v3333_v15 = vpop.f32.mrf.mxu1 }
 0x19d   : > { %v2149_v58 = vadd.f32 %v3270_v59, %v4429_v24  ;;  %v3334_v60 = vadd.f32 %v3333_v15, %v3332_v61  ;;  %v4591_v59 = vld [vmem:[#allocation5_spill] sm:$0xff] }
 0x19e   : > { %v3272_v14 = vpop.f32.mrf.mxu0  ;;  %v4458_v2 = vpop.f32.mrf.mxu1 }
 0x1a0   : > { %v4460_v30 = vpop.f32.mrf.mxu0  ;;  %v4462_v10 = vpop.f32.mrf.mxu1 }
 0x1a1   : > { %v3337_v1 = vadd.f32 %v4462_v10, %v4458_v2  ;;  %v2246_v10 = vadd.f32 %v3334_v60, %v2149_v58 }
 0x1a2   : > { %v4464_v9 = vpop.f32.mrf.mxu0  ;;  %v4466_v0 = vpop.f32.mrf.mxu1 }
 0x1a3   : > { %4581 = vst [vmem:[#allocation14_spill] sm:$0xff] %v4464_v9  ;;  %4582 = vst [vmem:[#allocation15_spill] sm:$0xff] %v4466_v0  ;;  %v3331_v9 = vadd.f32 %v3330_v3, %v3329_v62  ;;  %v2238_v3 = vadd.f32 %v3328_v21, %v2141_v4  ;;  %v4594_v4 = vld [vmem:[#allocation8_spill] sm:$0xff] }
 0x1a4   : > { %v3277_v45 = vpop.f32.mrf.mxu0  ;;  %v4468_v5 = vpop.f32.mrf.mxu1 }
 0x1a5   : > { %4583 = vst [vmem:[#allocation16_spill] sm:$0xff] %v4468_v5  ;;  %v3267_v5 = vadd.f32 %v3266_v37, %v3265_v26 }
 0x1a6   : > { %v3278_v13 = vpop.f32.mrf.mxu0  ;;  %v3341_v17 = vpop.f32.mrf.mxu1 }
 0x1a7   : > { %v3279_v50 = vadd.f32 %v3278_v13, %v3277_v45  ;;  %v4590_v45 = vld [vmem:[#allocation4_spill] sm:$0xff] }
 0x1a8   : > { %v3280_v57 = vpop.f32.mrf.mxu0  ;;  %v3342_v6 = vpop.f32.mrf.mxu1 }
 0x1aa   : > { %v3281_v23 = vpop.f32.mrf.mxu0  ;;  %v3344_v36 = vpop.f32.mrf.mxu1 }
 0x1ab   : > { %v3282_v26 = vadd.f32 %v3281_v23, %v3280_v57  ;;  %v4593_v57 = vld [vmem:[#allocation7_spill] sm:$0xff] }
 0x1ac   : > { %v3283_v25 = vpop.f32.mrf.mxu0  ;;  %v3345_v31 = vpop.f32.mrf.mxu1 }
 0x1ad   : > { %v2165_v61 = vadd.f32 %v3282_v26, %v4591_v59  ;;  %v3346_v15 = vadd.f32 %v3345_v31, %v3344_v36  ;;  %v4597_v36 = vld [vmem:[#allocation15_spill] sm:$0xff]  ;;  %v4598_v31 = vld [vmem:[#allocation16_spill] sm:$0xff] }
 0x1ae   : > { %v3284_v11 = vpop.f32.mrf.mxu0  ;;  %v3347_v28 = vpop.f32.mrf.mxu1 }
 0x1af   : > { %v3285_v37 = vadd.f32 %v3284_v11, %v3283_v25 }
 0x1b0   : > { %v3286_v34 = vpop.f32.mrf.mxu0  ;;  %v3348_v35 = vpop.f32.mrf.mxu1 }
 0x1b2   : > { %v3287_v38 = vpop.f32.mrf.mxu0  ;;  %v3350_v7 = vpop.f32.mrf.mxu1 }
 0x1b3   : > { %v3288_v33 = vadd.f32 %v3287_v38, %v3286_v34  ;;  %v4596_v34 = vld [vmem:[#allocation3_spill] sm:$0xff] }
 0x1b4   : > { %v3289_v41 = vpop.f32.mrf.mxu0  ;;  %v3351_v44 = vpop.f32.mrf.mxu1 }
 0x1b5   : > { %v3352_v21 = vadd.f32 %v3351_v44, %v3350_v7 }
 0x1b6   : > { %v3290_v47 = vpop.f32.mrf.mxu0  ;;  %v3353_v63 = vpop.f32.mrf.mxu1 }
 0x1b7   : > { %v3291_v42 = vadd.f32 %v3290_v47, %v3289_v41  ;;  %v3340_v41 = vadd.f32 %v4598_v31, %v4597_v36 }
 0x1b8   : > { %v3292_v27 = vpop.f32.mrf.mxu0  ;;  %v3354_v29 = vpop.f32.mrf.mxu1 }
 0x1b9   : > { %v3355_v23 = vadd.f32 %v3354_v29, %v3353_v63 }
 0x1ba   : > { %v3293_v18 = vpop.f32.mrf.mxu0  ;;  %v3356_v39 = vpop.f32.mrf.mxu1 }
 0x1bb   : > { %v3294_v56 = vadd.f32 %v3293_v18, %v3292_v27 }
 0x1bc   : > { %v3295_v52 = vpop.f32.mrf.mxu0  ;;  %v3357_v53 = vpop.f32.mrf.mxu1 }
 0x1bd   : > { %v3358_v11 = vadd.f32 %v3357_v53, %v3356_v39 }
 0x1be   : > { %v3296_v20 = vpop.f32.mrf.mxu0  ;;  %v4470_v8 = vpop.f32.mrf.mxu1 }
 0x1bf   : > { %4584 = vst [vmem:[#allocation17_spill] sm:$0xff] %v4470_v8  ;;  %v2146_v8 = vadd.f32 %v3267_v5, %v4427_v16  ;;  %v4592_v5 = vld [vmem:[#allocation6_spill] sm:$0xff] }
 0x1c0   : > { %v4472_v43 = vpop.f32.mrf.mxu0  ;;  %v4474_v32 = vpop.f32.mrf.mxu1  ;;  %v2170_v13 = vadd.f32 %v3285_v37, %v4592_v5 }
 0x1c1   : > { %4585 = vst [vmem:[#allocation18_spill] sm:$0xff] %v4472_v43  ;;  %4586 = vst [vmem:[#allocation19_spill] sm:$0xff] %v4474_v32  ;;  %v3273_v43 = vadd.f32 %v3272_v14, %v3271_v48  ;;  %v2243_v62 = vadd.f32 %v3331_v9, %v2146_v8  ;;  %v4589_v48 = vld [vmem:[#allocation14_spill] sm:$0xff]  ;;  %v2173_v8 = vadd.f32 %v3288_v33, %v4593_v57 }
 0x1c2   : > { %v4476_v0 = vpop.f32.mrf.mxu0  ;;  %v4478_v46 = vpop.f32.mrf.mxu1  ;;  %v3276_v14 = vadd.f32 %v4589_v48, %v4460_v30  ;;  %v2178_v9 = vadd.f32 %v3291_v42, %v4594_v4  ;;  %v4595_v30 = vld [vmem:[#allocation9_spill] sm:$0xff] }
 0x1c3   : > { %4587 = vst [vmem:[#allocation20_spill] sm:$0xff] %v4476_v0  ;;  %4588 = vst [vmem:[#allocation21_spill] sm:$0xff] %v4478_v46  ;;  %v2235_v46 = vadd.f32 %v3325_v22, %v4456_v51  ;;  %v2154_v49 = vadd.f32 %v3273_v43, %v4431_v54  ;;  %v2162_v22 = vadd.f32 %v3279_v50, %v4590_v45 }
 0x1c4   : > { %v3301_v19 = vpop.f32.mrf.mxu0  ;;  %v4481_v55 = vpop.f32.mrf.mxu1  ;;  %v3343_v51 = vadd.f32 %v3342_v6, %v3341_v17  ;;  %v3349_v54 = vadd.f32 %v3348_v35, %v3347_v28  ;;  %v2181_v25 = vadd.f32 %v3294_v56, %v4595_v30  ;;  %v3297_v17 = vadd.f32 %v3296_v20, %v3295_v52  ;;  %v4599_v52 = vld [vmem:[#allocation10_spill] sm:$0xff]  ;;  %v4604_v56 = vld [vmem:[#allocation12_spill] sm:$0xff] }
 0x1c5   : > { %v2157_v38 = vadd.f32 %v3276_v14, %v4596_v34  ;;  %v2251_v47 = vadd.f32 %v3337_v1, %v2154_v49  ;;  %v2262_v50 = vadd.f32 %v3346_v15, %v2165_v61  ;;  %v2270_v39 = vadd.f32 %v3352_v21, %v2173_v8  ;;  %v4605_v14 = vld [vmem:[#allocation13_spill] sm:$0xff] }
 0x1c6   : > { %v3302_v40 = vpop.f32.mrf.mxu0  ;;  %v3365_v32 = vpop.f32.mrf.mxu1  ;;  %v2267_v7 = vadd.f32 %v3349_v54, %v2170_v13  ;;  %v2259_v18 = vadd.f32 %v3343_v51, %v2162_v22  ;;  %v2186_v53 = vadd.f32 %v3297_v17, %v4599_v52  ;;  %v4600_v20 = vld [vmem:[#allocation17_spill] sm:$0xff]  ;;  %v2275_v33 = vadd.f32 %v3355_v23, %v2178_v9  ;;  %v4606_v23 = vld [vmem:[#allocation11_spill] sm:$0xff] }
 0x1c7   : > { %v3303_v28 = vadd.f32 %v3302_v40, %v3301_v19  ;;  %v2278_v19 = vadd.f32 %v3358_v11, %v2181_v25 }
 0x1c8   : > { %v3304_v0 = vpop.f32.mrf.mxu0  ;;  %v3366_v12 = vpop.f32.mrf.mxu1  ;;  %v4601_v58 = vld [vmem:[#allocation19_spill] sm:$0xff]  ;;  %v4602_v42 = vld [vmem:[#allocation18_spill] sm:$0xff] }
 0x1c9   : > { %v3361_v60 = vadd.f32 %v4601_v58, %v4600_v20  ;;  %v3367_v48 = vadd.f32 %v3366_v12, %v3365_v32 }
 0x1ca   : > { %v3305_v16 = vpop.f32.mrf.mxu0  ;;  %v3368_v24 = vpop.f32.mrf.mxu1  ;;  %v4607_v25 = vld [vmem:[#allocation21_spill] sm:$0xff] }
 0x1cb   : > { %v3306_v27 = vadd.f32 %v3305_v16, %v3304_v0  ;;  %v4603_v0 = vld [vmem:[#allocation20_spill] sm:$0xff]  ;;  %v2194_v16 = vadd.f32 %v3303_v28, %v4604_v56  ;;  %v3364_v11 = vadd.f32 %v4481_v55, %v4607_v25 }
 0x1cc   : > { %v3405_v43 = vpop.f32.mrf.mxu0  ;;  %v3369_v2 = vpop.f32.mrf.mxu1  ;;  %v3300_v49 = vadd.f32 %v4603_v0, %v4602_v42 }
 0x1cd   : > { %v2340_v26 = vadd.f32 %v3405_v43, %v2243_v62  ;;  %v2197_v45 = vadd.f32 %v3306_v27, %v4605_v14  ;;  %v3370_v43 = vadd.f32 %v3369_v2, %v3368_v24 }
 0x1ce   : > { %v2331_v6 = vpop.f32.mrf.mxu0  ;;  %v3413_v35 = vpop.f32.mrf.mxu1  ;;  %v2189_v30 = vadd.f32 %v3300_v49, %v4606_v23 }
 0x1cf   : > { %v2332_v63 = vadd.f32 %v2331_v6, %v2235_v46  ;;  %v4507_v22 = vadd.f32 %v3413_v35, %v2275_v33  ;;  %v2498_v8 = vmul.f32 %v2340_v26, %v2340_v26  ;;  %v2291_v35 = vadd.f32 %v3367_v48, %v2194_v16 }
 0x1d0   : > { %v3406_v44 = vpop.f32.mrf.mxu0  ;;  %v2363_v29 = vpop.f32.mrf.mxu1  ;;  %v2294_v27 = vadd.f32 %v3370_v43, %v2197_v45 }
 0x1d1   : > { %v2343_v37 = vadd.f32 %v3406_v44, %v2246_v10  ;;  %v2496_v61 = vmul.f32 %v2332_v63, %v2332_v63  ;;  %v2364_v57 = vadd.f32 %v2363_v29, %v2267_v7  ;;  %v2254_v7 = vadd.f32 %v3340_v41, %v2157_v38 }
 0x1d2   : > { %v2334_v40 = vpop.f32.mrf.mxu0  ;;  %v3414_v62 = vpop.f32.mrf.mxu1 }
 0x1d3   : > { %v3053_v1 = vpack.c.bf16 %v2343_v37, %v2340_v26  ;;  %v2335_v46 = vadd.f32 %v2334_v40, %v2238_v3  ;;  %v4509_v51 = vadd.f32 %v3414_v62, %v2278_v19  ;;  %v2499_v17 = vmul.f32 %v2343_v37, %v2343_v37 }
 0x1d4   : > { %v3409_v59 = vpop.f32.mrf.mxu0  ;;  %v2366_v54 = vpop.f32.mrf.mxu1 }
 0x1d5   : > { %3108 = vst [vmem:[%s3676_s15 + $0x8] sm:$0xff] %v3053_v1   ;;  %v3048_v15 = vpack.c.bf16 %v2335_v46, %v2332_v63  ;;  %v2474_v5 = vadd.f32 %v2335_v46, %v2332_v63  ;;  %v2497_v13 = vmul.f32 %v2335_v46, %v2335_v46  ;;  %v3073_v32 = vpack.c.bf16 %v4509_v51, %v4507_v22 }
 0x1d6   : > { %v2367_v12 = vadd.f32 %v2366_v54, %v2270_v39  ;;  %v2347_v3 = vpop.f32.mrf.mxu0  ;;  %v3417_v9 = vpop.f32.mrf.mxu1  ;;  %v2356_v34 = vadd.f32 %v3409_v59, %v2259_v18  ;;  %v2507_v54 = vmul.f32 %v4509_v51, %v4509_v51 }
 0x1d7   : > { %3049 = vst [vmem:[%s3676_s15] sm:$0xff] %v3048_v15   ;;  %v2475_v21 = vadd.f32 %v2474_v5, %v2340_v26  ;;  %v2512_v4 = vadd.f32 %v2497_v13, %v2496_v61  ;;  %v2348_v10 = vadd.f32 %v2347_v3, %v2251_v47  ;;  %3112 = vst [vmem:[%s3676_s15 + $0x28] sm:$0xff] %v3073_v32  }
 0x1d8   : > { %v3068_v24 = vpack.c.bf16 %v2367_v12, %v2364_v57  ;;  %v3410_v2 = vpop.f32.mrf.mxu0  ;;  %v2379_v31 = vpop.f32.mrf.mxu1  ;;  %v2388_v39 = vadd.f32 %v3417_v9, %v2291_v35  ;;  %v2502_v49 = vmul.f32 %v2356_v34, %v2356_v34  ;;  %v2505_v45 = vmul.f32 %v2367_v12, %v2367_v12 }
 0x1d9   : > { %v2513_v6 = vadd.f32 %v2512_v4, %v2498_v8  ;;  %v2476_v36 = vadd.f32 %v2475_v21, %v2343_v37  ;;  %v2359_v28 = vadd.f32 %v3410_v2, %v2262_v50  ;;  %v2500_v26 = vmul.f32 %v2348_v10, %v2348_v10 }
 0x1da   : > { %3111 = vst [vmem:[%s3676_s15 + $0x20] sm:$0xff] %v3068_v24   ;;  %v2350_v47 = vpop.f32.mrf.mxu0  ;;  %v3418_v55 = vpop.f32.mrf.mxu1  ;;  %v2283_v37 = vadd.f32 %v3361_v60, %v2186_v53  ;;  %v2286_v50 = vadd.f32 %v3364_v11, %v2189_v30  ;;  %v2504_v60 = vmul.f32 %v2364_v57, %v2364_v57  ;;  %v2506_v15 = vmul.f32 %v4507_v22, %v4507_v22 }
 0x1db   : > { %v2477_v44 = vadd.f32 %v2476_v36, %v2348_v10  ;;  %v2514_v63 = vadd.f32 %v2513_v6, %v2499_v17  ;;  %v3063_v29 = vpack.c.bf16 %v2359_v28, %v2356_v34  ;;  %v2391_v52 = vadd.f32 %v3418_v55, %v2294_v27 }
 0x1dc   : > { %v2351_v20 = vadd.f32 %v2350_v47, %v2254_v7  ;;  %v2382_v58 = vpop.f32.mrf.mxu1  ;;  %v2380_v41 = vadd.f32 %v2379_v31, %v2283_v37  ;;  %v2503_v62 = vmul.f32 %v2359_v28, %v2359_v28  ;;  %v2510_v9 = vmul.f32 %v2388_v39, %v2388_v39 }
 0x1dd   : > { %v2515_v18 = vadd.f32 %v2514_v63, %v2500_v26  ;;  %3110 = vst [vmem:[%s3676_s15 + $0x18] sm:$0xff] %v3063_v29   ;;  %v3083_v33 = vpack.c.bf16 %v2391_v52, %v2388_v39  ;;  %v2383_v42 = vadd.f32 %v2382_v58, %v2286_v50  ;;  %v2511_v30 = vmul.f32 %v2391_v52, %v2391_v52 }
 0x1de   : > { %v3058_v19 = vpack.c.bf16 %v2351_v20, %v2348_v10  ;;  %v2478_v38 = vadd.f32 %v2477_v44, %v2351_v20  ;;  %v2501_v40 = vmul.f32 %v2351_v20, %v2351_v20  ;;  %v2508_v3 = vmul.f32 %v2380_v41, %v2380_v41 }
 0x1df   : > { %3114 = vst [vmem:[%s3676_s15 + $0x38] sm:$0xff] %v3083_v33   ;;  %v3078_v16 = vpack.c.bf16 %v2383_v42, %v2380_v41  ;;  %v2509_v21 = vmul.f32 %v2383_v42, %v2383_v42 }
 0x1e0   : > { %3109 = vst [vmem:[%s3676_s15 + $0x10] sm:$0xff] %v3058_v19   ;;  %v2479_v0 = vadd.f32 %v2478_v38, %v2356_v34  ;;  %v2516_v56 = vadd.f32 %v2515_v18, %v2501_v40 }
 0x1e1   : > { %3113 = vst [vmem:[%s3676_s15 + $0x30] sm:$0xff] %v3078_v16  }
 0x1e2   : > { %v2480_v1 = vadd.f32 %v2479_v0, %v2359_v28  ;;  %v2517_v46 = vadd.f32 %v2516_v56, %v2502_v49 }
 0x1e4   : > { %v2481_v53 = vadd.f32 %v2480_v1, %v2364_v57  ;;  %v2518_v48 = vadd.f32 %v2517_v46, %v2503_v62 }
 0x1e6   : > { %v2482_v14 = vadd.f32 %v2481_v53, %v2367_v12  ;;  %v2519_v59 = vadd.f32 %v2518_v48, %v2504_v60 }
 0x1e8   : > { %v2483_v61 = vadd.f32 %v2482_v14, %v4507_v22  ;;  %v2520_v5 = vadd.f32 %v2519_v59, %v2505_v45 }
 0x1ea   : > { %v2484_v13 = vadd.f32 %v2483_v61, %v4509_v51  ;;  %v2521_v43 = vadd.f32 %v2520_v5, %v2506_v15 }
 0x1ec   : > { %v2485_v32 = vadd.f32 %v2484_v13, %v2380_v41  ;;  %v2522_v8 = vadd.f32 %v2521_v43, %v2507_v54 }
 0x1ee   : > { %v2486_v57 = vadd.f32 %v2485_v32, %v2383_v42  ;;  %v2523_v4 = vadd.f32 %v2522_v8, %v2508_v3 }
 0x1f0   : > { %v2487_v12 = vadd.f32 %v2486_v57, %v2388_v39  ;;  %v2524_v10 = vadd.f32 %v2523_v4, %v2509_v21 }
 0x1f2   : > { %v2488_v23 = vadd.f32 %v2487_v12, %v2391_v52  ;;  %v2525_v22 = vadd.f32 %v2524_v10, %v2510_v9 }
 0x1f4   : > { %v2489_v25 = vrot.slane %v2488_v23, 4  ;;  %v2526_v11 = vadd.f32 %v2525_v22, %v2511_v30 }
 0x1f6   : > { %v2490_v17 = vadd.f32 %v2489_v25, %v2488_v23  ;;  %v2527_v24 = vrot.slane %v2526_v11, 4 }
 0x1f8   : > { %v2491_v51 = vrot.slane %v2490_v17, 2  ;;  %v2528_v2 = vadd.f32 %v2527_v24, %v2526_v11 }
 0x1fa   : > { %v2492_v6 = vadd.f32 %v2491_v51, %v2490_v17  ;;  %v2529_v34 = vrot.slane %v2528_v2, 2 }
 0x1fc   : > { %v2493_v36 = vrot.slane %v2492_v6, 1  ;;  %v2530_v31 = vadd.f32 %v2529_v34, %v2528_v2 }
 0x1fe   : > { %v2494_v28 = vadd.f32 %v2493_v36, %v2492_v6  ;;  %v2531_v35 = vrot.slane %v2530_v31, 1 }
 0x200   : > { %2495 = vst [vmem:[%s306_s7] sm:$0x1] %v2494_v28  ;;  %v2532_v27 = vadd.f32 %v2531_v35, %v2530_v31 }
 0x202   : > { %2533 = vst [vmem:[%s313_s28] sm:$0x1] %v2532_v27 }
 0x203 PF: > { %s17_s25 = sadd.s32 1, %s3596_s25   ;;  %s4608_s21 = smov %s3588_s23 }
 0x204   : > { %p14_p9 = scmp.ge.s32.totalorder %s17_s25, 6   ;;  %s4609_s22 = smov %s3592_s24 }
 0x205   : > { %s4610_s23 = smov %s4613_s26  ;;  %s4611_s24 = smov %s4617_s27 }
 0x206   :  { %16 = sbr.rel (!%p14_p9) target bundleno = 3 (0x3), region = 97 }

</bundles_post_ra>
